<compile_context>
chip_gen: v6e
topology: v6e:2x2x1
jax: 0.10.0
libtpu: 0.0.40
codegen_flags: <defaults>
</compile_context>

<pallas_src>
import math
from functools import partial

import jax
import jax.numpy as jnp
from jax.experimental import pallas as pl
from jax.experimental.pallas import tpu as pltpu

NEG_INF = -1e9   # finite additive mask value (avoids NaN on fully-masked rows)
LN_EPS = 1e-5    # torch LayerNorm default


# ----------------------------- Pallas kernels ------------------------------

def _layernorm(x, g, b):
    mean = jnp.mean(x, axis=-1, keepdims=True)
    c = x - mean
    var = jnp.mean(c * c, axis=-1, keepdims=True)
    return c * jax.lax.rsqrt(var + LN_EPS) * g + b


def _make_mha_ln_kernel(*, nhead, dh, scale, use_mask):
    """Fused multi-head attention block: proj -> attention -> out-proj -> +res -> LN."""
    def kernel(*refs):
        if use_mask:
            (xq_ref, xkv_ref, mask_ref, wq_ref, bq_ref, wkv_ref, bkv_ref,
             wo_ref, bo_ref, g_ref, b_ref, o_ref) = refs
        else:
            (xq_ref, xkv_ref, wq_ref, bq_ref, wkv_ref, bkv_ref,
             wo_ref, bo_ref, g_ref, b_ref, o_ref) = refs
            mask_ref = None

        xq = xq_ref[0]        # (Tq, D)
        xkv = xkv_ref[0]      # (Tk, D)
        D = xq.shape[-1]

        # fused projections (Q separate so the same kernel serves cross-attention)
        q = jnp.dot(xq, wq_ref[...], preferred_element_type=jnp.float32) + bq_ref[...]
        kv = jnp.dot(xkv, wkv_ref[...], preferred_element_type=jnp.float32) + bkv_ref[...]
        k = kv[:, :D]
        v = kv[:, D:]

        heads = []
        for h in range(nhead):          # static unroll over heads
            lo = h * dh
            qh = q[:, lo:lo + dh]
            kh = k[:, lo:lo + dh]
            vh = v[:, lo:lo + dh]
            s = jax.lax.dot_general(qh, kh, (((1,), (1,)), ((), ())),
                                    preferred_element_type=jnp.float32) * scale
            if use_mask:
                s = s + mask_ref[0]
            s = s - jnp.max(s, axis=-1, keepdims=True)
            p = jnp.exp(s)
            p = p * pl.reciprocal(jnp.sum(p, axis=-1, keepdims=True), approx=True)
            heads.append(jnp.dot(p, vh, preferred_element_type=jnp.float32))
        ctx = jnp.concatenate(heads, axis=-1)          # (Tq, D) merged, lane-dense

        attn = jnp.dot(ctx, wo_ref[...], preferred_element_type=jnp.float32) + bo_ref[...]
        o_ref[0] = _layernorm(xq + attn, g_ref[...], b_ref[...])
    return kernel


def _ffn_ln_kernel(x_ref, w1_ref, b1_ref, w2_ref, b2_ref, g_ref, b_ref, o_ref):
    # fused: LN(x + relu(x @ W1 + b1) @ W2 + b2)
    x = x_ref[0]
    h = jnp.dot(x, w1_ref[...], preferred_element_type=jnp.float32) + b1_ref[...]
    h = jnp.maximum(h, 0.0)
    f = jnp.dot(h, w2_ref[...], preferred_element_type=jnp.float32) + b2_ref[...]
    o_ref[0] = _layernorm(x + f, g_ref[...], b_ref[...])


def _ln_kernel(x_ref, g_ref, b_ref, o_ref):
    o_ref[0] = _layernorm(x_ref[0], g_ref[...], b_ref[...])


def _ln_linear_kernel(x_ref, g_ref, b_ref, w_ref, bias_ref, o_ref):
    # fused: LN(x) @ W + b   (decoder final norm + prediction head)
    xn = _layernorm(x_ref[0], g_ref[...], b_ref[...])
    o_ref[0] = jnp.dot(xn, w_ref[...], preferred_element_type=jnp.float32) + bias_ref[...]


# ----------------------------- pallas_call helpers ------------------------------

def _per_batch_spec(a):
    n = a.ndim
    return pl.BlockSpec((1,) + a.shape[1:], lambda i, _n=n: (i,) + (0,) * (_n - 1))


def _resident_spec(a):
    n = a.ndim
    return pl.BlockSpec(a.shape, lambda i, _n=n: (0,) * _n)


def _batched_pallas(kernel, per_batch, resident, out_tail, dtype=jnp.float32):
    """Run `kernel` with grid=(B,): one batch element per step; `resident` arrays
    use a constant index_map so they stay in VMEM across the whole grid."""
    B = per_batch[0].shape[0]
    out_tail = tuple(out_tail)
    n_tail = len(out_tail)
    in_specs = ([_per_batch_spec(a) for a in per_batch]
                + [_resident_spec(a) for a in resident])
    return pl.pallas_call(
        kernel,
        out_shape=jax.ShapeDtypeStruct((B,) + out_tail, dtype),
        grid=(B,),
        in_specs=in_specs,
        out_specs=pl.BlockSpec((1,) + out_tail,
                               lambda i: (i,) + (0,) * n_tail),
        compiler_params=pltpu.CompilerParams(dimension_semantics=("parallel",)),
    )(*per_batch, *resident)


# ----------------------------- fused blocks ------------------------------

def mha_ln_block(xq, xkv, p, ln_g, ln_b, *, nhead, mask=None):
    """LN(xq + MHA(xq, xkv, xkv)) — post-LN, one fused kernel."""
    B, Tq, D = xq.shape
    dh = D // nhead
    kernel = _make_mha_ln_kernel(nhead=nhead, dh=dh, scale=1.0 / math.sqrt(dh),
                                 use_mask=mask is not None)
    per_batch = [xq, xkv] + ([mask] if mask is not None else [])
    resident = [p["wq"], p["bq"], p["wkv"], p["bkv"], p["wo"], p["bo"], ln_g, ln_b]
    return _batched_pallas(kernel, per_batch, resident, (Tq, D))


def ffn_ln_block(x, w1, b1, w2, b2, g, b):
    B, S, D = x.shape
    return _batched_pallas(_ffn_ln_kernel, [x], [w1, b1, w2, b2, g, b], (S, D))


def layer_norm(x, g, b):
    B, S, D = x.shape
    return _batched_pallas(_ln_kernel, [x], [g, b], (S, D))


def ln_predict(x, g, b, w, bias):
    B, T, D = x.shape
    V = w.shape[1]
    return _batched_pallas(_ln_linear_kernel, [x], [g, b, w, bias], (T, V))


# ----------------------------- model pieces ------------------------------

def make_pos_embedding(d_model, maxlen=5000):
    den = jnp.exp(-jnp.arange(0, d_model, 2, dtype=jnp.float32)
                  * (math.log(10000.0) / d_model))
    pos = jnp.arange(0, maxlen, dtype=jnp.float32).reshape(maxlen, 1)
    pe = jnp.zeros((maxlen, d_model), jnp.float32)
    pe = pe.at[:, 0::2].set(jnp.sin(pos * den))
    pe = pe.at[:, 1::2].set(jnp.cos(pos * den))
    return pe[None]  # (1, maxlen, d_model)


def seq2seq_transformer_forward(params, enc_inp, dec_inp, tgt_mask,
                                enc_pad_mask, dec_pad_mask, *, nhead):
    pe = params["pos_embedding"]
    B, S = enc_inp.shape
    T = dec_inp.shape[1]

    # embedding gather + positional encoding (dropout = identity in eval mode)
    src = jnp.take(params["enc_emb"], enc_inp, axis=0) + pe[:, :S]
    tgt = jnp.take(params["dec_emb"], dec_inp, axis=0) + pe[:, :T]

    # per-batch additive masks (NOT duplicated per head)
    src_mask = jnp.broadcast_to(
        jnp.where(enc_pad_mask[:, None, :], jnp.float32(NEG_INF), 0.0), (B, S, S))
    tgt_self_mask = (tgt_mask[None, :, :].astype(jnp.float32)
                     + jnp.where(dec_pad_mask[:, None, :], jnp.float32(NEG_INF), 0.0))

    # ---------------- encoder (post-LN) ----------------
    x = src
    for lyr in params["enc_layers"]:
        x = mha_ln_block(x, x, lyr["sa"], lyr["ln1_g"], lyr["ln1_b"],
                         nhead=nhead, mask=src_mask)
        x = ffn_ln_block(x, lyr["w1"], lyr["b1"], lyr["w2"], lyr["b2"],
                         lyr["ln2_g"], lyr["ln2_b"])
    memory = layer_norm(x, params["enc_norm_g"], params["enc_norm_b"])

    # ---------------- decoder (post-LN) ----------------
    y = tgt
    for lyr in params["dec_layers"]:
        y = mha_ln_block(y, y, lyr["sa"], lyr["ln1_g"], lyr["ln1_b"],
                         nhead=nhead, mask=tgt_self_mask)
        # cross-attention: memory_key_padding_mask is None in the reference forward
        y = mha_ln_block(y, memory, lyr["ca"], lyr["ln2_g"], lyr["ln2_b"],
                         nhead=nhead, mask=None)
        y = ffn_ln_block(y, lyr["w1"], lyr["b1"], lyr["w2"], lyr["b2"],
                         lyr["ln3_g"], lyr["ln3_b"])

    # decoder final norm fused with the vocabulary projection
    return ln_predict(y, params["dec_norm_g"], params["dec_norm_b"],
                      params["predict_w"], params["predict_b"])


# ----------------------------- parameter init ------------------------------

def init_params(key, d_model, nhead, n_enc, n_dec, d_ff, enc_voc, dec_voc):
    keys = iter(jax.random.split(key, 256))

    def w(shape, scale=0.02):
        # all projection weights stored pre-transposed: (in_features, out_features)
        return (scale * jax.random.normal(next(keys), shape)).astype(jnp.float32)

    zeros = lambda s: jnp.zeros(s, jnp.float32)
    ones = lambda s: jnp.ones(s, jnp.float32)

    def mha_p():
        return dict(wq=w((d_model, d_model)), bq=zeros((1, d_model)),
                    wkv=w((d_model, 2 * d_model)), bkv=zeros((1, 2 * d_model)),
                    wo=w((d_model, d_model)), bo=zeros((1, d_model)))

    def enc_layer():
        return dict(sa=mha_p(),
                    w1=w((d_model, d_ff)), b1=zeros((1, d_ff)),
                    w2=w((d_ff, d_model)), b2=zeros((1, d_model)),
                    ln1_g=ones((1, d_model)), ln1_b=zeros((1, d_model)),
                    ln2_g=ones((1, d_model)), ln2_b=zeros((1, d_model)))

    def dec_layer():
        d = enc_layer()
        d["ca"] = mha_p()
        d["ln3_g"] = ones((1, d_model))
        d["ln3_b"] = zeros((1, d_model))
        return d

    return dict(
        enc_emb=w((enc_voc, d_model), 1.0),
        dec_emb=w((dec_voc, d_model), 1.0),
        pos_embedding=make_pos_embedding(d_model),
        enc_layers=[enc_layer() for _ in range(n_enc)],
        dec_layers=[dec_layer() for _ in range(n_dec)],
        enc_norm_g=ones((1, d_model)), enc_norm_b=zeros((1, d_model)),
        dec_norm_g=ones((1, d_model)), dec_norm_b=zeros((1, d_model)),
        predict_w=w((d_model, dec_voc)), predict_b=zeros((1, dec_voc)),
    )


# ----------------------------- main ------------------------------

if __name__ == "__main__":
    d_model, nhead = 32, 4
    num_enc_layers, num_dec_layers = 2, 2
    dim_forward = 64
    enc_voc_size, dec_voc_size = 40, 29
    B, S, T = 2, 10, 8

    root = jax.random.PRNGKey(0)
    k_par, k_src, k_tgt = jax.random.split(root, 3)

    params = init_params(k_par, d_model, nhead, num_enc_layers,
                         num_dec_layers, dim_forward, enc_voc_size, dec_voc_size)

    enc_inp = jax.random.randint(k_src, (B, S), 0, enc_voc_size, dtype=jnp.int32)
    dec_inp = jax.random.randint(k_tgt, (B, T), 0, dec_voc_size, dtype=jnp.int32)

    # causal target mask (like nn.Transformer.generate_square_subsequent_mask)
    tgt_mask = jnp.where(jnp.triu(jnp.ones((T, T), bool), k=1),
                         jnp.float32(NEG_INF), jnp.float32(0.0))

    # key-padding masks: True = padded position
    enc_lens = jnp.array([S, 7], jnp.int32)
    dec_lens = jnp.array([T, 6], jnp.int32)
    enc_pad_mask = jnp.arange(S)[None, :] >= enc_lens[:, None]
    dec_pad_mask = jnp.arange(T)[None, :] >= dec_lens[:, None]

    fwd = jax.jit(partial(seq2seq_transformer_forward, nhead=nhead))
    logits = fwd(params, enc_inp, dec_inp, tgt_mask, enc_pad_mask, dec_pad_mask)
    logits = jax.block_until_ready(logits)

    assert logits.shape == (B, T, dec_voc_size), logits.shape
    assert bool(jnp.all(jnp.isfinite(logits)))
    print("KERNEL_OK")
</pallas_src>

<mosaic_0001>
module attributes {stable_mosaic.version = 11 : i64} {
  func.func @_ffn_ln_kernel(%arg0: i32, %arg1: memref<1x10x32xf32, #tpu.memory_space<vmem>>, %arg2: memref<32x64xf32, #tpu.memory_space<vmem>>, %arg3: memref<1x64xf32, #tpu.memory_space<vmem>>, %arg4: memref<64x32xf32, #tpu.memory_space<vmem>>, %arg5: memref<1x32xf32, #tpu.memory_space<vmem>>, %arg6: memref<1x32xf32, #tpu.memory_space<vmem>>, %arg7: memref<1x32xf32, #tpu.memory_space<vmem>>, %arg8: memref<1x10x32xf32, #tpu.memory_space<vmem>>) attributes {dimension_semantics = [#tpu.dimension_semantics<parallel>], iteration_bounds = array<i64: 2>, scalar_prefetch = 0 : i64, scratch_operands = 0 : i64, tpu.core_type = #tpu.core_type<tc>, window_params = [{transform_indices = @transform_0, window_bounds = array<i64: 1, 10, 32>}, {pipeline_mode = #tpu.pipeline_mode<synchronous>, transform_indices = @transform_1, window_bounds = array<i64: 32, 64>}, {pipeline_mode = #tpu.pipeline_mode<synchronous>, transform_indices = @transform_2, window_bounds = array<i64: 1, 64>}, {pipeline_mode = #tpu.pipeline_mode<synchronous>, transform_indices = @transform_3, window_bounds = array<i64: 64, 32>}, {pipeline_mode = #tpu.pipeline_mode<synchronous>, transform_indices = @transform_4, window_bounds = array<i64: 1, 32>}, {pipeline_mode = #tpu.pipeline_mode<synchronous>, transform_indices = @transform_5, window_bounds = array<i64: 1, 32>}, {pipeline_mode = #tpu.pipeline_mode<synchronous>, transform_indices = @transform_6, window_bounds = array<i64: 1, 32>}, {transform_indices = @transform_7, window_bounds = array<i64: 1, 10, 32>}]} {
    %c0 = arith.constant 0 : index
    %c0_0 = arith.constant 0 : index
    %c0_1 = arith.constant 0 : index
    %0 = vector.load %arg1[%c0, %c0_0, %c0_1] : memref<1x10x32xf32, #tpu.memory_space<vmem>>, vector<1x10x32xf32>
    %1 = vector.shape_cast %0 : vector<1x10x32xf32> to vector<10x32xf32>
    %c0_2 = arith.constant 0 : index
    %c0_3 = arith.constant 0 : index
    %2 = vector.load %arg2[%c0_2, %c0_3] : memref<32x64xf32, #tpu.memory_space<vmem>>, vector<32x64xf32>
    %cst = arith.constant dense<0.000000e+00> : vector<10x64xf32>
    %3 = tpu.matmul %1, %2, %cst {dimension_numbers = #tpu.dot_dimension_numbers<[1], [0], [0], [1], [0, 0, 1, 1], [], []>} : vector<10x32xf32>, vector<32x64xf32>, vector<10x64xf32> -> vector<10x64xf32>
    %c0_4 = arith.constant 0 : index
    %c0_5 = arith.constant 0 : index
    %4 = vector.load %arg3[%c0_4, %c0_5] : memref<1x64xf32, #tpu.memory_space<vmem>>, vector<1x64xf32>
    %5 = vector.broadcast %4 : vector<1x64xf32> to vector<10x64xf32>
    %6 = arith.addf %3, %5 : vector<10x64xf32>
    %cst_6 = arith.constant 0.000000e+00 : f32
    %7 = vector.broadcast %cst_6 : f32 to vector<10x64xf32>
    %8 = arith.maximumf %6, %7 : vector<10x64xf32>
    %c0_7 = arith.constant 0 : index
    %c0_8 = arith.constant 0 : index
    %9 = vector.load %arg4[%c0_7, %c0_8] : memref<64x32xf32, #tpu.memory_space<vmem>>, vector<64x32xf32>
    %cst_9 = arith.constant dense<0.000000e+00> : vector<10x32xf32>
    %10 = tpu.matmul %8, %9, %cst_9 {dimension_numbers = #tpu.dot_dimension_numbers<[1], [0], [0], [1], [0, 0, 1, 1], [], []>} : vector<10x64xf32>, vector<64x32xf32>, vector<10x32xf32> -> vector<10x32xf32>
    %c0_10 = arith.constant 0 : index
    %c0_11 = arith.constant 0 : index
    %11 = vector.load %arg5[%c0_10, %c0_11] : memref<1x32xf32, #tpu.memory_space<vmem>>, vector<1x32xf32>
    %12 = vector.broadcast %11 : vector<1x32xf32> to vector<10x32xf32>
    %13 = arith.addf %10, %12 : vector<10x32xf32>
    %14 = arith.addf %1, %13 : vector<10x32xf32>
    %c0_12 = arith.constant 0 : index
    %c0_13 = arith.constant 0 : index
    %15 = vector.load %arg6[%c0_12, %c0_13] : memref<1x32xf32, #tpu.memory_space<vmem>>, vector<1x32xf32>
    %c0_14 = arith.constant 0 : index
    %c0_15 = arith.constant 0 : index
    %16 = vector.load %arg7[%c0_14, %c0_15] : memref<1x32xf32, #tpu.memory_space<vmem>>, vector<1x32xf32>
    %cst_16 = arith.constant dense<0.000000e+00> : vector<10xf32>
    %17 = vector.multi_reduction <add>, %14, %cst_16 [1] : vector<10x32xf32> to vector<10xf32>
    %18 = vector.shape_cast %17 : vector<10xf32> to vector<10x1xf32>
    %cst_17 = arith.constant 3.200000e+01 : f32
    %19 = vector.broadcast %cst_17 : f32 to vector<10x1xf32>
    %20 = arith.divf %18, %19 : vector<10x1xf32>
    %21 = vector.broadcast %20 : vector<10x1xf32> to vector<10x32xf32>
    %22 = arith.subf %14, %21 : vector<10x32xf32>
    %23 = arith.mulf %22, %22 : vector<10x32xf32>
    %cst_18 = arith.constant dense<0.000000e+00> : vector<10xf32>
    %24 = vector.multi_reduction <add>, %23, %cst_18 [1] : vector<10x32xf32> to vector<10xf32>
    %25 = vector.shape_cast %24 : vector<10xf32> to vector<10x1xf32>
    %cst_19 = arith.constant 3.200000e+01 : f32
    %26 = vector.broadcast %cst_19 : f32 to vector<10x1xf32>
    %27 = arith.divf %25, %26 : vector<10x1xf32>
    %cst_20 = arith.constant 9.99999974E-6 : f32
    %28 = vector.broadcast %cst_20 : f32 to vector<10x1xf32>
    %29 = arith.addf %27, %28 : vector<10x1xf32>
    %30 = math.rsqrt %29 : vector<10x1xf32>
    %31 = vector.broadcast %30 : vector<10x1xf32> to vector<10x32xf32>
    %32 = arith.mulf %22, %31 : vector<10x32xf32>
    %33 = vector.broadcast %15 : vector<1x32xf32> to vector<10x32xf32>
    %34 = arith.mulf %32, %33 : vector<10x32xf32>
    %35 = vector.broadcast %16 : vector<1x32xf32> to vector<10x32xf32>
    %36 = arith.addf %34, %35 : vector<10x32xf32>
    %c0_21 = arith.constant 0 : index
    %c0_22 = arith.constant 0 : index
    %c0_23 = arith.constant 0 : index
    %37 = vector.load %arg8[%c0_21, %c0_22, %c0_23] : memref<1x10x32xf32, #tpu.memory_space<vmem>>, vector<1x10x32xf32>
    %38 = vector.shape_cast %37 : vector<1x10x32xf32> to vector<10x32xf32>
    %39 = vector.shape_cast %36 : vector<10x32xf32> to vector<1x10x32xf32>
    tpu.vector_store %arg8[%c0_21, %c0_22, %c0_23], %39 {strides = array<i32>} : memref<1x10x32xf32, #tpu.memory_space<vmem>>, vector<1x10x32xf32>,
    return
  }
  func.func @transform_0(%arg0: i32) -> (i32, i32, i32) {
    %c0_i32 = arith.constant 0 : i32
    %c0_i32_0 = arith.constant 0 : i32
    %c0_i32_1 = arith.constant 0 : i32
    return %arg0, %c0_i32, %c0_i32_0 : i32, i32, i32
  }
  func.func @transform_1(%arg0: i32) -> (i32, i32) {
    %c0_i32 = arith.constant 0 : i32
    %c0_i32_0 = arith.constant 0 : i32
    %c0_i32_1 = arith.constant 0 : i32
    return %c0_i32, %c0_i32_0 : i32, i32
  }
  func.func @transform_2(%arg0: i32) -> (i32, i32) {
    %c0_i32 = arith.constant 0 : i32
    %c0_i32_0 = arith.constant 0 : i32
    %c0_i32_1 = arith.constant 0 : i32
    return %c0_i32, %c0_i32_0 : i32, i32
  }
  func.func @transform_3(%arg0: i32) -> (i32, i32) {
    %c0_i32 = arith.constant 0 : i32
    %c0_i32_0 = arith.constant 0 : i32
    %c0_i32_1 = arith.constant 0 : i32
    return %c0_i32, %c0_i32_0 : i32, i32
  }
  func.func @transform_4(%arg0: i32) -> (i32, i32) {
    %c0_i32 = arith.constant 0 : i32
    %c0_i32_0 = arith.constant 0 : i32
    %c0_i32_1 = arith.constant 0 : i32
    return %c0_i32, %c0_i32_0 : i32, i32
  }
  func.func @transform_5(%arg0: i32) -> (i32, i32) {
    %c0_i32 = arith.constant 0 : i32
    %c0_i32_0 = arith.constant 0 : i32
    %c0_i32_1 = arith.constant 0 : i32
    return %c0_i32, %c0_i32_0 : i32, i32
  }
  func.func @transform_6(%arg0: i32) -> (i32, i32) {
    %c0_i32 = arith.constant 0 : i32
    %c0_i32_0 = arith.constant 0 : i32
    %c0_i32_1 = arith.constant 0 : i32
    return %c0_i32, %c0_i32_0 : i32, i32
  }
  func.func @transform_7(%arg0: i32) -> (i32, i32, i32) {
    %c0_i32 = arith.constant 0 : i32
    %c0_i32_0 = arith.constant 0 : i32
    %c0_i32_1 = arith.constant 0 : i32
    return %arg0, %c0_i32, %c0_i32_0 : i32, i32, i32
  }
}

module attributes {stable_mosaic.version = 11 : i64} {
  func.func @kernel(%arg0: i32, %arg1: memref<1x10x32xf32, #tpu.memory_space<vmem>>, %arg2: memref<1x10x32xf32, #tpu.memory_space<vmem>>, %arg3: memref<1x10x10xf32, #tpu.memory_space<vmem>>, %arg4: memref<32x32xf32, #tpu.memory_space<vmem>>, %arg5: memref<1x32xf32, #tpu.memory_space<vmem>>, %arg6: memref<32x64xf32, #tpu.memory_space<vmem>>, %arg7: memref<1x64xf32, #tpu.memory_space<vmem>>, %arg8: memref<32x32xf32, #tpu.memory_space<vmem>>, %arg9: memref<1x32xf32, #tpu.memory_space<vmem>>, %arg10: memref<1x32xf32, #tpu.memory_space<vmem>>, %arg11: memref<1x32xf32, #tpu.memory_space<vmem>>, %arg12: memref<1x10x32xf32, #tpu.memory_space<vmem>>) attributes {dimension_semantics = [#tpu.dimension_semantics<parallel>], iteration_bounds = array<i64: 2>, scalar_prefetch = 0 : i64, scratch_operands = 0 : i64, tpu.core_type = #tpu.core_type<tc>, window_params = [{transform_indices = @transform_0, window_bounds = array<i64: 1, 10, 32>}, {transform_indices = @transform_1, window_bounds = array<i64: 1, 10, 32>}, {transform_indices = @transform_2, window_bounds = array<i64: 1, 10, 10>}, {pipeline_mode = #tpu.pipeline_mode<synchronous>, transform_indices = @transform_3, window_bounds = array<i64: 32, 32>}, {pipeline_mode = #tpu.pipeline_mode<synchronous>, transform_indices = @transform_4, window_bounds = array<i64: 1, 32>}, {pipeline_mode = #tpu.pipeline_mode<synchronous>, transform_indices = @transform_5, window_bounds = array<i64: 32, 64>}, {pipeline_mode = #tpu.pipeline_mode<synchronous>, transform_indices = @transform_6, window_bounds = array<i64: 1, 64>}, {pipeline_mode = #tpu.pipeline_mode<synchronous>, transform_indices = @transform_7, window_bounds = array<i64: 32, 32>}, {pipeline_mode = #tpu.pipeline_mode<synchronous>, transform_indices = @transform_8, window_bounds = array<i64: 1, 32>}, {pipeline_mode = #tpu.pipeline_mode<synchronous>, transform_indices = @transform_9, window_bounds = array<i64: 1, 32>}, {pipeline_mode = #tpu.pipeline_mode<synchronous>, transform_indices = @transform_10, window_bounds = array<i64: 1, 32>}, {transform_indices = @transform_11, window_bounds = array<i64: 1, 10, 32>}]} {
    %c0 = arith.constant 0 : index
    %c0_0 = arith.constant 0 : index
    %c0_1 = arith.constant 0 : index
    %0 = vector.load %arg1[%c0, %c0_0, %c0_1] : memref<1x10x32xf32, #tpu.memory_space<vmem>>, vector<1x10x32xf32>
    %1 = vector.shape_cast %0 : vector<1x10x32xf32> to vector<10x32xf32>
    %c0_2 = arith.constant 0 : index
    %c0_3 = arith.constant 0 : index
    %c0_4 = arith.constant 0 : index
    %2 = vector.load %arg2[%c0_2, %c0_3, %c0_4] : memref<1x10x32xf32, #tpu.memory_space<vmem>>, vector<1x10x32xf32>
    %3 = vector.shape_cast %2 : vector<1x10x32xf32> to vector<10x32xf32>
    %c0_5 = arith.constant 0 : index
    %c0_6 = arith.constant 0 : index
    %4 = vector.load %arg4[%c0_5, %c0_6] : memref<32x32xf32, #tpu.memory_space<vmem>>, vector<32x32xf32>
    %cst = arith.constant dense<0.000000e+00> : vector<10x32xf32>
    %5 = tpu.matmul %1, %4, %cst {dimension_numbers = #tpu.dot_dimension_numbers<[1], [0], [0], [1], [0, 0, 1, 1], [], []>} : vector<10x32xf32>, vector<32x32xf32>, vector<10x32xf32> -> vector<10x32xf32>
    %c0_7 = arith.constant 0 : index
    %c0_8 = arith.constant 0 : index
    %6 = vector.load %arg5[%c0_7, %c0_8] : memref<1x32xf32, #tpu.memory_space<vmem>>, vector<1x32xf32>
    %7 = vector.broadcast %6 : vector<1x32xf32> to vector<10x32xf32>
    %8 = arith.addf %5, %7 : vector<10x32xf32>
    %c0_9 = arith.constant 0 : index
    %c0_10 = arith.constant 0 : index
    %9 = vector.load %arg6[%c0_9, %c0_10] : memref<32x64xf32, #tpu.memory_space<vmem>>, vector<32x64xf32>
    %cst_11 = arith.constant dense<0.000000e+00> : vector<10x64xf32>
    %10 = tpu.matmul %3, %9, %cst_11 {dimension_numbers = #tpu.dot_dimension_numbers<[1], [0], [0], [1], [0, 0, 1, 1], [], []>} : vector<10x32xf32>, vector<32x64xf32>, vector<10x64xf32> -> vector<10x64xf32>
    %c0_12 = arith.constant 0 : index
    %c0_13 = arith.constant 0 : index
    %11 = vector.load %arg7[%c0_12, %c0_13] : memref<1x64xf32, #tpu.memory_space<vmem>>, vector<1x64xf32>
    %12 = vector.broadcast %11 : vector<1x64xf32> to vector<10x64xf32>
    %13 = arith.addf %10, %12 : vector<10x64xf32>
    %14 = vector.extract_strided_slice %13 {offsets = [0, 0], sizes = [10, 32], strides = [1, 1]} : vector<10x64xf32> to vector<10x32xf32>
    %15 = vector.extract_strided_slice %13 {offsets = [0, 32], sizes = [10, 32], strides = [1, 1]} : vector<10x64xf32> to vector<10x32xf32>
    %16 = vector.extract_strided_slice %8 {offsets = [0, 0], sizes = [10, 8], strides = [1, 1]} : vector<10x32xf32> to vector<10x8xf32>
    %17 = vector.extract_strided_slice %14 {offsets = [0, 0], sizes = [10, 8], strides = [1, 1]} : vector<10x32xf32> to vector<10x8xf32>
    %18 = vector.extract_strided_slice %15 {offsets = [0, 0], sizes = [10, 8], strides = [1, 1]} : vector<10x32xf32> to vector<10x8xf32>
    %cst_14 = arith.constant dense<0.000000e+00> : vector<10x10xf32>
    %19 = tpu.matmul %16, %17, %cst_14 {dimension_numbers = #tpu.dot_dimension_numbers<[1], [1], [0], [0], [0, 0, 1, 0], [], []>} : vector<10x8xf32>, vector<10x8xf32>, vector<10x10xf32> -> vector<10x10xf32>
    %cst_15 = arith.constant 0.353553385 : f32
    %20 = vector.broadcast %cst_15 : f32 to vector<10x10xf32>
    %21 = arith.mulf %19, %20 : vector<10x10xf32>
    %c0_16 = arith.constant 0 : index
    %c0_17 = arith.constant 0 : index
    %c0_18 = arith.constant 0 : index
    %22 = vector.load %arg3[%c0_16, %c0_17, %c0_18] : memref<1x10x10xf32, #tpu.memory_space<vmem>>, vector<1x10x10xf32>
    %23 = vector.shape_cast %22 : vector<1x10x10xf32> to vector<10x10xf32>
    %24 = arith.addf %21, %23 : vector<10x10xf32>
    %cst_19 = arith.constant dense<0xFF800000> : vector<10xf32>
    %25 = vector.multi_reduction <maximumf>, %24, %cst_19 [1] : vector<10x10xf32> to vector<10xf32>
    %26 = vector.shape_cast %25 : vector<10xf32> to vector<10x1xf32>
    %27 = vector.broadcast %26 : vector<10x1xf32> to vector<10x10xf32>
    %28 = arith.subf %24, %27 : vector<10x10xf32>
    %29 = math.exp %28 : vector<10x10xf32>
    %cst_20 = arith.constant dense<0.000000e+00> : vector<10xf32>
    %30 = vector.multi_reduction <add>, %29, %cst_20 [1] : vector<10x10xf32> to vector<10xf32>
    %31 = vector.shape_cast %30 : vector<10xf32> to vector<10x1xf32>
    %32 = tpu.reciprocal %31 {approx = true} : vector<10x1xf32> -> vector<10x1xf32>
    %33 = vector.broadcast %32 : vector<10x1xf32> to vector<10x10xf32>
    %34 = arith.mulf %29, %33 : vector<10x10xf32>
    %cst_21 = arith.constant dense<0.000000e+00> : vector<10x8xf32>
    %35 = tpu.matmul %34, %18, %cst_21 {dimension_numbers = #tpu.dot_dimension_numbers<[1], [0], [0], [1], [0, 0, 1, 1], [], []>} : vector<10x10xf32>, vector<10x8xf32>, vector<10x8xf32> -> vector<10x8xf32>
    %36 = vector.extract_strided_slice %8 {offsets = [0, 8], sizes = [10, 8], strides = [1, 1]} : vector<10x32xf32> to vector<10x8xf32>
    %37 = vector.extract_strided_slice %14 {offsets = [0, 8], sizes = [10, 8], strides = [1, 1]} : vector<10x32xf32> to vector<10x8xf32>
    %38 = vector.extract_strided_slice %15 {offsets = [0, 8], sizes = [10, 8], strides = [1, 1]} : vector<10x32xf32> to vector<10x8xf32>
    %cst_22 = arith.constant dense<0.000000e+00> : vector<10x10xf32>
    %39 = tpu.matmul %36, %37, %cst_22 {dimension_numbers = #tpu.dot_dimension_numbers<[1], [1], [0], [0], [0, 0, 1, 0], [], []>} : vector<10x8xf32>, vector<10x8xf32>, vector<10x10xf32> -> vector<10x10xf32>
    %cst_23 = arith.constant 0.353553385 : f32
    %40 = vector.broadcast %cst_23 : f32 to vector<10x10xf32>
    %41 = arith.mulf %39, %40 : vector<10x10xf32>
    %c0_24 = arith.constant 0 : index
    %c0_25 = arith.constant 0 : index
    %c0_26 = arith.constant 0 : index
    %42 = vector.load %arg3[%c0_24, %c0_25, %c0_26] : memref<1x10x10xf32, #tpu.memory_space<vmem>>, vector<1x10x10xf32>
    %43 = vector.shape_cast %42 : vector<1x10x10xf32> to vector<10x10xf32>
    %44 = arith.addf %41, %43 : vector<10x10xf32>
    %cst_27 = arith.constant dense<0xFF800000> : vector<10xf32>
    %45 = vector.multi_reduction <maximumf>, %44, %cst_27 [1] : vector<10x10xf32> to vector<10xf32>
    %46 = vector.shape_cast %45 : vector<10xf32> to vector<10x1xf32>
    %47 = vector.broadcast %46 : vector<10x1xf32> to vector<10x10xf32>
    %48 = arith.subf %44, %47 : vector<10x10xf32>
    %49 = math.exp %48 : vector<10x10xf32>
    %cst_28 = arith.constant dense<0.000000e+00> : vector<10xf32>
    %50 = vector.multi_reduction <add>, %49, %cst_28 [1] : vector<10x10xf32> to vector<10xf32>
    %51 = vector.shape_cast %50 : vector<10xf32> to vector<10x1xf32>
    %52 = tpu.reciprocal %51 {approx = true} : vector<10x1xf32> -> vector<10x1xf32>
    %53 = vector.broadcast %52 : vector<10x1xf32> to vector<10x10xf32>
    %54 = arith.mulf %49, %53 : vector<10x10xf32>
    %cst_29 = arith.constant dense<0.000000e+00> : vector<10x8xf32>
    %55 = tpu.matmul %54, %38, %cst_29 {dimension_numbers = #tpu.dot_dimension_numbers<[1], [0], [0], [1], [0, 0, 1, 1], [], []>} : vector<10x10xf32>, vector<10x8xf32>, vector<10x8xf32> -> vector<10x8xf32>
    %56 = vector.extract_strided_slice %8 {offsets = [0, 16], sizes = [10, 8], strides = [1, 1]} : vector<10x32xf32> to vector<10x8xf32>
    %57 = vector.extract_strided_slice %14 {offsets = [0, 16], sizes = [10, 8], strides = [1, 1]} : vector<10x32xf32> to vector<10x8xf32>
    %58 = vector.extract_strided_slice %15 {offsets = [0, 16], sizes = [10, 8], strides = [1, 1]} : vector<10x32xf32> to vector<10x8xf32>
    %cst_30 = arith.constant dense<0.000000e+00> : vector<10x10xf32>
    %59 = tpu.matmul %56, %57, %cst_30 {dimension_numbers = #tpu.dot_dimension_numbers<[1], [1], [0], [0], [0, 0, 1, 0], [], []>} : vector<10x8xf32>, vector<10x8xf32>, vector<10x10xf32> -> vector<10x10xf32>
    %cst_31 = arith.constant 0.353553385 : f32
    %60 = vector.broadcast %cst_31 : f32 to vector<10x10xf32>
    %61 = arith.mulf %59, %60 : vector<10x10xf32>
    %c0_32 = arith.constant 0 : index
    %c0_33 = arith.constant 0 : index
    %c0_34 = arith.constant 0 : index
    %62 = vector.load %arg3[%c0_32, %c0_33, %c0_34] : memref<1x10x10xf32, #tpu.memory_space<vmem>>, vector<1x10x10xf32>
    %63 = vector.shape_cast %62 : vector<1x10x10xf32> to vector<10x10xf32>
    %64 = arith.addf %61, %63 : vector<10x10xf32>
    %cst_35 = arith.constant dense<0xFF800000> : vector<10xf32>
    %65 = vector.multi_reduction <maximumf>, %64, %cst_35 [1] : vector<10x10xf32> to vector<10xf32>
    %66 = vector.shape_cast %65 : vector<10xf32> to vector<10x1xf32>
    %67 = vector.broadcast %66 : vector<10x1xf32> to vector<10x10xf32>
    %68 = arith.subf %64, %67 : vector<10x10xf32>
    %69 = math.exp %68 : vector<10x10xf32>
    %cst_36 = arith.constant dense<0.000000e+00> : vector<10xf32>
    %70 = vector.multi_reduction <add>, %69, %cst_36 [1] : vector<10x10xf32> to vector<10xf32>
    %71 = vector.shape_cast %70 : vector<10xf32> to vector<10x1xf32>
    %72 = tpu.reciprocal %71 {approx = true} : vector<10x1xf32> -> vector<10x1xf32>
    %73 = vector.broadcast %72 : vector<10x1xf32> to vector<10x10xf32>
    %74 = arith.mulf %69, %73 : vector<10x10xf32>
    %cst_37 = arith.constant dense<0.000000e+00> : vector<10x8xf32>
    %75 = tpu.matmul %74, %58, %cst_37 {dimension_numbers = #tpu.dot_dimension_numbers<[1], [0], [0], [1], [0, 0, 1, 1], [], []>} : vector<10x10xf32>, vector<10x8xf32>, vector<10x8xf32> -> vector<10x8xf32>
    %76 = vector.extract_strided_slice %8 {offsets = [0, 24], sizes = [10, 8], strides = [1, 1]} : vector<10x32xf32> to vector<10x8xf32>
    %77 = vector.extract_strided_slice %14 {offsets = [0, 24], sizes = [10, 8], strides = [1, 1]} : vector<10x32xf32> to vector<10x8xf32>
    %78 = vector.extract_strided_slice %15 {offsets = [0, 24], sizes = [10, 8], strides = [1, 1]} : vector<10x32xf32> to vector<10x8xf32>
    %cst_38 = arith.constant dense<0.000000e+00> : vector<10x10xf32>
    %79 = tpu.matmul %76, %77, %cst_38 {dimension_numbers = #tpu.dot_dimension_numbers<[1], [1], [0], [0], [0, 0, 1, 0], [], []>} : vector<10x8xf32>, vector<10x8xf32>, vector<10x10xf32> -> vector<10x10xf32>
    %cst_39 = arith.constant 0.353553385 : f32
    %80 = vector.broadcast %cst_39 : f32 to vector<10x10xf32>
    %81 = arith.mulf %79, %80 : vector<10x10xf32>
    %c0_40 = arith.constant 0 : index
    %c0_41 = arith.constant 0 : index
    %c0_42 = arith.constant 0 : index
    %82 = vector.load %arg3[%c0_40, %c0_41, %c0_42] : memref<1x10x10xf32, #tpu.memory_space<vmem>>, vector<1x10x10xf32>
    %83 = vector.shape_cast %82 : vector<1x10x10xf32> to vector<10x10xf32>
    %84 = arith.addf %81, %83 : vector<10x10xf32>
    %cst_43 = arith.constant dense<0xFF800000> : vector<10xf32>
    %85 = vector.multi_reduction <maximumf>, %84, %cst_43 [1] : vector<10x10xf32> to vector<10xf32>
    %86 = vector.shape_cast %85 : vector<10xf32> to vector<10x1xf32>
    %87 = vector.broadcast %86 : vector<10x1xf32> to vector<10x10xf32>
    %88 = arith.subf %84, %87 : vector<10x10xf32>
    %89 = math.exp %88 : vector<10x10xf32>
    %cst_44 = arith.constant dense<0.000000e+00> : vector<10xf32>
    %90 = vector.multi_reduction <add>, %89, %cst_44 [1] : vector<10x10xf32> to vector<10xf32>
    %91 = vector.shape_cast %90 : vector<10xf32> to vector<10x1xf32>
    %92 = tpu.reciprocal %91 {approx = true} : vector<10x1xf32> -> vector<10x1xf32>
    %93 = vector.broadcast %92 : vector<10x1xf32> to vector<10x10xf32>
    %94 = arith.mulf %89, %93 : vector<10x10xf32>
    %cst_45 = arith.constant dense<0.000000e+00> : vector<10x8xf32>
    %95 = tpu.matmul %94, %78, %cst_45 {dimension_numbers = #tpu.dot_dimension_numbers<[1], [0], [0], [1], [0, 0, 1, 1], [], []>} : vector<10x10xf32>, vector<10x8xf32>, vector<10x8xf32> -> vector<10x8xf32>
    %96 = tpu.concatenate %35, %55, %75, %95 in 1 : vector<10x8xf32>, vector<10x8xf32>, vector<10x8xf32>, vector<10x8xf32> -> vector<10x32xf32>
    %c0_46 = arith.constant 0 : index
    %c0_47 = arith.constant 0 : index
    %97 = vector.load %arg8[%c0_46, %c0_47] : memref<32x32xf32, #tpu.memory_space<vmem>>, vector<32x32xf32>
    %cst_48 = arith.constant dense<0.000000e+00> : vector<10x32xf32>
    %98 = tpu.matmul %96, %97, %cst_48 {dimension_numbers = #tpu.dot_dimension_numbers<[1], [0], [0], [1], [0, 0, 1, 1], [], []>} : vector<10x32xf32>, vector<32x32xf32>, vector<10x32xf32> -> vector<10x32xf32>
    %c0_49 = arith.constant 0 : index
    %c0_50 = arith.constant 0 : index
    %99 = vector.load %arg9[%c0_49, %c0_50] : memref<1x32xf32, #tpu.memory_space<vmem>>, vector<1x32xf32>
    %100 = vector.broadcast %99 : vector<1x32xf32> to vector<10x32xf32>
    %101 = arith.addf %98, %100 : vector<10x32xf32>
    %102 = arith.addf %1, %101 : vector<10x32xf32>
    %c0_51 = arith.constant 0 : index
    %c0_52 = arith.constant 0 : index
    %103 = vector.load %arg10[%c0_51, %c0_52] : memref<1x32xf32, #tpu.memory_space<vmem>>, vector<1x32xf32>
    %c0_53 = arith.constant 0 : index
    %c0_54 = arith.constant 0 : index
    %104 = vector.load %arg11[%c0_53, %c0_54] : memref<1x32xf32, #tpu.memory_space<vmem>>, vector<1x32xf32>
    %cst_55 = arith.constant dense<0.000000e+00> : vector<10xf32>
    %105 = vector.multi_reduction <add>, %102, %cst_55 [1] : vector<10x32xf32> to vector<10xf32>
    %106 = vector.shape_cast %105 : vector<10xf32> to vector<10x1xf32>
    %cst_56 = arith.constant 3.200000e+01 : f32
    %107 = vector.broadcast %cst_56 : f32 to vector<10x1xf32>
    %108 = arith.divf %106, %107 : vector<10x1xf32>
    %109 = vector.broadcast %108 : vector<10x1xf32> to vector<10x32xf32>
    %110 = arith.subf %102, %109 : vector<10x32xf32>
    %111 = arith.mulf %110, %110 : vector<10x32xf32>
    %cst_57 = arith.constant dense<0.000000e+00> : vector<10xf32>
    %112 = vector.multi_reduction <add>, %111, %cst_57 [1] : vector<10x32xf32> to vector<10xf32>
    %113 = vector.shape_cast %112 : vector<10xf32> to vector<10x1xf32>
    %cst_58 = arith.constant 3.200000e+01 : f32
    %114 = vector.broadcast %cst_58 : f32 to vector<10x1xf32>
    %115 = arith.divf %113, %114 : vector<10x1xf32>
    %cst_59 = arith.constant 9.99999974E-6 : f32
    %116 = vector.broadcast %cst_59 : f32 to vector<10x1xf32>
    %117 = arith.addf %115, %116 : vector<10x1xf32>
    %118 = math.rsqrt %117 : vector<10x1xf32>
    %119 = vector.broadcast %118 : vector<10x1xf32> to vector<10x32xf32>
    %120 = arith.mulf %110, %119 : vector<10x32xf32>
    %121 = vector.broadcast %103 : vector<1x32xf32> to vector<10x32xf32>
    %122 = arith.mulf %120, %121 : vector<10x32xf32>
    %123 = vector.broadcast %104 : vector<1x32xf32> to vector<10x32xf32>
    %124 = arith.addf %122, %123 : vector<10x32xf32>
    %c0_60 = arith.constant 0 : index
    %c0_61 = arith.constant 0 : index
    %c0_62 = arith.constant 0 : index
    %125 = vector.load %arg12[%c0_60, %c0_61, %c0_62] : memref<1x10x32xf32, #tpu.memory_space<vmem>>, vector<1x10x32xf32>
    %126 = vector.shape_cast %125 : vector<1x10x32xf32> to vector<10x32xf32>
    %127 = vector.shape_cast %124 : vector<10x32xf32> to vector<1x10x32xf32>
    tpu.vector_store %arg12[%c0_60, %c0_61, %c0_62], %127 {strides = array<i32>} : memref<1x10x32xf32, #tpu.memory_space<vmem>>, vector<1x10x32xf32>,
    return
  }
  func.func @transform_0(%arg0: i32) -> (i32, i32, i32) {
    %c0_i32 = arith.constant 0 : i32
    %c0_i32_0 = arith.constant 0 : i32
    %c0_i32_1 = arith.constant 0 : i32
    return %arg0, %c0_i32, %c0_i32_0 : i32, i32, i32
  }
  func.func @transform_1(%arg0: i32) -> (i32, i32, i32) {
    %c0_i32 = arith.constant 0 : i32
    %c0_i32_0 = arith.constant 0 : i32
    %c0_i32_1 = arith.constant 0 : i32
    return %arg0, %c0_i32, %c0_i32_0 : i32, i32, i32
  }
  func.func @transform_2(%arg0: i32) -> (i32, i32, i32) {
    %c0_i32 = arith.constant 0 : i32
    %c0_i32_0 = arith.constant 0 : i32
    %c0_i32_1 = arith.constant 0 : i32
    return %arg0, %c0_i32, %c0_i32_0 : i32, i32, i32
  }
  func.func @transform_3(%arg0: i32) -> (i32, i32) {
    %c0_i32 = arith.constant 0 : i32
    %c0_i32_0 = arith.constant 0 : i32
    %c0_i32_1 = arith.constant 0 : i32
    return %c0_i32, %c0_i32_0 : i32, i32
  }
  func.func @transform_4(%arg0: i32) -> (i32, i32) {
    %c0_i32 = arith.constant 0 : i32
    %c0_i32_0 = arith.constant 0 : i32
    %c0_i32_1 = arith.constant 0 : i32
    return %c0_i32, %c0_i32_0 : i32, i32
  }
  func.func @transform_5(%arg0: i32) -> (i32, i32) {
    %c0_i32 = arith.constant 0 : i32
    %c0_i32_0 = arith.constant 0 : i32
    %c0_i32_1 = arith.constant 0 : i32
    return %c0_i32, %c0_i32_0 : i32, i32
  }
  func.func @transform_6(%arg0: i32) -> (i32, i32) {
    %c0_i32 = arith.constant 0 : i32
    %c0_i32_0 = arith.constant 0 : i32
    %c0_i32_1 = arith.constant 0 : i32
    return %c0_i32, %c0_i32_0 : i32, i32
  }
  func.func @transform_7(%arg0: i32) -> (i32, i32) {
    %c0_i32 = arith.constant 0 : i32
    %c0_i32_0 = arith.constant 0 : i32
    %c0_i32_1 = arith.constant 0 : i32
    return %c0_i32, %c0_i32_0 : i32, i32
  }
  func.func @transform_8(%arg0: i32) -> (i32, i32) {
    %c0_i32 = arith.constant 0 : i32
    %c0_i32_0 = arith.constant 0 : i32
    %c0_i32_1 = arith.constant 0 : i32
    return %c0_i32, %c0_i32_0 : i32, i32
  }
  func.func @transform_9(%arg0: i32) -> (i32, i32) {
    %c0_i32 = arith.constant 0 : i32
    %c0_i32_0 = arith.constant 0 : i32
    %c0_i32_1 = arith.constant 0 : i32
    return %c0_i32, %c0_i32_0 : i32, i32
  }
  func.func @transform_10(%arg0: i32) -> (i32, i32) {
    %c0_i32 = arith.constant 0 : i32
    %c0_i32_0 = arith.constant 0 : i32
    %c0_i32_1 = arith.constant 0 : i32
    return %c0_i32, %c0_i32_0 : i32, i32
  }
  func.func @transform_11(%arg0: i32) -> (i32, i32, i32) {
    %c0_i32 = arith.constant 0 : i32
    %c0_i32_0 = arith.constant 0 : i32
    %c0_i32_1 = arith.constant 0 : i32
    return %arg0, %c0_i32, %c0_i32_0 : i32, i32, i32
  }
}

module attributes {stable_mosaic.version = 11 : i64} {
  func.func @_ln_kernel(%arg0: i32, %arg1: memref<1x10x32xf32, #tpu.memory_space<vmem>>, %arg2: memref<1x32xf32, #tpu.memory_space<vmem>>, %arg3: memref<1x32xf32, #tpu.memory_space<vmem>>, %arg4: memref<1x10x32xf32, #tpu.memory_space<vmem>>) attributes {dimension_semantics = [#tpu.dimension_semantics<parallel>], iteration_bounds = array<i64: 2>, scalar_prefetch = 0 : i64, scratch_operands = 0 : i64, tpu.core_type = #tpu.core_type<tc>, window_params = [{transform_indices = @transform_0, window_bounds = array<i64: 1, 10, 32>}, {pipeline_mode = #tpu.pipeline_mode<synchronous>, transform_indices = @transform_1, window_bounds = array<i64: 1, 32>}, {pipeline_mode = #tpu.pipeline_mode<synchronous>, transform_indices = @transform_2, window_bounds = array<i64: 1, 32>}, {transform_indices = @transform_3, window_bounds = array<i64: 1, 10, 32>}]} {
    %c0 = arith.constant 0 : index
    %c0_0 = arith.constant 0 : index
    %c0_1 = arith.constant 0 : index
    %0 = vector.load %arg1[%c0, %c0_0, %c0_1] : memref<1x10x32xf32, #tpu.memory_space<vmem>>, vector<1x10x32xf32>
    %1 = vector.shape_cast %0 : vector<1x10x32xf32> to vector<10x32xf32>
    %c0_2 = arith.constant 0 : index
    %c0_3 = arith.constant 0 : index
    %2 = vector.load %arg2[%c0_2, %c0_3] : memref<1x32xf32, #tpu.memory_space<vmem>>, vector<1x32xf32>
    %c0_4 = arith.constant 0 : index
    %c0_5 = arith.constant 0 : index
    %3 = vector.load %arg3[%c0_4, %c0_5] : memref<1x32xf32, #tpu.memory_space<vmem>>, vector<1x32xf32>
    %cst = arith.constant dense<0.000000e+00> : vector<10xf32>
    %4 = vector.multi_reduction <add>, %1, %cst [1] : vector<10x32xf32> to vector<10xf32>
    %5 = vector.shape_cast %4 : vector<10xf32> to vector<10x1xf32>
    %cst_6 = arith.constant 3.200000e+01 : f32
    %6 = vector.broadcast %cst_6 : f32 to vector<10x1xf32>
    %7 = arith.divf %5, %6 : vector<10x1xf32>
    %8 = vector.broadcast %7 : vector<10x1xf32> to vector<10x32xf32>
    %9 = arith.subf %1, %8 : vector<10x32xf32>
    %10 = arith.mulf %9, %9 : vector<10x32xf32>
    %cst_7 = arith.constant dense<0.000000e+00> : vector<10xf32>
    %11 = vector.multi_reduction <add>, %10, %cst_7 [1] : vector<10x32xf32> to vector<10xf32>
    %12 = vector.shape_cast %11 : vector<10xf32> to vector<10x1xf32>
    %cst_8 = arith.constant 3.200000e+01 : f32
    %13 = vector.broadcast %cst_8 : f32 to vector<10x1xf32>
    %14 = arith.divf %12, %13 : vector<10x1xf32>
    %cst_9 = arith.constant 9.99999974E-6 : f32
    %15 = vector.broadcast %cst_9 : f32 to vector<10x1xf32>
    %16 = arith.addf %14, %15 : vector<10x1xf32>
    %17 = math.rsqrt %16 : vector<10x1xf32>
    %18 = vector.broadcast %17 : vector<10x1xf32> to vector<10x32xf32>
    %19 = arith.mulf %9, %18 : vector<10x32xf32>
    %20 = vector.broadcast %2 : vector<1x32xf32> to vector<10x32xf32>
    %21 = arith.mulf %19, %20 : vector<10x32xf32>
    %22 = vector.broadcast %3 : vector<1x32xf32> to vector<10x32xf32>
    %23 = arith.addf %21, %22 : vector<10x32xf32>
    %c0_10 = arith.constant 0 : index
    %c0_11 = arith.constant 0 : index
    %c0_12 = arith.constant 0 : index
    %24 = vector.load %arg4[%c0_10, %c0_11, %c0_12] : memref<1x10x32xf32, #tpu.memory_space<vmem>>, vector<1x10x32xf32>
    %25 = vector.shape_cast %24 : vector<1x10x32xf32> to vector<10x32xf32>
    %26 = vector.shape_cast %23 : vector<10x32xf32> to vector<1x10x32xf32>
    tpu.vector_store %arg4[%c0_10, %c0_11, %c0_12], %26 {strides = array<i32>} : memref<1x10x32xf32, #tpu.memory_space<vmem>>, vector<1x10x32xf32>,
    return
  }
  func.func @transform_0(%arg0: i32) -> (i32, i32, i32) {
    %c0_i32 = arith.constant 0 : i32
    %c0_i32_0 = arith.constant 0 : i32
    %c0_i32_1 = arith.constant 0 : i32
    return %arg0, %c0_i32, %c0_i32_0 : i32, i32, i32
  }
  func.func @transform_1(%arg0: i32) -> (i32, i32) {
    %c0_i32 = arith.constant 0 : i32
    %c0_i32_0 = arith.constant 0 : i32
    %c0_i32_1 = arith.constant 0 : i32
    return %c0_i32, %c0_i32_0 : i32, i32
  }
  func.func @transform_2(%arg0: i32) -> (i32, i32) {
    %c0_i32 = arith.constant 0 : i32
    %c0_i32_0 = arith.constant 0 : i32
    %c0_i32_1 = arith.constant 0 : i32
    return %c0_i32, %c0_i32_0 : i32, i32
  }
  func.func @transform_3(%arg0: i32) -> (i32, i32, i32) {
    %c0_i32 = arith.constant 0 : i32
    %c0_i32_0 = arith.constant 0 : i32
    %c0_i32_1 = arith.constant 0 : i32
    return %arg0, %c0_i32, %c0_i32_0 : i32, i32, i32
  }
}

module attributes {stable_mosaic.version = 11 : i64} {
  func.func @kernel(%arg0: i32, %arg1: memref<1x8x32xf32, #tpu.memory_space<vmem>>, %arg2: memref<1x8x32xf32, #tpu.memory_space<vmem>>, %arg3: memref<1x8x8xf32, #tpu.memory_space<vmem>>, %arg4: memref<32x32xf32, #tpu.memory_space<vmem>>, %arg5: memref<1x32xf32, #tpu.memory_space<vmem>>, %arg6: memref<32x64xf32, #tpu.memory_space<vmem>>, %arg7: memref<1x64xf32, #tpu.memory_space<vmem>>, %arg8: memref<32x32xf32, #tpu.memory_space<vmem>>, %arg9: memref<1x32xf32, #tpu.memory_space<vmem>>, %arg10: memref<1x32xf32, #tpu.memory_space<vmem>>, %arg11: memref<1x32xf32, #tpu.memory_space<vmem>>, %arg12: memref<1x8x32xf32, #tpu.memory_space<vmem>>) attributes {dimension_semantics = [#tpu.dimension_semantics<parallel>], iteration_bounds = array<i64: 2>, scalar_prefetch = 0 : i64, scratch_operands = 0 : i64, tpu.core_type = #tpu.core_type<tc>, window_params = [{transform_indices = @transform_0, window_bounds = array<i64: 1, 8, 32>}, {transform_indices = @transform_1, window_bounds = array<i64: 1, 8, 32>}, {transform_indices = @transform_2, window_bounds = array<i64: 1, 8, 8>}, {pipeline_mode = #tpu.pipeline_mode<synchronous>, transform_indices = @transform_3, window_bounds = array<i64: 32, 32>}, {pipeline_mode = #tpu.pipeline_mode<synchronous>, transform_indices = @transform_4, window_bounds = array<i64: 1, 32>}, {pipeline_mode = #tpu.pipeline_mode<synchronous>, transform_indices = @transform_5, window_bounds = array<i64: 32, 64>}, {pipeline_mode = #tpu.pipeline_mode<synchronous>, transform_indices = @transform_6, window_bounds = array<i64: 1, 64>}, {pipeline_mode = #tpu.pipeline_mode<synchronous>, transform_indices = @transform_7, window_bounds = array<i64: 32, 32>}, {pipeline_mode = #tpu.pipeline_mode<synchronous>, transform_indices = @transform_8, window_bounds = array<i64: 1, 32>}, {pipeline_mode = #tpu.pipeline_mode<synchronous>, transform_indices = @transform_9, window_bounds = array<i64: 1, 32>}, {pipeline_mode = #tpu.pipeline_mode<synchronous>, transform_indices = @transform_10, window_bounds = array<i64: 1, 32>}, {transform_indices = @transform_11, window_bounds = array<i64: 1, 8, 32>}]} {
    %c0 = arith.constant 0 : index
    %c0_0 = arith.constant 0 : index
    %c0_1 = arith.constant 0 : index
    %0 = vector.load %arg1[%c0, %c0_0, %c0_1] : memref<1x8x32xf32, #tpu.memory_space<vmem>>, vector<1x8x32xf32>
    %1 = vector.shape_cast %0 : vector<1x8x32xf32> to vector<8x32xf32>
    %c0_2 = arith.constant 0 : index
    %c0_3 = arith.constant 0 : index
    %c0_4 = arith.constant 0 : index
    %2 = vector.load %arg2[%c0_2, %c0_3, %c0_4] : memref<1x8x32xf32, #tpu.memory_space<vmem>>, vector<1x8x32xf32>
    %3 = vector.shape_cast %2 : vector<1x8x32xf32> to vector<8x32xf32>
    %c0_5 = arith.constant 0 : index
    %c0_6 = arith.constant 0 : index
    %4 = vector.load %arg4[%c0_5, %c0_6] : memref<32x32xf32, #tpu.memory_space<vmem>>, vector<32x32xf32>
    %cst = arith.constant dense<0.000000e+00> : vector<8x32xf32>
    %5 = tpu.matmul %1, %4, %cst {dimension_numbers = #tpu.dot_dimension_numbers<[1], [0], [0], [1], [0, 0, 1, 1], [], []>} : vector<8x32xf32>, vector<32x32xf32>, vector<8x32xf32> -> vector<8x32xf32>
    %c0_7 = arith.constant 0 : index
    %c0_8 = arith.constant 0 : index
    %6 = vector.load %arg5[%c0_7, %c0_8] : memref<1x32xf32, #tpu.memory_space<vmem>>, vector<1x32xf32>
    %7 = vector.broadcast %6 : vector<1x32xf32> to vector<8x32xf32>
    %8 = arith.addf %5, %7 : vector<8x32xf32>
    %c0_9 = arith.constant 0 : index
    %c0_10 = arith.constant 0 : index
    %9 = vector.load %arg6[%c0_9, %c0_10] : memref<32x64xf32, #tpu.memory_space<vmem>>, vector<32x64xf32>
    %cst_11 = arith.constant dense<0.000000e+00> : vector<8x64xf32>
    %10 = tpu.matmul %3, %9, %cst_11 {dimension_numbers = #tpu.dot_dimension_numbers<[1], [0], [0], [1], [0, 0, 1, 1], [], []>} : vector<8x32xf32>, vector<32x64xf32>, vector<8x64xf32> -> vector<8x64xf32>
    %c0_12 = arith.constant 0 : index
    %c0_13 = arith.constant 0 : index
    %11 = vector.load %arg7[%c0_12, %c0_13] : memref<1x64xf32, #tpu.memory_space<vmem>>, vector<1x64xf32>
    %12 = vector.broadcast %11 : vector<1x64xf32> to vector<8x64xf32>
    %13 = arith.addf %10, %12 : vector<8x64xf32>
    %14 = vector.extract_strided_slice %13 {offsets = [0, 0], sizes = [8, 32], strides = [1, 1]} : vector<8x64xf32> to vector<8x32xf32>
    %15 = vector.extract_strided_slice %13 {offsets = [0, 32], sizes = [8, 32], strides = [1, 1]} : vector<8x64xf32> to vector<8x32xf32>
    %16 = vector.extract_strided_slice %8 {offsets = [0, 0], sizes = [8, 8], strides = [1, 1]} : vector<8x32xf32> to vector<8x8xf32>
    %17 = vector.extract_strided_slice %14 {offsets = [0, 0], sizes = [8, 8], strides = [1, 1]} : vector<8x32xf32> to vector<8x8xf32>
    %18 = vector.extract_strided_slice %15 {offsets = [0, 0], sizes = [8, 8], strides = [1, 1]} : vector<8x32xf32> to vector<8x8xf32>
    %cst_14 = arith.constant dense<0.000000e+00> : vector<8x8xf32>
    %19 = tpu.matmul %16, %17, %cst_14 {dimension_numbers = #tpu.dot_dimension_numbers<[1], [1], [0], [0], [0, 0, 1, 0], [], []>} : vector<8x8xf32>, vector<8x8xf32>, vector<8x8xf32> -> vector<8x8xf32>
    %cst_15 = arith.constant 0.353553385 : f32
    %20 = vector.broadcast %cst_15 : f32 to vector<8x8xf32>
    %21 = arith.mulf %19, %20 : vector<8x8xf32>
    %c0_16 = arith.constant 0 : index
    %c0_17 = arith.constant 0 : index
    %c0_18 = arith.constant 0 : index
    %22 = vector.load %arg3[%c0_16, %c0_17, %c0_18] : memref<1x8x8xf32, #tpu.memory_space<vmem>>, vector<1x8x8xf32>
    %23 = vector.shape_cast %22 : vector<1x8x8xf32> to vector<8x8xf32>
    %24 = arith.addf %21, %23 : vector<8x8xf32>
    %cst_19 = arith.constant dense<0xFF800000> : vector<8xf32>
    %25 = vector.multi_reduction <maximumf>, %24, %cst_19 [1] : vector<8x8xf32> to vector<8xf32>
    %26 = vector.shape_cast %25 : vector<8xf32> to vector<8x1xf32>
    %27 = vector.broadcast %26 : vector<8x1xf32> to vector<8x8xf32>
    %28 = arith.subf %24, %27 : vector<8x8xf32>
    %29 = math.exp %28 : vector<8x8xf32>
    %cst_20 = arith.constant dense<0.000000e+00> : vector<8xf32>
    %30 = vector.multi_reduction <add>, %29, %cst_20 [1] : vector<8x8xf32> to vector<8xf32>
    %31 = vector.shape_cast %30 : vector<8xf32> to vector<8x1xf32>
    %32 = tpu.reciprocal %31 {approx = true} : vector<8x1xf32> -> vector<8x1xf32>
    %33 = vector.broadcast %32 : vector<8x1xf32> to vector<8x8xf32>
    %34 = arith.mulf %29, %33 : vector<8x8xf32>
    %cst_21 = arith.constant dense<0.000000e+00> : vector<8x8xf32>
    %35 = tpu.matmul %34, %18, %cst_21 {dimension_numbers = #tpu.dot_dimension_numbers<[1], [0], [0], [1], [0, 0, 1, 1], [], []>} : vector<8x8xf32>, vector<8x8xf32>, vector<8x8xf32> -> vector<8x8xf32>
    %36 = vector.extract_strided_slice %8 {offsets = [0, 8], sizes = [8, 8], strides = [1, 1]} : vector<8x32xf32> to vector<8x8xf32>
    %37 = vector.extract_strided_slice %14 {offsets = [0, 8], sizes = [8, 8], strides = [1, 1]} : vector<8x32xf32> to vector<8x8xf32>
    %38 = vector.extract_strided_slice %15 {offsets = [0, 8], sizes = [8, 8], strides = [1, 1]} : vector<8x32xf32> to vector<8x8xf32>
    %cst_22 = arith.constant dense<0.000000e+00> : vector<8x8xf32>
    %39 = tpu.matmul %36, %37, %cst_22 {dimension_numbers = #tpu.dot_dimension_numbers<[1], [1], [0], [0], [0, 0, 1, 0], [], []>} : vector<8x8xf32>, vector<8x8xf32>, vector<8x8xf32> -> vector<8x8xf32>
    %cst_23 = arith.constant 0.353553385 : f32
    %40 = vector.broadcast %cst_23 : f32 to vector<8x8xf32>
    %41 = arith.mulf %39, %40 : vector<8x8xf32>
    %c0_24 = arith.constant 0 : index
    %c0_25 = arith.constant 0 : index
    %c0_26 = arith.constant 0 : index
    %42 = vector.load %arg3[%c0_24, %c0_25, %c0_26] : memref<1x8x8xf32, #tpu.memory_space<vmem>>, vector<1x8x8xf32>
    %43 = vector.shape_cast %42 : vector<1x8x8xf32> to vector<8x8xf32>
    %44 = arith.addf %41, %43 : vector<8x8xf32>
    %cst_27 = arith.constant dense<0xFF800000> : vector<8xf32>
    %45 = vector.multi_reduction <maximumf>, %44, %cst_27 [1] : vector<8x8xf32> to vector<8xf32>
    %46 = vector.shape_cast %45 : vector<8xf32> to vector<8x1xf32>
    %47 = vector.broadcast %46 : vector<8x1xf32> to vector<8x8xf32>
    %48 = arith.subf %44, %47 : vector<8x8xf32>
    %49 = math.exp %48 : vector<8x8xf32>
    %cst_28 = arith.constant dense<0.000000e+00> : vector<8xf32>
    %50 = vector.multi_reduction <add>, %49, %cst_28 [1] : vector<8x8xf32> to vector<8xf32>
    %51 = vector.shape_cast %50 : vector<8xf32> to vector<8x1xf32>
    %52 = tpu.reciprocal %51 {approx = true} : vector<8x1xf32> -> vector<8x1xf32>
    %53 = vector.broadcast %52 : vector<8x1xf32> to vector<8x8xf32>
    %54 = arith.mulf %49, %53 : vector<8x8xf32>
    %cst_29 = arith.constant dense<0.000000e+00> : vector<8x8xf32>
    %55 = tpu.matmul %54, %38, %cst_29 {dimension_numbers = #tpu.dot_dimension_numbers<[1], [0], [0], [1], [0, 0, 1, 1], [], []>} : vector<8x8xf32>, vector<8x8xf32>, vector<8x8xf32> -> vector<8x8xf32>
    %56 = vector.extract_strided_slice %8 {offsets = [0, 16], sizes = [8, 8], strides = [1, 1]} : vector<8x32xf32> to vector<8x8xf32>
    %57 = vector.extract_strided_slice %14 {offsets = [0, 16], sizes = [8, 8], strides = [1, 1]} : vector<8x32xf32> to vector<8x8xf32>
    %58 = vector.extract_strided_slice %15 {offsets = [0, 16], sizes = [8, 8], strides = [1, 1]} : vector<8x32xf32> to vector<8x8xf32>
    %cst_30 = arith.constant dense<0.000000e+00> : vector<8x8xf32>
    %59 = tpu.matmul %56, %57, %cst_30 {dimension_numbers = #tpu.dot_dimension_numbers<[1], [1], [0], [0], [0, 0, 1, 0], [], []>} : vector<8x8xf32>, vector<8x8xf32>, vector<8x8xf32> -> vector<8x8xf32>
    %cst_31 = arith.constant 0.353553385 : f32
    %60 = vector.broadcast %cst_31 : f32 to vector<8x8xf32>
    %61 = arith.mulf %59, %60 : vector<8x8xf32>
    %c0_32 = arith.constant 0 : index
    %c0_33 = arith.constant 0 : index
    %c0_34 = arith.constant 0 : index
    %62 = vector.load %arg3[%c0_32, %c0_33, %c0_34] : memref<1x8x8xf32, #tpu.memory_space<vmem>>, vector<1x8x8xf32>
    %63 = vector.shape_cast %62 : vector<1x8x8xf32> to vector<8x8xf32>
    %64 = arith.addf %61, %63 : vector<8x8xf32>
    %cst_35 = arith.constant dense<0xFF800000> : vector<8xf32>
    %65 = vector.multi_reduction <maximumf>, %64, %cst_35 [1] : vector<8x8xf32> to vector<8xf32>
    %66 = vector.shape_cast %65 : vector<8xf32> to vector<8x1xf32>
    %67 = vector.broadcast %66 : vector<8x1xf32> to vector<8x8xf32>
    %68 = arith.subf %64, %67 : vector<8x8xf32>
    %69 = math.exp %68 : vector<8x8xf32>
    %cst_36 = arith.constant dense<0.000000e+00> : vector<8xf32>
    %70 = vector.multi_reduction <add>, %69, %cst_36 [1] : vector<8x8xf32> to vector<8xf32>
    %71 = vector.shape_cast %70 : vector<8xf32> to vector<8x1xf32>
    %72 = tpu.reciprocal %71 {approx = true} : vector<8x1xf32> -> vector<8x1xf32>
    %73 = vector.broadcast %72 : vector<8x1xf32> to vector<8x8xf32>
    %74 = arith.mulf %69, %73 : vector<8x8xf32>
    %cst_37 = arith.constant dense<0.000000e+00> : vector<8x8xf32>
    %75 = tpu.matmul %74, %58, %cst_37 {dimension_numbers = #tpu.dot_dimension_numbers<[1], [0], [0], [1], [0, 0, 1, 1], [], []>} : vector<8x8xf32>, vector<8x8xf32>, vector<8x8xf32> -> vector<8x8xf32>
    %76 = vector.extract_strided_slice %8 {offsets = [0, 24], sizes = [8, 8], strides = [1, 1]} : vector<8x32xf32> to vector<8x8xf32>
    %77 = vector.extract_strided_slice %14 {offsets = [0, 24], sizes = [8, 8], strides = [1, 1]} : vector<8x32xf32> to vector<8x8xf32>
    %78 = vector.extract_strided_slice %15 {offsets = [0, 24], sizes = [8, 8], strides = [1, 1]} : vector<8x32xf32> to vector<8x8xf32>
    %cst_38 = arith.constant dense<0.000000e+00> : vector<8x8xf32>
    %79 = tpu.matmul %76, %77, %cst_38 {dimension_numbers = #tpu.dot_dimension_numbers<[1], [1], [0], [0], [0, 0, 1, 0], [], []>} : vector<8x8xf32>, vector<8x8xf32>, vector<8x8xf32> -> vector<8x8xf32>
    %cst_39 = arith.constant 0.353553385 : f32
    %80 = vector.broadcast %cst_39 : f32 to vector<8x8xf32>
    %81 = arith.mulf %79, %80 : vector<8x8xf32>
    %c0_40 = arith.constant 0 : index
    %c0_41 = arith.constant 0 : index
    %c0_42 = arith.constant 0 : index
    %82 = vector.load %arg3[%c0_40, %c0_41, %c0_42] : memref<1x8x8xf32, #tpu.memory_space<vmem>>, vector<1x8x8xf32>
    %83 = vector.shape_cast %82 : vector<1x8x8xf32> to vector<8x8xf32>
    %84 = arith.addf %81, %83 : vector<8x8xf32>
    %cst_43 = arith.constant dense<0xFF800000> : vector<8xf32>
    %85 = vector.multi_reduction <maximumf>, %84, %cst_43 [1] : vector<8x8xf32> to vector<8xf32>
    %86 = vector.shape_cast %85 : vector<8xf32> to vector<8x1xf32>
    %87 = vector.broadcast %86 : vector<8x1xf32> to vector<8x8xf32>
    %88 = arith.subf %84, %87 : vector<8x8xf32>
    %89 = math.exp %88 : vector<8x8xf32>
    %cst_44 = arith.constant dense<0.000000e+00> : vector<8xf32>
    %90 = vector.multi_reduction <add>, %89, %cst_44 [1] : vector<8x8xf32> to vector<8xf32>
    %91 = vector.shape_cast %90 : vector<8xf32> to vector<8x1xf32>
    %92 = tpu.reciprocal %91 {approx = true} : vector<8x1xf32> -> vector<8x1xf32>
    %93 = vector.broadcast %92 : vector<8x1xf32> to vector<8x8xf32>
    %94 = arith.mulf %89, %93 : vector<8x8xf32>
    %cst_45 = arith.constant dense<0.000000e+00> : vector<8x8xf32>
    %95 = tpu.matmul %94, %78, %cst_45 {dimension_numbers = #tpu.dot_dimension_numbers<[1], [0], [0], [1], [0, 0, 1, 1], [], []>} : vector<8x8xf32>, vector<8x8xf32>, vector<8x8xf32> -> vector<8x8xf32>
    %96 = tpu.concatenate %35, %55, %75, %95 in 1 : vector<8x8xf32>, vector<8x8xf32>, vector<8x8xf32>, vector<8x8xf32> -> vector<8x32xf32>
    %c0_46 = arith.constant 0 : index
    %c0_47 = arith.constant 0 : index
    %97 = vector.load %arg8[%c0_46, %c0_47] : memref<32x32xf32, #tpu.memory_space<vmem>>, vector<32x32xf32>
    %cst_48 = arith.constant dense<0.000000e+00> : vector<8x32xf32>
    %98 = tpu.matmul %96, %97, %cst_48 {dimension_numbers = #tpu.dot_dimension_numbers<[1], [0], [0], [1], [0, 0, 1, 1], [], []>} : vector<8x32xf32>, vector<32x32xf32>, vector<8x32xf32> -> vector<8x32xf32>
    %c0_49 = arith.constant 0 : index
    %c0_50 = arith.constant 0 : index
    %99 = vector.load %arg9[%c0_49, %c0_50] : memref<1x32xf32, #tpu.memory_space<vmem>>, vector<1x32xf32>
    %100 = vector.broadcast %99 : vector<1x32xf32> to vector<8x32xf32>
    %101 = arith.addf %98, %100 : vector<8x32xf32>
    %102 = arith.addf %1, %101 : vector<8x32xf32>
    %c0_51 = arith.constant 0 : index
    %c0_52 = arith.constant 0 : index
    %103 = vector.load %arg10[%c0_51, %c0_52] : memref<1x32xf32, #tpu.memory_space<vmem>>, vector<1x32xf32>
    %c0_53 = arith.constant 0 : index
    %c0_54 = arith.constant 0 : index
    %104 = vector.load %arg11[%c0_53, %c0_54] : memref<1x32xf32, #tpu.memory_space<vmem>>, vector<1x32xf32>
    %cst_55 = arith.constant dense<0.000000e+00> : vector<8xf32>
    %105 = vector.multi_reduction <add>, %102, %cst_55 [1] : vector<8x32xf32> to vector<8xf32>
    %106 = vector.shape_cast %105 : vector<8xf32> to vector<8x1xf32>
    %cst_56 = arith.constant 3.200000e+01 : f32
    %107 = vector.broadcast %cst_56 : f32 to vector<8x1xf32>
    %108 = arith.divf %106, %107 : vector<8x1xf32>
    %109 = vector.broadcast %108 : vector<8x1xf32> to vector<8x32xf32>
    %110 = arith.subf %102, %109 : vector<8x32xf32>
    %111 = arith.mulf %110, %110 : vector<8x32xf32>
    %cst_57 = arith.constant dense<0.000000e+00> : vector<8xf32>
    %112 = vector.multi_reduction <add>, %111, %cst_57 [1] : vector<8x32xf32> to vector<8xf32>
    %113 = vector.shape_cast %112 : vector<8xf32> to vector<8x1xf32>
    %cst_58 = arith.constant 3.200000e+01 : f32
    %114 = vector.broadcast %cst_58 : f32 to vector<8x1xf32>
    %115 = arith.divf %113, %114 : vector<8x1xf32>
    %cst_59 = arith.constant 9.99999974E-6 : f32
    %116 = vector.broadcast %cst_59 : f32 to vector<8x1xf32>
    %117 = arith.addf %115, %116 : vector<8x1xf32>
    %118 = math.rsqrt %117 : vector<8x1xf32>
    %119 = vector.broadcast %118 : vector<8x1xf32> to vector<8x32xf32>
    %120 = arith.mulf %110, %119 : vector<8x32xf32>
    %121 = vector.broadcast %103 : vector<1x32xf32> to vector<8x32xf32>
    %122 = arith.mulf %120, %121 : vector<8x32xf32>
    %123 = vector.broadcast %104 : vector<1x32xf32> to vector<8x32xf32>
    %124 = arith.addf %122, %123 : vector<8x32xf32>
    %c0_60 = arith.constant 0 : index
    %c0_61 = arith.constant 0 : index
    %c0_62 = arith.constant 0 : index
    %125 = vector.load %arg12[%c0_60, %c0_61, %c0_62] : memref<1x8x32xf32, #tpu.memory_space<vmem>>, vector<1x8x32xf32>
    %126 = vector.shape_cast %125 : vector<1x8x32xf32> to vector<8x32xf32>
    %127 = vector.shape_cast %124 : vector<8x32xf32> to vector<1x8x32xf32>
    tpu.vector_store %arg12[%c0_60, %c0_61, %c0_62], %127 {strides = array<i32>} : memref<1x8x32xf32, #tpu.memory_space<vmem>>, vector<1x8x32xf32>,
    return
  }
  func.func @transform_0(%arg0: i32) -> (i32, i32, i32) {
    %c0_i32 = arith.constant 0 : i32
    %c0_i32_0 = arith.constant 0 : i32
    %c0_i32_1 = arith.constant 0 : i32
    return %arg0, %c0_i32, %c0_i32_0 : i32, i32, i32
  }
  func.func @transform_1(%arg0: i32) -> (i32, i32, i32) {
    %c0_i32 = arith.constant 0 : i32
    %c0_i32_0 = arith.constant 0 : i32
    %c0_i32_1 = arith.constant 0 : i32
    return %arg0, %c0_i32, %c0_i32_0 : i32, i32, i32
  }
  func.func @transform_2(%arg0: i32) -> (i32, i32, i32) {
    %c0_i32 = arith.constant 0 : i32
    %c0_i32_0 = arith.constant 0 : i32
    %c0_i32_1 = arith.constant 0 : i32
    return %arg0, %c0_i32, %c0_i32_0 : i32, i32, i32
  }
  func.func @transform_3(%arg0: i32) -> (i32, i32) {
    %c0_i32 = arith.constant 0 : i32
    %c0_i32_0 = arith.constant 0 : i32
    %c0_i32_1 = arith.constant 0 : i32
    return %c0_i32, %c0_i32_0 : i32, i32
  }
  func.func @transform_4(%arg0: i32) -> (i32, i32) {
    %c0_i32 = arith.constant 0 : i32
    %c0_i32_0 = arith.constant 0 : i32
    %c0_i32_1 = arith.constant 0 : i32
    return %c0_i32, %c0_i32_0 : i32, i32
  }
  func.func @transform_5(%arg0: i32) -> (i32, i32) {
    %c0_i32 = arith.constant 0 : i32
    %c0_i32_0 = arith.constant 0 : i32
    %c0_i32_1 = arith.constant 0 : i32
    return %c0_i32, %c0_i32_0 : i32, i32
  }
  func.func @transform_6(%arg0: i32) -> (i32, i32) {
    %c0_i32 = arith.constant 0 : i32
    %c0_i32_0 = arith.constant 0 : i32
    %c0_i32_1 = arith.constant 0 : i32
    return %c0_i32, %c0_i32_0 : i32, i32
  }
  func.func @transform_7(%arg0: i32) -> (i32, i32) {
    %c0_i32 = arith.constant 0 : i32
    %c0_i32_0 = arith.constant 0 : i32
    %c0_i32_1 = arith.constant 0 : i32
    return %c0_i32, %c0_i32_0 : i32, i32
  }
  func.func @transform_8(%arg0: i32) -> (i32, i32) {
    %c0_i32 = arith.constant 0 : i32
    %c0_i32_0 = arith.constant 0 : i32
    %c0_i32_1 = arith.constant 0 : i32
    return %c0_i32, %c0_i32_0 : i32, i32
  }
  func.func @transform_9(%arg0: i32) -> (i32, i32) {
    %c0_i32 = arith.constant 0 : i32
    %c0_i32_0 = arith.constant 0 : i32
    %c0_i32_1 = arith.constant 0 : i32
    return %c0_i32, %c0_i32_0 : i32, i32
  }
  func.func @transform_10(%arg0: i32) -> (i32, i32) {
    %c0_i32 = arith.constant 0 : i32
    %c0_i32_0 = arith.constant 0 : i32
    %c0_i32_1 = arith.constant 0 : i32
    return %c0_i32, %c0_i32_0 : i32, i32
  }
  func.func @transform_11(%arg0: i32) -> (i32, i32, i32) {
    %c0_i32 = arith.constant 0 : i32
    %c0_i32_0 = arith.constant 0 : i32
    %c0_i32_1 = arith.constant 0 : i32
    return %arg0, %c0_i32, %c0_i32_0 : i32, i32, i32
  }
}

module attributes {stable_mosaic.version = 11 : i64} {
  func.func @kernel(%arg0: i32, %arg1: memref<1x8x32xf32, #tpu.memory_space<vmem>>, %arg2: memref<1x10x32xf32, #tpu.memory_space<vmem>>, %arg3: memref<32x32xf32, #tpu.memory_space<vmem>>, %arg4: memref<1x32xf32, #tpu.memory_space<vmem>>, %arg5: memref<32x64xf32, #tpu.memory_space<vmem>>, %arg6: memref<1x64xf32, #tpu.memory_space<vmem>>, %arg7: memref<32x32xf32, #tpu.memory_space<vmem>>, %arg8: memref<1x32xf32, #tpu.memory_space<vmem>>, %arg9: memref<1x32xf32, #tpu.memory_space<vmem>>, %arg10: memref<1x32xf32, #tpu.memory_space<vmem>>, %arg11: memref<1x8x32xf32, #tpu.memory_space<vmem>>) attributes {dimension_semantics = [#tpu.dimension_semantics<parallel>], iteration_bounds = array<i64: 2>, scalar_prefetch = 0 : i64, scratch_operands = 0 : i64, tpu.core_type = #tpu.core_type<tc>, window_params = [{transform_indices = @transform_0, window_bounds = array<i64: 1, 8, 32>}, {transform_indices = @transform_1, window_bounds = array<i64: 1, 10, 32>}, {pipeline_mode = #tpu.pipeline_mode<synchronous>, transform_indices = @transform_2, window_bounds = array<i64: 32, 32>}, {pipeline_mode = #tpu.pipeline_mode<synchronous>, transform_indices = @transform_3, window_bounds = array<i64: 1, 32>}, {pipeline_mode = #tpu.pipeline_mode<synchronous>, transform_indices = @transform_4, window_bounds = array<i64: 32, 64>}, {pipeline_mode = #tpu.pipeline_mode<synchronous>, transform_indices = @transform_5, window_bounds = array<i64: 1, 64>}, {pipeline_mode = #tpu.pipeline_mode<synchronous>, transform_indices = @transform_6, window_bounds = array<i64: 32, 32>}, {pipeline_mode = #tpu.pipeline_mode<synchronous>, transform_indices = @transform_7, window_bounds = array<i64: 1, 32>}, {pipeline_mode = #tpu.pipeline_mode<synchronous>, transform_indices = @transform_8, window_bounds = array<i64: 1, 32>}, {pipeline_mode = #tpu.pipeline_mode<synchronous>, transform_indices = @transform_9, window_bounds = array<i64: 1, 32>}, {transform_indices = @transform_10, window_bounds = array<i64: 1, 8, 32>}]} {
    %c0 = arith.constant 0 : index
    %c0_0 = arith.constant 0 : index
    %c0_1 = arith.constant 0 : index
    %0 = vector.load %arg1[%c0, %c0_0, %c0_1] : memref<1x8x32xf32, #tpu.memory_space<vmem>>, vector<1x8x32xf32>
    %1 = vector.shape_cast %0 : vector<1x8x32xf32> to vector<8x32xf32>
    %c0_2 = arith.constant 0 : index
    %c0_3 = arith.constant 0 : index
    %c0_4 = arith.constant 0 : index
    %2 = vector.load %arg2[%c0_2, %c0_3, %c0_4] : memref<1x10x32xf32, #tpu.memory_space<vmem>>, vector<1x10x32xf32>
    %3 = vector.shape_cast %2 : vector<1x10x32xf32> to vector<10x32xf32>
    %c0_5 = arith.constant 0 : index
    %c0_6 = arith.constant 0 : index
    %4 = vector.load %arg3[%c0_5, %c0_6] : memref<32x32xf32, #tpu.memory_space<vmem>>, vector<32x32xf32>
    %cst = arith.constant dense<0.000000e+00> : vector<8x32xf32>
    %5 = tpu.matmul %1, %4, %cst {dimension_numbers = #tpu.dot_dimension_numbers<[1], [0], [0], [1], [0, 0, 1, 1], [], []>} : vector<8x32xf32>, vector<32x32xf32>, vector<8x32xf32> -> vector<8x32xf32>
    %c0_7 = arith.constant 0 : index
    %c0_8 = arith.constant 0 : index
    %6 = vector.load %arg4[%c0_7, %c0_8] : memref<1x32xf32, #tpu.memory_space<vmem>>, vector<1x32xf32>
    %7 = vector.broadcast %6 : vector<1x32xf32> to vector<8x32xf32>
    %8 = arith.addf %5, %7 : vector<8x32xf32>
    %c0_9 = arith.constant 0 : index
    %c0_10 = arith.constant 0 : index
    %9 = vector.load %arg5[%c0_9, %c0_10] : memref<32x64xf32, #tpu.memory_space<vmem>>, vector<32x64xf32>
    %cst_11 = arith.constant dense<0.000000e+00> : vector<10x64xf32>
    %10 = tpu.matmul %3, %9, %cst_11 {dimension_numbers = #tpu.dot_dimension_numbers<[1], [0], [0], [1], [0, 0, 1, 1], [], []>} : vector<10x32xf32>, vector<32x64xf32>, vector<10x64xf32> -> vector<10x64xf32>
    %c0_12 = arith.constant 0 : index
    %c0_13 = arith.constant 0 : index
    %11 = vector.load %arg6[%c0_12, %c0_13] : memref<1x64xf32, #tpu.memory_space<vmem>>, vector<1x64xf32>
    %12 = vector.broadcast %11 : vector<1x64xf32> to vector<10x64xf32>
    %13 = arith.addf %10, %12 : vector<10x64xf32>
    %14 = vector.extract_strided_slice %13 {offsets = [0, 0], sizes = [10, 32], strides = [1, 1]} : vector<10x64xf32> to vector<10x32xf32>
    %15 = vector.extract_strided_slice %13 {offsets = [0, 32], sizes = [10, 32], strides = [1, 1]} : vector<10x64xf32> to vector<10x32xf32>
    %16 = vector.extract_strided_slice %8 {offsets = [0, 0], sizes = [8, 8], strides = [1, 1]} : vector<8x32xf32> to vector<8x8xf32>
    %17 = vector.extract_strided_slice %14 {offsets = [0, 0], sizes = [10, 8], strides = [1, 1]} : vector<10x32xf32> to vector<10x8xf32>
    %18 = vector.extract_strided_slice %15 {offsets = [0, 0], sizes = [10, 8], strides = [1, 1]} : vector<10x32xf32> to vector<10x8xf32>
    %cst_14 = arith.constant dense<0.000000e+00> : vector<8x10xf32>
    %19 = tpu.matmul %16, %17, %cst_14 {dimension_numbers = #tpu.dot_dimension_numbers<[1], [1], [0], [0], [0, 0, 1, 0], [], []>} : vector<8x8xf32>, vector<10x8xf32>, vector<8x10xf32> -> vector<8x10xf32>
    %cst_15 = arith.constant 0.353553385 : f32
    %20 = vector.broadcast %cst_15 : f32 to vector<8x10xf32>
    %21 = arith.mulf %19, %20 : vector<8x10xf32>
    %cst_16 = arith.constant dense<0xFF800000> : vector<8xf32>
    %22 = vector.multi_reduction <maximumf>, %21, %cst_16 [1] : vector<8x10xf32> to vector<8xf32>
    %23 = vector.shape_cast %22 : vector<8xf32> to vector<8x1xf32>
    %24 = vector.broadcast %23 : vector<8x1xf32> to vector<8x10xf32>
    %25 = arith.subf %21, %24 : vector<8x10xf32>
    %26 = math.exp %25 : vector<8x10xf32>
    %cst_17 = arith.constant dense<0.000000e+00> : vector<8xf32>
    %27 = vector.multi_reduction <add>, %26, %cst_17 [1] : vector<8x10xf32> to vector<8xf32>
    %28 = vector.shape_cast %27 : vector<8xf32> to vector<8x1xf32>
    %29 = tpu.reciprocal %28 {approx = true} : vector<8x1xf32> -> vector<8x1xf32>
    %30 = vector.broadcast %29 : vector<8x1xf32> to vector<8x10xf32>
    %31 = arith.mulf %26, %30 : vector<8x10xf32>
    %cst_18 = arith.constant dense<0.000000e+00> : vector<8x8xf32>
    %32 = tpu.matmul %31, %18, %cst_18 {dimension_numbers = #tpu.dot_dimension_numbers<[1], [0], [0], [1], [0, 0, 1, 1], [], []>} : vector<8x10xf32>, vector<10x8xf32>, vector<8x8xf32> -> vector<8x8xf32>
    %33 = vector.extract_strided_slice %8 {offsets = [0, 8], sizes = [8, 8], strides = [1, 1]} : vector<8x32xf32> to vector<8x8xf32>
    %34 = vector.extract_strided_slice %14 {offsets = [0, 8], sizes = [10, 8], strides = [1, 1]} : vector<10x32xf32> to vector<10x8xf32>
    %35 = vector.extract_strided_slice %15 {offsets = [0, 8], sizes = [10, 8], strides = [1, 1]} : vector<10x32xf32> to vector<10x8xf32>
    %cst_19 = arith.constant dense<0.000000e+00> : vector<8x10xf32>
    %36 = tpu.matmul %33, %34, %cst_19 {dimension_numbers = #tpu.dot_dimension_numbers<[1], [1], [0], [0], [0, 0, 1, 0], [], []>} : vector<8x8xf32>, vector<10x8xf32>, vector<8x10xf32> -> vector<8x10xf32>
    %cst_20 = arith.constant 0.353553385 : f32
    %37 = vector.broadcast %cst_20 : f32 to vector<8x10xf32>
    %38 = arith.mulf %36, %37 : vector<8x10xf32>
    %cst_21 = arith.constant dense<0xFF800000> : vector<8xf32>
    %39 = vector.multi_reduction <maximumf>, %38, %cst_21 [1] : vector<8x10xf32> to vector<8xf32>
    %40 = vector.shape_cast %39 : vector<8xf32> to vector<8x1xf32>
    %41 = vector.broadcast %40 : vector<8x1xf32> to vector<8x10xf32>
    %42 = arith.subf %38, %41 : vector<8x10xf32>
    %43 = math.exp %42 : vector<8x10xf32>
    %cst_22 = arith.constant dense<0.000000e+00> : vector<8xf32>
    %44 = vector.multi_reduction <add>, %43, %cst_22 [1] : vector<8x10xf32> to vector<8xf32>
    %45 = vector.shape_cast %44 : vector<8xf32> to vector<8x1xf32>
    %46 = tpu.reciprocal %45 {approx = true} : vector<8x1xf32> -> vector<8x1xf32>
    %47 = vector.broadcast %46 : vector<8x1xf32> to vector<8x10xf32>
    %48 = arith.mulf %43, %47 : vector<8x10xf32>
    %cst_23 = arith.constant dense<0.000000e+00> : vector<8x8xf32>
    %49 = tpu.matmul %48, %35, %cst_23 {dimension_numbers = #tpu.dot_dimension_numbers<[1], [0], [0], [1], [0, 0, 1, 1], [], []>} : vector<8x10xf32>, vector<10x8xf32>, vector<8x8xf32> -> vector<8x8xf32>
    %50 = vector.extract_strided_slice %8 {offsets = [0, 16], sizes = [8, 8], strides = [1, 1]} : vector<8x32xf32> to vector<8x8xf32>
    %51 = vector.extract_strided_slice %14 {offsets = [0, 16], sizes = [10, 8], strides = [1, 1]} : vector<10x32xf32> to vector<10x8xf32>
    %52 = vector.extract_strided_slice %15 {offsets = [0, 16], sizes = [10, 8], strides = [1, 1]} : vector<10x32xf32> to vector<10x8xf32>
    %cst_24 = arith.constant dense<0.000000e+00> : vector<8x10xf32>
    %53 = tpu.matmul %50, %51, %cst_24 {dimension_numbers = #tpu.dot_dimension_numbers<[1], [1], [0], [0], [0, 0, 1, 0], [], []>} : vector<8x8xf32>, vector<10x8xf32>, vector<8x10xf32> -> vector<8x10xf32>
    %cst_25 = arith.constant 0.353553385 : f32
    %54 = vector.broadcast %cst_25 : f32 to vector<8x10xf32>
    %55 = arith.mulf %53, %54 : vector<8x10xf32>
    %cst_26 = arith.constant dense<0xFF800000> : vector<8xf32>
    %56 = vector.multi_reduction <maximumf>, %55, %cst_26 [1] : vector<8x10xf32> to vector<8xf32>
    %57 = vector.shape_cast %56 : vector<8xf32> to vector<8x1xf32>
    %58 = vector.broadcast %57 : vector<8x1xf32> to vector<8x10xf32>
    %59 = arith.subf %55, %58 : vector<8x10xf32>
    %60 = math.exp %59 : vector<8x10xf32>
    %cst_27 = arith.constant dense<0.000000e+00> : vector<8xf32>
    %61 = vector.multi_reduction <add>, %60, %cst_27 [1] : vector<8x10xf32> to vector<8xf32>
    %62 = vector.shape_cast %61 : vector<8xf32> to vector<8x1xf32>
    %63 = tpu.reciprocal %62 {approx = true} : vector<8x1xf32> -> vector<8x1xf32>
    %64 = vector.broadcast %63 : vector<8x1xf32> to vector<8x10xf32>
    %65 = arith.mulf %60, %64 : vector<8x10xf32>
    %cst_28 = arith.constant dense<0.000000e+00> : vector<8x8xf32>
    %66 = tpu.matmul %65, %52, %cst_28 {dimension_numbers = #tpu.dot_dimension_numbers<[1], [0], [0], [1], [0, 0, 1, 1], [], []>} : vector<8x10xf32>, vector<10x8xf32>, vector<8x8xf32> -> vector<8x8xf32>
    %67 = vector.extract_strided_slice %8 {offsets = [0, 24], sizes = [8, 8], strides = [1, 1]} : vector<8x32xf32> to vector<8x8xf32>
    %68 = vector.extract_strided_slice %14 {offsets = [0, 24], sizes = [10, 8], strides = [1, 1]} : vector<10x32xf32> to vector<10x8xf32>
    %69 = vector.extract_strided_slice %15 {offsets = [0, 24], sizes = [10, 8], strides = [1, 1]} : vector<10x32xf32> to vector<10x8xf32>
    %cst_29 = arith.constant dense<0.000000e+00> : vector<8x10xf32>
    %70 = tpu.matmul %67, %68, %cst_29 {dimension_numbers = #tpu.dot_dimension_numbers<[1], [1], [0], [0], [0, 0, 1, 0], [], []>} : vector<8x8xf32>, vector<10x8xf32>, vector<8x10xf32> -> vector<8x10xf32>
    %cst_30 = arith.constant 0.353553385 : f32
    %71 = vector.broadcast %cst_30 : f32 to vector<8x10xf32>
    %72 = arith.mulf %70, %71 : vector<8x10xf32>
    %cst_31 = arith.constant dense<0xFF800000> : vector<8xf32>
    %73 = vector.multi_reduction <maximumf>, %72, %cst_31 [1] : vector<8x10xf32> to vector<8xf32>
    %74 = vector.shape_cast %73 : vector<8xf32> to vector<8x1xf32>
    %75 = vector.broadcast %74 : vector<8x1xf32> to vector<8x10xf32>
    %76 = arith.subf %72, %75 : vector<8x10xf32>
    %77 = math.exp %76 : vector<8x10xf32>
    %cst_32 = arith.constant dense<0.000000e+00> : vector<8xf32>
    %78 = vector.multi_reduction <add>, %77, %cst_32 [1] : vector<8x10xf32> to vector<8xf32>
    %79 = vector.shape_cast %78 : vector<8xf32> to vector<8x1xf32>
    %80 = tpu.reciprocal %79 {approx = true} : vector<8x1xf32> -> vector<8x1xf32>
    %81 = vector.broadcast %80 : vector<8x1xf32> to vector<8x10xf32>
    %82 = arith.mulf %77, %81 : vector<8x10xf32>
    %cst_33 = arith.constant dense<0.000000e+00> : vector<8x8xf32>
    %83 = tpu.matmul %82, %69, %cst_33 {dimension_numbers = #tpu.dot_dimension_numbers<[1], [0], [0], [1], [0, 0, 1, 1], [], []>} : vector<8x10xf32>, vector<10x8xf32>, vector<8x8xf32> -> vector<8x8xf32>
    %84 = tpu.concatenate %32, %49, %66, %83 in 1 : vector<8x8xf32>, vector<8x8xf32>, vector<8x8xf32>, vector<8x8xf32> -> vector<8x32xf32>
    %c0_34 = arith.constant 0 : index
    %c0_35 = arith.constant 0 : index
    %85 = vector.load %arg7[%c0_34, %c0_35] : memref<32x32xf32, #tpu.memory_space<vmem>>, vector<32x32xf32>
    %cst_36 = arith.constant dense<0.000000e+00> : vector<8x32xf32>
    %86 = tpu.matmul %84, %85, %cst_36 {dimension_numbers = #tpu.dot_dimension_numbers<[1], [0], [0], [1], [0, 0, 1, 1], [], []>} : vector<8x32xf32>, vector<32x32xf32>, vector<8x32xf32> -> vector<8x32xf32>
    %c0_37 = arith.constant 0 : index
    %c0_38 = arith.constant 0 : index
    %87 = vector.load %arg8[%c0_37, %c0_38] : memref<1x32xf32, #tpu.memory_space<vmem>>, vector<1x32xf32>
    %88 = vector.broadcast %87 : vector<1x32xf32> to vector<8x32xf32>
    %89 = arith.addf %86, %88 : vector<8x32xf32>
    %90 = arith.addf %1, %89 : vector<8x32xf32>
    %c0_39 = arith.constant 0 : index
    %c0_40 = arith.constant 0 : index
    %91 = vector.load %arg9[%c0_39, %c0_40] : memref<1x32xf32, #tpu.memory_space<vmem>>, vector<1x32xf32>
    %c0_41 = arith.constant 0 : index
    %c0_42 = arith.constant 0 : index
    %92 = vector.load %arg10[%c0_41, %c0_42] : memref<1x32xf32, #tpu.memory_space<vmem>>, vector<1x32xf32>
    %cst_43 = arith.constant dense<0.000000e+00> : vector<8xf32>
    %93 = vector.multi_reduction <add>, %90, %cst_43 [1] : vector<8x32xf32> to vector<8xf32>
    %94 = vector.shape_cast %93 : vector<8xf32> to vector<8x1xf32>
    %cst_44 = arith.constant 3.200000e+01 : f32
    %95 = vector.broadcast %cst_44 : f32 to vector<8x1xf32>
    %96 = arith.divf %94, %95 : vector<8x1xf32>
    %97 = vector.broadcast %96 : vector<8x1xf32> to vector<8x32xf32>
    %98 = arith.subf %90, %97 : vector<8x32xf32>
    %99 = arith.mulf %98, %98 : vector<8x32xf32>
    %cst_45 = arith.constant dense<0.000000e+00> : vector<8xf32>
    %100 = vector.multi_reduction <add>, %99, %cst_45 [1] : vector<8x32xf32> to vector<8xf32>
    %101 = vector.shape_cast %100 : vector<8xf32> to vector<8x1xf32>
    %cst_46 = arith.constant 3.200000e+01 : f32
    %102 = vector.broadcast %cst_46 : f32 to vector<8x1xf32>
    %103 = arith.divf %101, %102 : vector<8x1xf32>
    %cst_47 = arith.constant 9.99999974E-6 : f32
    %104 = vector.broadcast %cst_47 : f32 to vector<8x1xf32>
    %105 = arith.addf %103, %104 : vector<8x1xf32>
    %106 = math.rsqrt %105 : vector<8x1xf32>
    %107 = vector.broadcast %106 : vector<8x1xf32> to vector<8x32xf32>
    %108 = arith.mulf %98, %107 : vector<8x32xf32>
    %109 = vector.broadcast %91 : vector<1x32xf32> to vector<8x32xf32>
    %110 = arith.mulf %108, %109 : vector<8x32xf32>
    %111 = vector.broadcast %92 : vector<1x32xf32> to vector<8x32xf32>
    %112 = arith.addf %110, %111 : vector<8x32xf32>
    %c0_48 = arith.constant 0 : index
    %c0_49 = arith.constant 0 : index
    %c0_50 = arith.constant 0 : index
    %113 = vector.load %arg11[%c0_48, %c0_49, %c0_50] : memref<1x8x32xf32, #tpu.memory_space<vmem>>, vector<1x8x32xf32>
    %114 = vector.shape_cast %113 : vector<1x8x32xf32> to vector<8x32xf32>
    %115 = vector.shape_cast %112 : vector<8x32xf32> to vector<1x8x32xf32>
    tpu.vector_store %arg11[%c0_48, %c0_49, %c0_50], %115 {strides = array<i32>} : memref<1x8x32xf32, #tpu.memory_space<vmem>>, vector<1x8x32xf32>,
    return
  }
  func.func @transform_0(%arg0: i32) -> (i32, i32, i32) {
    %c0_i32 = arith.constant 0 : i32
    %c0_i32_0 = arith.constant 0 : i32
    %c0_i32_1 = arith.constant 0 : i32
    return %arg0, %c0_i32, %c0_i32_0 : i32, i32, i32
  }
  func.func @transform_1(%arg0: i32) -> (i32, i32, i32) {
    %c0_i32 = arith.constant 0 : i32
    %c0_i32_0 = arith.constant 0 : i32
    %c0_i32_1 = arith.constant 0 : i32
    return %arg0, %c0_i32, %c0_i32_0 : i32, i32, i32
  }
  func.func @transform_2(%arg0: i32) -> (i32, i32) {
    %c0_i32 = arith.constant 0 : i32
    %c0_i32_0 = arith.constant 0 : i32
    %c0_i32_1 = arith.constant 0 : i32
    return %c0_i32, %c0_i32_0 : i32, i32
  }
  func.func @transform_3(%arg0: i32) -> (i32, i32) {
    %c0_i32 = arith.constant 0 : i32
    %c0_i32_0 = arith.constant 0 : i32
    %c0_i32_1 = arith.constant 0 : i32
    return %c0_i32, %c0_i32_0 : i32, i32
  }
  func.func @transform_4(%arg0: i32) -> (i32, i32) {
    %c0_i32 = arith.constant 0 : i32
    %c0_i32_0 = arith.constant 0 : i32
    %c0_i32_1 = arith.constant 0 : i32
    return %c0_i32, %c0_i32_0 : i32, i32
  }
  func.func @transform_5(%arg0: i32) -> (i32, i32) {
    %c0_i32 = arith.constant 0 : i32
    %c0_i32_0 = arith.constant 0 : i32
    %c0_i32_1 = arith.constant 0 : i32
    return %c0_i32, %c0_i32_0 : i32, i32
  }
  func.func @transform_6(%arg0: i32) -> (i32, i32) {
    %c0_i32 = arith.constant 0 : i32
    %c0_i32_0 = arith.constant 0 : i32
    %c0_i32_1 = arith.constant 0 : i32
    return %c0_i32, %c0_i32_0 : i32, i32
  }
  func.func @transform_7(%arg0: i32) -> (i32, i32) {
    %c0_i32 = arith.constant 0 : i32
    %c0_i32_0 = arith.constant 0 : i32
    %c0_i32_1 = arith.constant 0 : i32
    return %c0_i32, %c0_i32_0 : i32, i32
  }
  func.func @transform_8(%arg0: i32) -> (i32, i32) {
    %c0_i32 = arith.constant 0 : i32
    %c0_i32_0 = arith.constant 0 : i32
    %c0_i32_1 = arith.constant 0 : i32
    return %c0_i32, %c0_i32_0 : i32, i32
  }
  func.func @transform_9(%arg0: i32) -> (i32, i32) {
    %c0_i32 = arith.constant 0 : i32
    %c0_i32_0 = arith.constant 0 : i32
    %c0_i32_1 = arith.constant 0 : i32
    return %c0_i32, %c0_i32_0 : i32, i32
  }
  func.func @transform_10(%arg0: i32) -> (i32, i32, i32) {
    %c0_i32 = arith.constant 0 : i32
    %c0_i32_0 = arith.constant 0 : i32
    %c0_i32_1 = arith.constant 0 : i32
    return %arg0, %c0_i32, %c0_i32_0 : i32, i32, i32
  }
}

module attributes {stable_mosaic.version = 11 : i64} {
  func.func @_ffn_ln_kernel(%arg0: i32, %arg1: memref<1x8x32xf32, #tpu.memory_space<vmem>>, %arg2: memref<32x64xf32, #tpu.memory_space<vmem>>, %arg3: memref<1x64xf32, #tpu.memory_space<vmem>>, %arg4: memref<64x32xf32, #tpu.memory_space<vmem>>, %arg5: memref<1x32xf32, #tpu.memory_space<vmem>>, %arg6: memref<1x32xf32, #tpu.memory_space<vmem>>, %arg7: memref<1x32xf32, #tpu.memory_space<vmem>>, %arg8: memref<1x8x32xf32, #tpu.memory_space<vmem>>) attributes {dimension_semantics = [#tpu.dimension_semantics<parallel>], iteration_bounds = array<i64: 2>, scalar_prefetch = 0 : i64, scratch_operands = 0 : i64, tpu.core_type = #tpu.core_type<tc>, window_params = [{transform_indices = @transform_0, window_bounds = array<i64: 1, 8, 32>}, {pipeline_mode = #tpu.pipeline_mode<synchronous>, transform_indices = @transform_1, window_bounds = array<i64: 32, 64>}, {pipeline_mode = #tpu.pipeline_mode<synchronous>, transform_indices = @transform_2, window_bounds = array<i64: 1, 64>}, {pipeline_mode = #tpu.pipeline_mode<synchronous>, transform_indices = @transform_3, window_bounds = array<i64: 64, 32>}, {pipeline_mode = #tpu.pipeline_mode<synchronous>, transform_indices = @transform_4, window_bounds = array<i64: 1, 32>}, {pipeline_mode = #tpu.pipeline_mode<synchronous>, transform_indices = @transform_5, window_bounds = array<i64: 1, 32>}, {pipeline_mode = #tpu.pipeline_mode<synchronous>, transform_indices = @transform_6, window_bounds = array<i64: 1, 32>}, {transform_indices = @transform_7, window_bounds = array<i64: 1, 8, 32>}]} {
    %c0 = arith.constant 0 : index
    %c0_0 = arith.constant 0 : index
    %c0_1 = arith.constant 0 : index
    %0 = vector.load %arg1[%c0, %c0_0, %c0_1] : memref<1x8x32xf32, #tpu.memory_space<vmem>>, vector<1x8x32xf32>
    %1 = vector.shape_cast %0 : vector<1x8x32xf32> to vector<8x32xf32>
    %c0_2 = arith.constant 0 : index
    %c0_3 = arith.constant 0 : index
    %2 = vector.load %arg2[%c0_2, %c0_3] : memref<32x64xf32, #tpu.memory_space<vmem>>, vector<32x64xf32>
    %cst = arith.constant dense<0.000000e+00> : vector<8x64xf32>
    %3 = tpu.matmul %1, %2, %cst {dimension_numbers = #tpu.dot_dimension_numbers<[1], [0], [0], [1], [0, 0, 1, 1], [], []>} : vector<8x32xf32>, vector<32x64xf32>, vector<8x64xf32> -> vector<8x64xf32>
    %c0_4 = arith.constant 0 : index
    %c0_5 = arith.constant 0 : index
    %4 = vector.load %arg3[%c0_4, %c0_5] : memref<1x64xf32, #tpu.memory_space<vmem>>, vector<1x64xf32>
    %5 = vector.broadcast %4 : vector<1x64xf32> to vector<8x64xf32>
    %6 = arith.addf %3, %5 : vector<8x64xf32>
    %cst_6 = arith.constant 0.000000e+00 : f32
    %7 = vector.broadcast %cst_6 : f32 to vector<8x64xf32>
    %8 = arith.maximumf %6, %7 : vector<8x64xf32>
    %c0_7 = arith.constant 0 : index
    %c0_8 = arith.constant 0 : index
    %9 = vector.load %arg4[%c0_7, %c0_8] : memref<64x32xf32, #tpu.memory_space<vmem>>, vector<64x32xf32>
    %cst_9 = arith.constant dense<0.000000e+00> : vector<8x32xf32>
    %10 = tpu.matmul %8, %9, %cst_9 {dimension_numbers = #tpu.dot_dimension_numbers<[1], [0], [0], [1], [0, 0, 1, 1], [], []>} : vector<8x64xf32>, vector<64x32xf32>, vector<8x32xf32> -> vector<8x32xf32>
    %c0_10 = arith.constant 0 : index
    %c0_11 = arith.constant 0 : index
    %11 = vector.load %arg5[%c0_10, %c0_11] : memref<1x32xf32, #tpu.memory_space<vmem>>, vector<1x32xf32>
    %12 = vector.broadcast %11 : vector<1x32xf32> to vector<8x32xf32>
    %13 = arith.addf %10, %12 : vector<8x32xf32>
    %14 = arith.addf %1, %13 : vector<8x32xf32>
    %c0_12 = arith.constant 0 : index
    %c0_13 = arith.constant 0 : index
    %15 = vector.load %arg6[%c0_12, %c0_13] : memref<1x32xf32, #tpu.memory_space<vmem>>, vector<1x32xf32>
    %c0_14 = arith.constant 0 : index
    %c0_15 = arith.constant 0 : index
    %16 = vector.load %arg7[%c0_14, %c0_15] : memref<1x32xf32, #tpu.memory_space<vmem>>, vector<1x32xf32>
    %cst_16 = arith.constant dense<0.000000e+00> : vector<8xf32>
    %17 = vector.multi_reduction <add>, %14, %cst_16 [1] : vector<8x32xf32> to vector<8xf32>
    %18 = vector.shape_cast %17 : vector<8xf32> to vector<8x1xf32>
    %cst_17 = arith.constant 3.200000e+01 : f32
    %19 = vector.broadcast %cst_17 : f32 to vector<8x1xf32>
    %20 = arith.divf %18, %19 : vector<8x1xf32>
    %21 = vector.broadcast %20 : vector<8x1xf32> to vector<8x32xf32>
    %22 = arith.subf %14, %21 : vector<8x32xf32>
    %23 = arith.mulf %22, %22 : vector<8x32xf32>
    %cst_18 = arith.constant dense<0.000000e+00> : vector<8xf32>
    %24 = vector.multi_reduction <add>, %23, %cst_18 [1] : vector<8x32xf32> to vector<8xf32>
    %25 = vector.shape_cast %24 : vector<8xf32> to vector<8x1xf32>
    %cst_19 = arith.constant 3.200000e+01 : f32
    %26 = vector.broadcast %cst_19 : f32 to vector<8x1xf32>
    %27 = arith.divf %25, %26 : vector<8x1xf32>
    %cst_20 = arith.constant 9.99999974E-6 : f32
    %28 = vector.broadcast %cst_20 : f32 to vector<8x1xf32>
    %29 = arith.addf %27, %28 : vector<8x1xf32>
    %30 = math.rsqrt %29 : vector<8x1xf32>
    %31 = vector.broadcast %30 : vector<8x1xf32> to vector<8x32xf32>
    %32 = arith.mulf %22, %31 : vector<8x32xf32>
    %33 = vector.broadcast %15 : vector<1x32xf32> to vector<8x32xf32>
    %34 = arith.mulf %32, %33 : vector<8x32xf32>
    %35 = vector.broadcast %16 : vector<1x32xf32> to vector<8x32xf32>
    %36 = arith.addf %34, %35 : vector<8x32xf32>
    %c0_21 = arith.constant 0 : index
    %c0_22 = arith.constant 0 : index
    %c0_23 = arith.constant 0 : index
    %37 = vector.load %arg8[%c0_21, %c0_22, %c0_23] : memref<1x8x32xf32, #tpu.memory_space<vmem>>, vector<1x8x32xf32>
    %38 = vector.shape_cast %37 : vector<1x8x32xf32> to vector<8x32xf32>
    %39 = vector.shape_cast %36 : vector<8x32xf32> to vector<1x8x32xf32>
    tpu.vector_store %arg8[%c0_21, %c0_22, %c0_23], %39 {strides = array<i32>} : memref<1x8x32xf32, #tpu.memory_space<vmem>>, vector<1x8x32xf32>,
    return
  }
  func.func @transform_0(%arg0: i32) -> (i32, i32, i32) {
    %c0_i32 = arith.constant 0 : i32
    %c0_i32_0 = arith.constant 0 : i32
    %c0_i32_1 = arith.constant 0 : i32
    return %arg0, %c0_i32, %c0_i32_0 : i32, i32, i32
  }
  func.func @transform_1(%arg0: i32) -> (i32, i32) {
    %c0_i32 = arith.constant 0 : i32
    %c0_i32_0 = arith.constant 0 : i32
    %c0_i32_1 = arith.constant 0 : i32
    return %c0_i32, %c0_i32_0 : i32, i32
  }
  func.func @transform_2(%arg0: i32) -> (i32, i32) {
    %c0_i32 = arith.constant 0 : i32
    %c0_i32_0 = arith.constant 0 : i32
    %c0_i32_1 = arith.constant 0 : i32
    return %c0_i32, %c0_i32_0 : i32, i32
  }
  func.func @transform_3(%arg0: i32) -> (i32, i32) {
    %c0_i32 = arith.constant 0 : i32
    %c0_i32_0 = arith.constant 0 : i32
    %c0_i32_1 = arith.constant 0 : i32
    return %c0_i32, %c0_i32_0 : i32, i32
  }
  func.func @transform_4(%arg0: i32) -> (i32, i32) {
    %c0_i32 = arith.constant 0 : i32
    %c0_i32_0 = arith.constant 0 : i32
    %c0_i32_1 = arith.constant 0 : i32
    return %c0_i32, %c0_i32_0 : i32, i32
  }
  func.func @transform_5(%arg0: i32) -> (i32, i32) {
    %c0_i32 = arith.constant 0 : i32
    %c0_i32_0 = arith.constant 0 : i32
    %c0_i32_1 = arith.constant 0 : i32
    return %c0_i32, %c0_i32_0 : i32, i32
  }
  func.func @transform_6(%arg0: i32) -> (i32, i32) {
    %c0_i32 = arith.constant 0 : i32
    %c0_i32_0 = arith.constant 0 : i32
    %c0_i32_1 = arith.constant 0 : i32
    return %c0_i32, %c0_i32_0 : i32, i32
  }
  func.func @transform_7(%arg0: i32) -> (i32, i32, i32) {
    %c0_i32 = arith.constant 0 : i32
    %c0_i32_0 = arith.constant 0 : i32
    %c0_i32_1 = arith.constant 0 : i32
    return %arg0, %c0_i32, %c0_i32_0 : i32, i32, i32
  }
}

module attributes {stable_mosaic.version = 11 : i64} {
  func.func @_ln_linear_kernel(%arg0: i32, %arg1: memref<1x8x32xf32, #tpu.memory_space<vmem>>, %arg2: memref<1x32xf32, #tpu.memory_space<vmem>>, %arg3: memref<1x32xf32, #tpu.memory_space<vmem>>, %arg4: memref<32x29xf32, #tpu.memory_space<vmem>>, %arg5: memref<1x29xf32, #tpu.memory_space<vmem>>, %arg6: memref<1x8x29xf32, #tpu.memory_space<vmem>>) attributes {dimension_semantics = [#tpu.dimension_semantics<parallel>], iteration_bounds = array<i64: 2>, scalar_prefetch = 0 : i64, scratch_operands = 0 : i64, tpu.core_type = #tpu.core_type<tc>, window_params = [{transform_indices = @transform_0, window_bounds = array<i64: 1, 8, 32>}, {pipeline_mode = #tpu.pipeline_mode<synchronous>, transform_indices = @transform_1, window_bounds = array<i64: 1, 32>}, {pipeline_mode = #tpu.pipeline_mode<synchronous>, transform_indices = @transform_2, window_bounds = array<i64: 1, 32>}, {pipeline_mode = #tpu.pipeline_mode<synchronous>, transform_indices = @transform_3, window_bounds = array<i64: 32, 29>}, {pipeline_mode = #tpu.pipeline_mode<synchronous>, transform_indices = @transform_4, window_bounds = array<i64: 1, 29>}, {transform_indices = @transform_5, window_bounds = array<i64: 1, 8, 29>}]} {
    %c0 = arith.constant 0 : index
    %c0_0 = arith.constant 0 : index
    %c0_1 = arith.constant 0 : index
    %0 = vector.load %arg1[%c0, %c0_0, %c0_1] : memref<1x8x32xf32, #tpu.memory_space<vmem>>, vector<1x8x32xf32>
    %1 = vector.shape_cast %0 : vector<1x8x32xf32> to vector<8x32xf32>
    %c0_2 = arith.constant 0 : index
    %c0_3 = arith.constant 0 : index
    %2 = vector.load %arg2[%c0_2, %c0_3] : memref<1x32xf32, #tpu.memory_space<vmem>>, vector<1x32xf32>
    %c0_4 = arith.constant 0 : index
    %c0_5 = arith.constant 0 : index
    %3 = vector.load %arg3[%c0_4, %c0_5] : memref<1x32xf32, #tpu.memory_space<vmem>>, vector<1x32xf32>
    %cst = arith.constant dense<0.000000e+00> : vector<8xf32>
    %4 = vector.multi_reduction <add>, %1, %cst [1] : vector<8x32xf32> to vector<8xf32>
    %5 = vector.shape_cast %4 : vector<8xf32> to vector<8x1xf32>
    %cst_6 = arith.constant 3.200000e+01 : f32
    %6 = vector.broadcast %cst_6 : f32 to vector<8x1xf32>
    %7 = arith.divf %5, %6 : vector<8x1xf32>
    %8 = vector.broadcast %7 : vector<8x1xf32> to vector<8x32xf32>
    %9 = arith.subf %1, %8 : vector<8x32xf32>
    %10 = arith.mulf %9, %9 : vector<8x32xf32>
    %cst_7 = arith.constant dense<0.000000e+00> : vector<8xf32>
    %11 = vector.multi_reduction <add>, %10, %cst_7 [1] : vector<8x32xf32> to vector<8xf32>
    %12 = vector.shape_cast %11 : vector<8xf32> to vector<8x1xf32>
    %cst_8 = arith.constant 3.200000e+01 : f32
    %13 = vector.broadcast %cst_8 : f32 to vector<8x1xf32>
    %14 = arith.divf %12, %13 : vector<8x1xf32>
    %cst_9 = arith.constant 9.99999974E-6 : f32
    %15 = vector.broadcast %cst_9 : f32 to vector<8x1xf32>
    %16 = arith.addf %14, %15 : vector<8x1xf32>
    %17 = math.rsqrt %16 : vector<8x1xf32>
    %18 = vector.broadcast %17 : vector<8x1xf32> to vector<8x32xf32>
    %19 = arith.mulf %9, %18 : vector<8x32xf32>
    %20 = vector.broadcast %2 : vector<1x32xf32> to vector<8x32xf32>
    %21 = arith.mulf %19, %20 : vector<8x32xf32>
    %22 = vector.broadcast %3 : vector<1x32xf32> to vector<8x32xf32>
    %23 = arith.addf %21, %22 : vector<8x32xf32>
    %c0_10 = arith.constant 0 : index
    %c0_11 = arith.constant 0 : index
    %24 = vector.load %arg4[%c0_10, %c0_11] : memref<32x29xf32, #tpu.memory_space<vmem>>, vector<32x29xf32>
    %cst_12 = arith.constant dense<0.000000e+00> : vector<8x29xf32>
    %25 = tpu.matmul %23, %24, %cst_12 {dimension_numbers = #tpu.dot_dimension_numbers<[1], [0], [0], [1], [0, 0, 1, 1], [], []>} : vector<8x32xf32>, vector<32x29xf32>, vector<8x29xf32> -> vector<8x29xf32>
    %c0_13 = arith.constant 0 : index
    %c0_14 = arith.constant 0 : index
    %26 = vector.load %arg5[%c0_13, %c0_14] : memref<1x29xf32, #tpu.memory_space<vmem>>, vector<1x29xf32>
    %27 = vector.broadcast %26 : vector<1x29xf32> to vector<8x29xf32>
    %28 = arith.addf %25, %27 : vector<8x29xf32>
    %c0_15 = arith.constant 0 : index
    %c0_16 = arith.constant 0 : index
    %c0_17 = arith.constant 0 : index
    %29 = vector.load %arg6[%c0_15, %c0_16, %c0_17] : memref<1x8x29xf32, #tpu.memory_space<vmem>>, vector<1x8x29xf32>
    %30 = vector.shape_cast %29 : vector<1x8x29xf32> to vector<8x29xf32>
    %31 = vector.shape_cast %28 : vector<8x29xf32> to vector<1x8x29xf32>
    tpu.vector_store %arg6[%c0_15, %c0_16, %c0_17], %31 {strides = array<i32>} : memref<1x8x29xf32, #tpu.memory_space<vmem>>, vector<1x8x29xf32>,
    return
  }
  func.func @transform_0(%arg0: i32) -> (i32, i32, i32) {
    %c0_i32 = arith.constant 0 : i32
    %c0_i32_0 = arith.constant 0 : i32
    %c0_i32_1 = arith.constant 0 : i32
    return %arg0, %c0_i32, %c0_i32_0 : i32, i32, i32
  }
  func.func @transform_1(%arg0: i32) -> (i32, i32) {
    %c0_i32 = arith.constant 0 : i32
    %c0_i32_0 = arith.constant 0 : i32
    %c0_i32_1 = arith.constant 0 : i32
    return %c0_i32, %c0_i32_0 : i32, i32
  }
  func.func @transform_2(%arg0: i32) -> (i32, i32) {
    %c0_i32 = arith.constant 0 : i32
    %c0_i32_0 = arith.constant 0 : i32
    %c0_i32_1 = arith.constant 0 : i32
    return %c0_i32, %c0_i32_0 : i32, i32
  }
  func.func @transform_3(%arg0: i32) -> (i32, i32) {
    %c0_i32 = arith.constant 0 : i32
    %c0_i32_0 = arith.constant 0 : i32
    %c0_i32_1 = arith.constant 0 : i32
    return %c0_i32, %c0_i32_0 : i32, i32
  }
  func.func @transform_4(%arg0: i32) -> (i32, i32) {
    %c0_i32 = arith.constant 0 : i32
    %c0_i32_0 = arith.constant 0 : i32
    %c0_i32_1 = arith.constant 0 : i32
    return %c0_i32, %c0_i32_0 : i32, i32
  }
  func.func @transform_5(%arg0: i32) -> (i32, i32, i32) {
    %c0_i32 = arith.constant 0 : i32
    %c0_i32_0 = arith.constant 0 : i32
    %c0_i32_1 = arith.constant 0 : i32
    return %arg0, %c0_i32, %c0_i32_0 : i32, i32, i32
  }
}

</mosaic_0001>

<bundles_post_ra>
// kernel: seq2seq_transformer_forward.16
= control target key start
LH: loop header
LB: loop body
LE: loop exit
PB: predicated region body
PF: predicated region fallthrough
CT: control target
= control target key end

     0   :  { %s332_s12 = smov 0   ;;  %s368_s0 = inlined_call_operand.vmem [shape: f32[2,10,32], index: 0, kind: input, shape index: {}]   ;;  %s369_s1 = inlined_call_operand.vmem [shape: f32[1,32], index: 1, kind: input, shape index: {}]   ;;  %s370_s2 = inlined_call_operand.vmem [shape: f32[1,32], index: 2, kind: input, shape index: {}]   ;;  %s371_s3 = inlined_call_operand.vmem [shape: f32[2,10,32], index: 3, kind: output, shape index: {}]  }
   0x1 LB: > { %s277_s13 = sadd.s32 4294967295, %s310_s12   ;;  %p281_p0 = scmp.ge.s32.totalorder %s310_s12, 1  ;;  %s310_s12 = sphi %s332_s12, %s13_s12  }
   0x2   : > { %p137_p1 = scmp.lt.s32.totalorder %s310_s12, 3 }
   0x4   : > { %p138_p2 = pnand %p281_p0, %p137_p1 }
   0x5   : > { %p161_p3 = scmp.lt.s32.totalorder (!%p138_p2), %s277_s13, 1 }
   0x6   : > { %141 = sbr.rel (%p138_p2) target bundleno = 328 (0x148), region = 32 }
   0xb   : > { %s373_s13 = smov (!%p161_p3, %s277_s13), 1  ;;  %vm175_vm0 = vcmask 261120   ;;  %vm179_vm1 = vcmask 254976   ;;  %v286_v21 = vld [vmem:[%s369_s1] ss:$0 sm:$0xff] }
   0xc   : > { %s290_s14 = sshll.u32 %s373_s13, 4  ;;  %v287_v23 = vld [vmem:[%s370_s2] ss:$0 sm:$0xff] }
   0xd   : > { %s165_s17 = scalar_lea.vmem %s368_s0, %s290_s14  ;;  %s170_s24 = scalar_lea.vmem %s371_s3, %s290_s14 }
   0xe   : > { %v171_v0 = vld [vmem:[%s165_s17] sm:$0xff]  ;;  %v172_v1 = vld [vmem:[%s165_s17 + $0x8] sm:$0x3] }
   0xf   : > { %v176_v2 = vsel %vm175_vm0, %v171_v0, 0.0  ;;  %v180_v3 = vsel %vm179_vm1, %v172_v1, 0.0 }
  0x10   : > { %177 = vadd.xlane.f32.xlu0 %v176_v2 }
  0x14   : > { %181 = vadd.xlane.f32.xlu0 %v180_v3 }
  0x99   : > { %v178_v4 = vpop.xlane.xlu0 %177 }
  0x9a   : > { %v184_v5 = vmul.f32 0.03125, %v178_v4 }
  0x9c   : > { %v186_v6 = vsub.f32 %v171_v0, %v184_v5 }
  0x9d   : > { %v182_v7 = vpop.xlane.xlu0 %181 }
  0x9e   : > { %v185_v8 = vmul.f32 0.03125, %v182_v7  ;;  %v188_v9 = vmul.f32 %v186_v6, %v186_v6 }
  0xa0   : > { %v187_v10 = vsub.f32 %v172_v1, %v185_v8  ;;  %v190_v11 = vsel %vm175_vm0, %v188_v9, 0.0 }
  0xa1   : > { %191 = vadd.xlane.f32.xlu1 %v190_v11 }
  0xa2   : > { %v189_v12 = vmul.f32 %v187_v10, %v187_v10 }
  0xa4   : > { %v193_v13 = vsel %vm179_vm1, %v189_v12, 0.0 }
  0xa5   : > { %194 = vadd.xlane.f32.xlu1 %v193_v13 }
 0x12a   : > { %v192_v14 = vpop.xlane.xlu1 %191 }
 0x12b   : > { %v196_v15 = vmul.f32 0.03125, %v192_v14 }
 0x12d   : > { %v198_v16 = vadd.f32 1e-05, %v196_v15 }
 0x12e   : > { %v195_v17 = vpop.xlane.xlu1 %194 }
 0x12f   : > { %300 = vrsqrt.f32 %v198_v16  ;;  %v197_v18 = vmul.f32 0.03125, %v195_v17 }
 0x131   : > { %v199_v19 = vadd.f32 1e-05, %v197_v18 }
 0x133   : > { %302 = vrsqrt.f32 %v199_v19 }
 0x13c   : > { %v301_v20 = vpop.eup %300 }
 0x13d   : > { %v202_v22 = vmul.f32 %v301_v20, %v186_v6 }
 0x13f   : > { %v210_v24 = vmul.f32 %v286_v21, %v202_v22 }
 0x140   : > { %v303_v25 = vpop.eup %302 }
 0x141   : > { %v218_v26 = vadd.f32 %v287_v23, %v210_v24  ;;  %v203_v27 = vmul.f32 %v303_v25, %v187_v10 }
 0x143   : > { %220 = vst.msk [vmem:[%s170_s24] sm:$0xff] %vm175_vm0, %v218_v26  ;;  %v211_v28 = vmul.f32 %v286_v21, %v203_v27 }
 0x145   : > { %v219_v29 = vadd.f32 %v287_v23, %v211_v28 }
 0x147   : > { %221 = vst.msk [vmem:[%s170_s24 + $0x8] sm:$0x3] %vm179_vm1, %v219_v29 }
 0x148 PF: > { %s13_s12 = sadd.s32 1, %s310_s12  }
 0x149   : > { %p10_p4 = scmp.ge.s32.totalorder %s13_s12, 4  }
 0x14b   :  { %12 = sbr.rel (!%p10_p4) target bundleno = 1 (0x1), region = 62 }

// kernel: seq2seq_transformer_forward.13
= control target key start
LH: loop header
LB: loop body
LE: loop exit
PB: predicated region body
PF: predicated region fallthrough
CT: control target
= control target key end

     0   :  { %s705_s24 = smov 0   ;;  %s785_s0 = inlined_call_operand.vmem [shape: f32[2,10,32], index: 0, kind: input, shape index: {}]   ;;  %s786_s1 = inlined_call_operand.vmem [shape: f32[32,64], index: 1, kind: input, shape index: {}]   ;;  %s787_s2 = inlined_call_operand.vmem [shape: f32[1,64], index: 2, kind: input, shape index: {}]   ;;  %s788_s3 = inlined_call_operand.vmem [shape: f32[64,32], index: 3, kind: input, shape index: {}]   ;;  %s789_s4 = inlined_call_operand.vmem [shape: f32[1,32], index: 4, kind: input, shape index: {}]   ;;  %s790_s5 = inlined_call_operand.vmem [shape: f32[1,32], index: 5, kind: input, shape index: {}]   ;;  %s791_s6 = inlined_call_operand.vmem [shape: f32[1,32], index: 6, kind: input, shape index: {}]   ;;  %s792_s7 = inlined_call_operand.vmem [shape: f32[2,10,32], index: 7, kind: output, shape index: {}]  }
   0x1 LB: > { %s578_s25 = sadd.s32 4294967295, %s663_s24   ;;  %p582_p0 = scmp.ge.s32.totalorder %s663_s24, 1  ;;  %s663_s24 = sphi %s705_s24, %s17_s24  }
   0x2   : > { %p237_p1 = scmp.lt.s32.totalorder %s663_s24, 3 }
   0x4   : > { %p238_p2 = pnand %p582_p0, %p237_p1 }
   0x5   : > { %p269_p3 = scmp.lt.s32.totalorder (!%p238_p2), %s578_s25, 1 }
   0x6   : > { %241 = sbr.rel (%p238_p2) target bundleno = 732 (0x2dc), region = 48 }
   0xb   : > { %v284_v0 = vld [vmem:[%s786_s1 + $0x18] sm:$0xff]  ;;  %v283_v1 = vld [vmem:[%s786_s1 + $0x10] sm:$0xff]  ;;  %v282_v4 = vld [vmem:[%s786_s1 + $0x8] sm:$0xff]  ;;  %s794_s25 = smov (!%p269_p3, %s578_s25), 1  ;;  %vm292_vm0 = vcmask 261120   ;;  %vm391_vm1 = vcmask 523264  }
   0xc   : > { %615 = vmatprep.subr.mxu0 %v284_v0  ;;  %v383_v2 = vld [vmem:[%s788_s3 + $0x38] sm:$0xff]  ;;  %v382_v3 = vld [vmem:[%s788_s3 + $0x30] sm:$0xff]  ;;  %v381_v5 = vld [vmem:[%s788_s3 + $0x28] sm:$0xff]  ;;  %s597_s17 = sshll.u32 %s794_s25, 4  ;;  %vm480_vm2 = vcmask 254976  }
   0xd   : > { %616 = vmatpush3.msra.mxu0 %v284_v0  ;;  %626 = vmatprep.subr.mxu1 %v383_v2  ;;  %v281_v6 = vld [vmem:[%s786_s1] sm:$0xff]  ;;  %s273_s20 = scalar_lea.vmem %s785_s0, %s597_s17  ;;  %v379_v10 = vld [vmem:[%s788_s3 + $0x18] sm:$0xff]  ;;  %v378_v11 = vld [vmem:[%s788_s3 + $0x10] sm:$0xff]  ;;  %s278_s21 = scalar_lea.vmem %s792_s7, %s597_s17 }
   0xe   : > { %617 = vmatprep.subr.mxu0 %v283_v1  ;;  %627 = vmatpush3.msra.mxu1 %v383_v2  ;;  %v279_v7 = vld [vmem:[%s273_s20] sm:$0xff]  ;;  %v280_v8 = vld [vmem:[%s273_s20 + $0x8] sm:$0x3] }
   0xf   : > { %618 = vmatpush3.msra.mxu0 %v283_v1  ;;  %628 = vmatprep.subr.mxu1 %v382_v3  ;;  %v380_v9 = vld [vmem:[%s788_s3 + $0x20] sm:$0xff]  ;;  %v377_v12 = vld [vmem:[%s788_s3 + $0x8] sm:$0xff] }
  0x10   : > { %619 = vmatprep.subr.mxu0 %v282_v4  ;;  %629 = vmatpush3.msra.mxu1 %v382_v3  ;;  %v376_v13 = vld [vmem:[%s788_s3] sm:$0xff] }
  0x11   : > { %620 = vmatpush3.msra.mxu0 %v282_v4  ;;  %630 = vmatprep.subr.mxu1 %v381_v5  ;;  %v587_v14 = vld [vmem:[%s787_s2] ss:$0 sm:$0xff] }
  0x12   : > { %621 = vmatprep.subr.mxu0 %v281_v6  ;;  %623 = vmatprep.mubr.msk.f32.mxu0 %vm292_vm0, %v279_v7  ;;  %v590_v22 = vld [vmem:[%s789_s4] ss:$0 sm:$0xff] }
  0x13   : > { %622 = vmatpush3.msra.mxu0 %v281_v6  ;;  %631 = vmatpush3.msra.mxu1 %v381_v5  ;;  %v593_v47 = vld [vmem:[%s790_s5] ss:$0 sm:$0xff] }
  0x14   : > { %624 = vmatmul.mubr.msk.f32.vlgmr.msra.gmra.mxu0 %vm292_vm0, %v280_v8  ;;  %632 = vmatprep.subr.mxu1 %v380_v9  ;;  %v594_v49 = vld [vmem:[%s791_s6] ss:$0 sm:$0xff] }
  0x15   : > { %633 = vmatpush3.msra.mxu1 %v380_v9 }
  0x16   : > { %634 = vmatprep.subr.mxu1 %v379_v10 }
  0x17   : > { %635 = vmatpush3.msra.mxu1 %v379_v10 }
  0x18   : > { %636 = vmatprep.subr.mxu1 %v378_v11 }
  0x19   : > { %637 = vmatpush3.msra.mxu1 %v378_v11 }
  0x1a   : > { %638 = vmatprep.subr.mxu1 %v377_v12 }
  0x1b   : > { %639 = vmatpush3.msra.mxu1 %v377_v12 }
  0x1c   : > { %640 = vmatprep.subr.mxu1 %v376_v13 }
  0x1d   : > { %641 = vmatpush3.msra.mxu1 %v376_v13 }
  0xd4   : > { %v625_v15 = vpop.f32.mrf.mxu0 }
  0xd5   : > { %v371_v16 = vadd.f32 %v625_v15, %v587_v14 }
  0xd6   : > { %v365_v17 = vpop.f32.mrf.mxu0 }
  0xd7   : > { %v366_v18 = vadd.f32 %v587_v14, %v365_v17  ;;  %v375_v20 = vmax.f32 %v371_v16, 0.0 }
  0xd9   : > { %v374_v19 = vmax.f32 %v366_v18, 0.0 }
  0xdb   : > { %642 = vmatprep.mubr.msk.f32.mxu1 %vm391_vm1, %v374_v19 }
  0xdc   : > { %643 = vmatmul.mubr.msk.f32.vlgmr.msra.gmra.mxu1 %vm391_vm1, %v375_v20 }
 0x19c   : > { %v644_v21 = vpop.f32.mrf.mxu1 }
 0x19d   : > { %v470_v24 = vadd.f32 %v644_v21, %v590_v22 }
 0x19e   : > { %v464_v23 = vpop.f32.mrf.mxu1 }
 0x19f   : > { %v465_v25 = vadd.f32 %v590_v22, %v464_v23  ;;  %v474_v28 = vadd.f32 %v470_v24, %v280_v8 }
 0x1a1   : > { %v473_v26 = vadd.f32 %v465_v25, %v279_v7  ;;  %v481_v29 = vsel %vm480_vm2, %v474_v28, 0.0 }
 0x1a3   : > { %v477_v27 = vsel %vm292_vm0, %v473_v26, 0.0 }
 0x1a4   : > { %478 = vadd.xlane.f32.xlu0 %v477_v27 }
 0x1a8   : > { %482 = vadd.xlane.f32.xlu0 %v481_v29 }
 0x22d   : > { %v479_v30 = vpop.xlane.xlu0 %478 }
 0x22e   : > { %v485_v31 = vmul.f32 0.03125, %v479_v30 }
 0x230   : > { %v487_v32 = vsub.f32 %v473_v26, %v485_v31 }
 0x231   : > { %v483_v33 = vpop.xlane.xlu0 %482 }
 0x232   : > { %v486_v34 = vmul.f32 0.03125, %v483_v33  ;;  %v489_v35 = vmul.f32 %v487_v32, %v487_v32 }
 0x234   : > { %v488_v36 = vsub.f32 %v474_v28, %v486_v34  ;;  %v491_v37 = vsel %vm292_vm0, %v489_v35, 0.0 }
 0x235   : > { %492 = vadd.xlane.f32.xlu1 %v491_v37 }
 0x236   : > { %v490_v38 = vmul.f32 %v488_v36, %v488_v36 }
 0x238   : > { %v494_v39 = vsel %vm480_vm2, %v490_v38, 0.0 }
 0x239   : > { %495 = vadd.xlane.f32.xlu1 %v494_v39 }
 0x2be   : > { %v493_v40 = vpop.xlane.xlu1 %492 }
 0x2bf   : > { %v497_v41 = vmul.f32 0.03125, %v493_v40 }
 0x2c1   : > { %v499_v42 = vadd.f32 1e-05, %v497_v41 }
 0x2c2   : > { %v496_v43 = vpop.xlane.xlu1 %495 }
 0x2c3   : > { %653 = vrsqrt.f32 %v499_v42  ;;  %v498_v44 = vmul.f32 0.03125, %v496_v43 }
 0x2c5   : > { %v500_v45 = vadd.f32 1e-05, %v498_v44 }
 0x2c7   : > { %655 = vrsqrt.f32 %v500_v45 }
 0x2d0   : > { %v654_v46 = vpop.eup %653 }
 0x2d1   : > { %v503_v48 = vmul.f32 %v654_v46, %v487_v32 }
 0x2d3   : > { %v511_v50 = vmul.f32 %v593_v47, %v503_v48 }
 0x2d4   : > { %v656_v51 = vpop.eup %655 }
 0x2d5   : > { %v519_v52 = vadd.f32 %v594_v49, %v511_v50  ;;  %v504_v53 = vmul.f32 %v656_v51, %v488_v36 }
 0x2d7   : > { %521 = vst.msk [vmem:[%s278_s21] sm:$0xff] %vm292_vm0, %v519_v52  ;;  %v512_v54 = vmul.f32 %v593_v47, %v504_v53 }
 0x2d9   : > { %v520_v55 = vadd.f32 %v594_v49, %v512_v54 }
 0x2db   : > { %522 = vst.msk [vmem:[%s278_s21 + $0x8] sm:$0x3] %vm480_vm2, %v520_v55 }
 0x2dc PF: > { %s17_s24 = sadd.s32 1, %s663_s24  }
 0x2dd   : > { %p14_p4 = scmp.ge.s32.totalorder %s17_s24, 4  }
 0x2df   :  { %16 = sbr.rel (!%p14_p4) target bundleno = 1 (0x1), region = 78 }

// kernel: seq2seq_transformer_forward.12
= control target key start
LH: loop header
LB: loop body
LE: loop exit
PB: predicated region body
PF: predicated region fallthrough
CT: control target
= control target key end

     0   :  { %s2020_s17 = smov 0   ;;  %s2234_s0 = inlined_call_operand.vmem [shape: f32[2,10,32], index: 0, kind: input, shape index: {}, may-alias: {0,1}]   ;;  %s2235_s1 = inlined_call_operand.vmem [shape: f32[2,10,32], index: 1, kind: input, shape index: {}, may-alias: {0,1}]   ;;  %s2236_s2 = inlined_call_operand.vmem [shape: f32[2,10,10], index: 2, kind: input, shape index: {}]   ;;  %s2237_s3 = inlined_call_operand.vmem [shape: f32[32,32], index: 3, kind: input, shape index: {}]   ;;  %s2238_s4 = inlined_call_operand.vmem [shape: f32[1,32], index: 4, kind: input, shape index: {}]   ;;  %s2239_s5 = inlined_call_operand.vmem [shape: f32[32,64], index: 5, kind: input, shape index: {}]   ;;  %s2240_s6 = inlined_call_operand.vmem [shape: f32[1,64], index: 6, kind: input, shape index: {}]   ;;  %s2241_s7 = inlined_call_operand.vmem [shape: f32[32,32], index: 7, kind: input, shape index: {}]   ;;  %s2242_s8 = inlined_call_operand.vmem [shape: f32[1,32], index: 8, kind: input, shape index: {}]   ;;  %s2243_s9 = inlined_call_operand.vmem [shape: f32[1,32], index: 9, kind: input, shape index: {}]   ;;  %s2244_s10 = inlined_call_operand.vmem [shape: f32[1,32], index: 10, kind: input, shape index: {}]   ;;  %s2245_s11 = inlined_call_operand.vmem [shape: f32[2,10,32], index: 11, kind: output, shape index: {}]  }
   0x1 LB: > { %s1691_s18 = sadd.s32 4294967295, %s1948_s17   ;;  %p1695_p0 = scmp.ge.s32.totalorder %s1948_s17, 1  ;;  %s1948_s17 = sphi %s2020_s17, %s21_s17  }
   0x2   : > { %p357_p1 = scmp.lt.s32.totalorder %s1948_s17, 3 }
   0x4   : > { %p358_p2 = pnand %p1695_p0, %p357_p1 }
   0x5   : > { %p407_p3 = scmp.lt.s32.totalorder (!%p358_p2), %s1691_s18, 1  ;;  %s1950_s28 = smov (!%p358_p2), 96  }
   0x6   : > { %361 = sbr.rel (%p358_p2) target bundleno = 2624 (0xa40), region = 64  ;;  %s1951_s29 = smov (!%p358_p2), 120  }
   0x7   : > { %s1952_s15 = smov (!%p358_p2), 112   ;;  %s1953_s16 = smov (!%p358_p2), 88  }
   0x8   : > { %s1955_s20 = smov (!%p358_p2), 104   ;;  %s1956_s21 = smov (!%p358_p2), 72  }
   0x9   : > { %s1957_s22 = smov (!%p358_p2), 8   ;;  %s1959_s12 = smov (!%p358_p2), 24  }
   0xb   : > { %v527_v0 = vld [vmem:[%s2239_s5 + $0x18] sm:$0xff]  ;;  %v526_v1 = vld [vmem:[%s2239_s5 + $0x10] sm:$0xff]  ;;  %v525_v4 = vld [vmem:[%s2239_s5 + $0x8] sm:$0xff]  ;;  %s2247_s18 = smov (!%p407_p3, %s1691_s18), 1  ;;  %vm442_vm0 = vcmask 261120   ;;  %vm616_vm1 = vcmask 64512  }
   0xc   : > { %v434_v2 = vld [vmem:[%s2237_s3 + $0x18] sm:$0xff]  ;;  %1810 = vmatprep.subr.mxu1 %v527_v0  ;;  %v433_v3 = vld [vmem:[%s2237_s3 + $0x10] sm:$0xff]  ;;  %v432_v5 = vld [vmem:[%s2237_s3 + $0x8] sm:$0xff]  ;;  %s2049_s14 = sshll.u32 %s2247_s18, 4  ;;  %vm710_vm2 = vcmask 80896   ;;  %vm714_vm3 = vcmask 74752  }
   0xd   : > { %1799 = vmatprep.subr.mxu0 %v434_v2  ;;  %1811 = vmatpush3.msra.mxu1 %v527_v0  ;;  %v524_v6 = vld [vmem:[%s2239_s5] sm:$0xff]  ;;  %s416_s19 = scalar_lea.vmem %s2235_s1, %s2049_s14  ;;  %s411_s23 = scalar_lea.vmem %s2234_s0, %s2049_s14  ;;  %vm745_vm4 = vcmask 1041408   ;;  %vm1464_vm5 = vcmask 130048   ;;  %vm1467_vm6 = vcmask 195584   ;;  %vm1569_vm7 = vcmask 254976  }
   0xe   : > { %1800 = vmatpush3.msra.mxu0 %v434_v2  ;;  %1812 = vmatprep.subr.mxu1 %v526_v1  ;;  %v431_v7 = vld [vmem:[%s2237_s3] sm:$0xff]  ;;  %v430_v9 = vld [vmem:[%s416_s19 + $0x8] sm:$0x3]  ;;  %s421_s13 = scalar_lea.vmem %s2236_s2, %s2049_s14  ;;  %s1958_s18 = smov 16  }
   0xf   : > { %1801 = vmatprep.subr.mxu0 %v433_v3  ;;  %1813 = vmatpush3.msra.mxu1 %v526_v1  ;;  %v429_v8 = vld [vmem:[%s416_s19] sm:$0xff]  ;;  %v2065_v11 = vld [vmem:[%s411_s23 + $0x8] sm:$0x3]  ;;  %s1954_s19 = smov 80  }
  0x10   : > { %1802 = vmatpush3.msra.mxu0 %v433_v3  ;;  %1814 = vmatprep.subr.mxu1 %v525_v4  ;;  %v2063_v10 = vld [vmem:[%s411_s23] sm:$0xff]  ;;  %v2108_v27 = vld [vmem:[%s421_s13 + $0x8] sm:$0x3]  ;;  %s426_s23 = scalar_lea.vmem %s2245_s11, %s2049_s14 }
  0x11   : > { %1803 = vmatprep.subr.mxu0 %v432_v5  ;;  %1815 = vmatpush3.msra.mxu1 %v525_v4  ;;  %v1707_v12 = vld [vmem:[%s2240_s6] ss:$0 sm:$0xff] }
  0x12   : > { %1804 = vmatpush3.msra.mxu0 %v432_v5  ;;  %1816 = vmatprep.subr.mxu1 %v524_v6  ;;  %v1704_v17 = vld [vmem:[%s2238_s4] ss:$0 sm:$0xff] }
  0x13   : > { %1818 = vmatprep.mubr.msk.f32.mxu1 %vm442_vm0, %v429_v8  ;;  %1817 = vmatpush3.msra.mxu1 %v524_v6  ;;  %v2106_v24 = vld [vmem:[%s421_s13] sm:$0xff] }
  0x14   : > { %1805 = vmatprep.subr.mxu0 %v431_v7  ;;  %1819 = vmatmul.mubr.msk.f32.vlgmr.msra.gmra.mxu1 %vm442_vm0, %v430_v9 }
  0x15   : > { %1806 = vmatpush3.msra.mxu0 %v431_v7  ;;  %1807 = vmatprep.mubr.msk.f32.mxu0 %vm442_vm0, %v2063_v10 }
  0x16   : > { %1808 = vmatmul.mubr.msk.f32.vlgmr.msra.gmra.mxu0 %vm442_vm0, %v2065_v11 }
  0xd4   : > { %v1820_v13 = vpop.f32.mrf.mxu1 }
  0xd5   : > { %v2075_v14 = vadd.f32 %v1820_v13, %v1707_v12 }
  0xd6   : > { %v607_v15 = vpop.f32.mrf.mxu1  ;;  %v1809_v16 = vpop.f32.mrf.mxu0 }
  0xd7   : > { %v2080_v18 = vadd.f32 %v1707_v12, %v607_v15  ;;  %1821 = vmatprep.subr.msk.mxu0 %vm616_vm1, %v2075_v14  ;;  %v2095_v21 = vadd.f32 %v1809_v16, %v1704_v17 }
  0xd8   : > { %1822 = vmatpush3.xpose.msk.msra.mxu0 %vm616_vm1, %v2075_v14  ;;  %v515_v19 = vpop.f32.mrf.mxu0 }
  0xd9   : > { %734 = vrot.lane.b32.xlu1 %v2080_v18, %s1950_s28  ;;  %v2087_v20 = vadd.f32 %v1704_v17, %v515_v19  ;;  %1823 = vmatprep.subr.msk.mxu0 %vm616_vm1, %v2080_v18 }
  0xdb   : > { %1825 = vmatprep.mubr.msk.f32.mxu0 %vm616_vm1, %v2087_v20 }
  0xdc   : > { %1824 = vmatpush3.xpose.msk.msra.mxu0 %vm616_vm1, %v2080_v18 }
  0xdd   : > { %829 = vrot.lane.b32.xlu1 %v2075_v14, %s1951_s29 }
  0xdf   : > { %1826 = vmatmul.mubr.msk.f32.vlgmr.msra.gmra.mxu0 %vm616_vm1, %v2095_v21 }
  0xe1   : > { %827 = vrot.lane.b32.xlu1 %v2080_v18, %s1951_s29 }
  0xe5   : > { %823 = vrot.lane.b32.xlu1 %v2087_v20, %s1951_s29 }
 0x14b   : > { %v735_v36 = vpop.permute.xlu1 %734 }
 0x14f   : > { %v830_v40 = vpop.permute.xlu1 %829 }
 0x153   : > { %v828_v48 = vpop.permute.xlu1 %827 }
 0x157   : > { %v824_v49 = vpop.permute.xlu1 %823 }
 0x19f   : > { %v1827_v22 = vpop.f32.mrf.mxu0 }
 0x1a0   : > { %v705_v25 = vmul.f32 0.35355338, %v1827_v22 }
 0x1a1   : > { %v695_v23 = vpop.f32.mrf.mxu0 }
 0x1a2   : > { %v704_v26 = vmul.f32 0.35355338, %v695_v23  ;;  %v709_v30 = vadd.f32 %v2108_v27, %v705_v25 }
 0x1a4   : > { %v708_v28 = vadd.f32 %v2106_v24, %v704_v26  ;;  %v715_v31 = vsel %vm714_vm3, %v709_v30, -inf }
 0x1a6   : > { %v711_v29 = vsel %vm710_vm2, %v708_v28, -inf }
 0x1a7   : > { %712 = vmax.xlane.f32.xlu0 %v711_v29 }
 0x1ab   : > { %716 = vmax.xlane.f32.xlu0 %v715_v31 }
 0x1c1   : > { %736 = vrot.lane.b32.xlu0 %v2075_v14, %s1950_s28 }
 0x1c5   : > { %1034 = vrot.lane.b32.xlu0 %v2075_v14, %s1952_s15 }
 0x1c9   : > { %825 = vrot.lane.b32.xlu0 %v2095_v21, %s1951_s29 }
 0x1cd   : > { %1028 = vrot.lane.b32.xlu0 %v2087_v20, %s1952_s15 }
 0x230   : > { %v713_v32 = vpop.xlane.xlu0 %712 }
 0x231   : > { %v718_v33 = vsub.f32 %v708_v28, %v713_v32 }
 0x233   : > { %v720_v37 = vmul.f32 1.442695, %v718_v33 }
 0x234   : > { %v717_v34 = vpop.xlane.xlu0 %716 }
 0x235   : > { %v719_v35 = vsub.f32 %v709_v30, %v717_v34 }
 0x237   : > { %v722_v38 = vmul.f32 1.442695, %v719_v35 }
 0x238   : > { %v737_v39 = vpop.permute.xlu0 %736 }
 0x239   : > { %1906 = vpow2.f32 %v722_v38  ;;  %1828 = vmatprep.subr.msk.mxu1 %vm745_vm4, %v737_v39 }
 0x23a   : > { %1829 = vmatpush3.msk.msra.mxu1 %vm745_vm4, %v737_v39  ;;  %1908 = vpow2.f32 %v720_v37 }
 0x23b   : > { %1830 = vmatprep.subr.mxu1 %v735_v36 }
 0x23c   : > { %1831 = vmatpush3.msra.mxu1 %v735_v36  ;;  %v1035_v41 = vpop.permute.xlu0 %1034 }
 0x23d   : > { %1835 = vmatprep.subr.msk.mxu1 %vm616_vm1, %v830_v40  ;;  %1849 = vmatprep.subr.msk.mxu0 %vm616_vm1, %v1035_v41 }
 0x23e   : > { %1850 = vmatpush3.xpose.msk.msra.mxu0 %vm616_vm1, %v1035_v41 }
 0x240   : > { %v826_v42 = vpop.permute.xlu0 %825 }
 0x244   : > { %v1029_v43 = vpop.permute.xlu0 %1028 }
 0x245   : > { %1853 = vmatprep.mubr.msk.f32.mxu0 %vm616_vm1, %v1029_v43 }
 0x246   : > { %v1907_v44 = vpop.eup %1906 }
 0x247   : > { %v727_v45 = vsel %vm714_vm3, %v1907_v44, 0.0  ;;  %v1909_v46 = vpop.eup %1908 }
 0x248   : > { %728 = vadd.xlane.f32.xlu1 %v727_v45  ;;  %v724_v47 = vsel %vm710_vm2, %v1909_v46, 0.0 }
 0x24c   : > { %725 = vadd.xlane.f32.xlu1 %v724_v47 }
 0x25d   : > { %1032 = vrot.lane.b32.xlu1 %v2080_v18, %s1952_s15 }
 0x261   : > { %1030 = vrot.lane.b32.xlu1 %v2095_v21, %s1952_s15 }
 0x2d1   : > { %v729_v50 = vpop.xlane.xlu1 %728 }
 0x2d2   : > { %1910 = vrcp.f32 %v729_v50 }
 0x2d5   : > { %v726_v51 = vpop.xlane.xlu1 %725 }
 0x2d6   : > { %1912 = vrcp.f32 %v726_v51 }
 0x2d9   : > { %v1033_v52 = vpop.permute.xlu1 %1032 }
 0x2da   : > { %1851 = vmatprep.subr.msk.mxu0 %vm616_vm1, %v1033_v52 }
 0x2db   : > { %1852 = vmatpush3.xpose.msk.msra.mxu0 %vm616_vm1, %v1033_v52 }
 0x2dd   : > { %v1031_v53 = vpop.permute.xlu1 %1030 }
 0x2de   : > { %1854 = vmatmul.mubr.msk.f32.vlgmr.msra.gmra.mxu0 %vm616_vm1, %v1031_v53 }
 0x2df   : > { %v1911_v54 = vpop.eup %1910 }
 0x2e0   : > { %v733_v57 = vmul.f32 %v1911_v54, %v1907_v44 }
 0x2e3   : > { %v1913_v55 = vpop.eup %1912 }
 0x2e4   : > { %v732_v56 = vmul.f32 %v1913_v55, %v1909_v46 }
 0x2e6   : > { %1832 = vmatprep.mubr.msk.f32.mxu1 %vm710_vm2, %v732_v56 }
 0x2e7   : > { %1833 = vmatmul.mubr.msk.f32.vlgmr.msra.gmra.mxu1 %vm710_vm2, %v733_v57 }
 0x2e8   : > { %1836 = vmatpush3.xpose.msk.msra.mxu1 %vm616_vm1, %v830_v40  ;;  %1839 = vmatprep.mubr.msk.f32.mxu1 %vm616_vm1, %v824_v49 }
 0x2e9   : > { %1837 = vmatprep.subr.msk.mxu1 %vm616_vm1, %v828_v48 }
 0x2ec   : > { %1838 = vmatpush3.xpose.msk.msra.mxu1 %vm616_vm1, %v828_v48 }
 0x2ef   : > { %1840 = vmatmul.mubr.msk.f32.vlgmr.msra.gmra.mxu1 %vm616_vm1, %v826_v42 }
 0x39e   : > { %v1855_v59 = vpop.f32.mrf.mxu0 }
 0x39f   : > { %v1120_v6 = vmul.f32 0.35355338, %v1855_v59 }
 0x3a0   : > { %v1110_v61 = vpop.f32.mrf.mxu0 }
 0x3a1   : > { %v1119_v1 = vmul.f32 0.35355338, %v1110_v61  ;;  %v1122_v12 = vadd.f32 %v1120_v6, %v2108_v27 }
 0x3a3   : > { %v1121_v8 = vadd.f32 %v1119_v1, %v2106_v24  ;;  %v1126_v13 = vsel %vm714_vm3, %v1122_v12, -inf }
 0x3a5   : > { %v1123_v9 = vsel %vm710_vm2, %v1121_v8, -inf }
 0x3a7   : > { %v2142_v58 = vpop.f32.mrf.mxu1 }
 0x3a9   : > { %v2144_v60 = vpop.f32.mrf.mxu1 }
 0x3af   : > { %v1841_v62 = vpop.f32.mrf.mxu1 }
 0x3b0   : > { %v915_v63 = vmul.f32 0.35355338, %v1841_v62 }
 0x3b1   : > { %v905_v0 = vpop.f32.mrf.mxu1 }
 0x3b2   : > { %v914_v2 = vmul.f32 0.35355338, %v905_v0  ;;  %v917_v3 = vadd.f32 %v915_v63, %v2108_v27 }
 0x3b4   : > { %v921_v4 = vsel %vm714_vm3, %v917_v3, -inf  ;;  %v916_v5 = vadd.f32 %v914_v2, %v2106_v24 }
 0x3b5   : > { %922 = vmax.xlane.f32.xlu1 %v921_v4 }
 0x3b6   : > { %v918_v7 = vsel %vm710_vm2, %v916_v5, -inf }
 0x3b7   : > { %919 = vmax.xlane.f32.xlu0 %v918_v7 }
 0x3bb   : > { %1124 = vmax.xlane.f32.xlu0 %v1123_v9 }
 0x3bf   : > { %1127 = vmax.xlane.f32.xlu0 %v1126_v13 }
 0x43e   : > { %v923_v17 = vpop.xlane.xlu1 %922 }
 0x43f   : > { %v925_v23 = vsub.f32 %v917_v3, %v923_v17 }
 0x440   : > { %v920_v15 = vpop.xlane.xlu0 %919 }
 0x441   : > { %v924_v16 = vsub.f32 %v916_v5, %v920_v15  ;;  %v928_v30 = vmul.f32 1.442695, %v925_v23 }
 0x443   : > { %v926_v25 = vmul.f32 1.442695, %v924_v16 }
 0x444   : > { %v1125_v19 = vpop.xlane.xlu0 %1124 }
 0x445   : > { %v1129_v22 = vsub.f32 %v1121_v8, %v1125_v19 }
 0x447   : > { %v1131_v26 = vmul.f32 1.442695, %v1129_v22 }
 0x448   : > { %v1128_v28 = vpop.xlane.xlu0 %1127 }
 0x449   : > { %1914 = vpow2.f32 %v1131_v26  ;;  %v1130_v29 = vsub.f32 %v1122_v12, %v1128_v28 }
 0x44a   : > { %1916 = vpow2.f32 %v926_v25 }
 0x44b   : > { %v1133_v31 = vmul.f32 1.442695, %v1130_v29 }
 0x44d   : > { %1918 = vpow2.f32 %v1133_v31  ;;  %v1472_v31 = vld [vmem:[%s2241_s7 + $0x10] sm:$0xff] }
 0x44e   : > { %1920 = vpow2.f32 %v928_v30 }
 0x456   : > { %v1915_v32 = vpop.eup %1914 }
 0x457   : > { %v1135_v33 = vsel %vm710_vm2, %v1915_v32, 0.0  ;;  %v1917_v34 = vpop.eup %1916 }
 0x458   : > { %1136 = vadd.xlane.f32.xlu0 %v1135_v33  ;;  %v930_v36 = vsel %vm710_vm2, %v1917_v34, 0.0  ;;  %v1470_v33 = vld [vmem:[%s2241_s7] sm:$0xff] }
 0x45a   : > { %v1919_v35 = vpop.eup %1918 }
 0x45b   : > { %v1138_v37 = vsel %vm714_vm3, %v1919_v35, 0.0  ;;  %v1921_v38 = vpop.eup %1920 }
 0x45c   : > { %931 = vadd.xlane.f32.xlu0 %v930_v36  ;;  %1139 = vadd.xlane.f32.xlu1 %v1138_v37  ;;  %v933_v39 = vsel %vm714_vm3, %v1921_v38, 0.0 }
 0x460   : > { %934 = vadd.xlane.f32.xlu1 %v933_v39 }
 0x471   : > { %940 = vrot.lane.b32.xlu1 %v2080_v18, %s1953_s16 }
 0x472   : > { %942 = vrot.lane.b32.xlu0 %v2075_v14, %s1953_s16 }
 0x475   : > { %1147 = vrot.lane.b32.xlu1 %v2075_v14, %s1954_s19 }
 0x476   : > { %1239 = vrot.lane.b32.xlu0 %v2075_v14, %s1955_s20 }
 0x479   : > { %1145 = vrot.lane.b32.xlu1 %v2080_v18, %s1954_s19 }
 0x47a   : > { %1233 = vrot.lane.b32.xlu0 %v2087_v20, %s1955_s20 }
 0x47d   : > { %1237 = vrot.lane.b32.xlu1 %v2080_v18, %s1955_s20 }
 0x481   : > { %1235 = vrot.lane.b32.xlu1 %v2095_v21, %s1955_s20 }
 0x4e1   : > { %v1137_v40 = vpop.xlane.xlu0 %1136 }
 0x4e5   : > { %v1140_v41 = vpop.xlane.xlu1 %1139  ;;  %v932_v42 = vpop.xlane.xlu0 %931 }
 0x4e6   : > { %1922 = vrcp.f32 %v932_v42 }
 0x4e7   : > { %1924 = vrcp.f32 %v1137_v40 }
 0x4e9   : > { %v935_v43 = vpop.xlane.xlu1 %934  ;;  %v943_v44 = vpop.permute.xlu0 %942 }
 0x4ea   : > { %1926 = vrcp.f32 %v935_v43  ;;  %1842 = vmatprep.subr.msk.mxu1 %vm745_vm4, %v943_v44 }
 0x4eb   : > { %1843 = vmatpush3.msk.msra.mxu1 %vm745_vm4, %v943_v44  ;;  %1928 = vrcp.f32 %v1140_v41 }
 0x4ed   : > { %v941_v45 = vpop.permute.xlu1 %940  ;;  %v1240_v49 = vpop.permute.xlu0 %1239 }
 0x4ee   : > { %1844 = vmatprep.subr.mxu1 %v941_v45 }
 0x4ef   : > { %1845 = vmatpush3.msra.mxu1 %v941_v45 }
 0x4f1   : > { %v1148_v20 = vpop.permute.xlu1 %1147  ;;  %v1234_v55 = vpop.permute.xlu0 %1233 }
 0x4f2   : > { %1856 = vmatprep.subr.msk.mxu1 %vm745_vm4, %v1148_v20 }
 0x4f3   : > { %v1923_v21 = vpop.eup %1922 }
 0x4f4   : > { %v938_v46 = vmul.f32 %v1923_v21, %v1917_v34  ;;  %v1925_v47 = vpop.eup %1924 }
 0x4f5   : > { %v1146_v52 = vpop.permute.xlu1 %1145  ;;  %v1143_v53 = vmul.f32 %v1925_v47, %v1915_v32  ;;  %v1471_v32 = vld [vmem:[%s2241_s7 + $0x8] sm:$0xff] }
 0x4f6   : > { %1846 = vmatprep.mubr.msk.f32.mxu1 %vm710_vm2, %v938_v46  ;;  %v1738_v46 = vld [vmem:[%s2242_s8] ss:$0 sm:$0xff] }
 0x4f7   : > { %v1927_v48 = vpop.eup %1926 }
 0x4f8   : > { %v939_v50 = vmul.f32 %v1927_v48, %v1921_v38  ;;  %v1929_v51 = vpop.eup %1928 }
 0x4f9   : > { %v1144_v54 = vmul.f32 %v1929_v51, %v1919_v35  ;;  %v1238_v56 = vpop.permute.xlu1 %1237 }
 0x4fa   : > { %1847 = vmatmul.mubr.msk.f32.vlgmr.msra.gmra.mxu1 %vm710_vm2, %v939_v50 }
 0x4fb   : > { %1857 = vmatpush3.msk.msra.mxu1 %vm745_vm4, %v1148_v20  ;;  %1860 = vmatprep.mubr.msk.f32.mxu1 %vm710_vm2, %v1143_v53 }
 0x4fc   : > { %1858 = vmatprep.subr.mxu1 %v1146_v52 }
 0x4fd   : > { %1859 = vmatpush3.msra.mxu1 %v1146_v52  ;;  %v1236_v57 = vpop.permute.xlu1 %1235 }
 0x4fe   : > { %1863 = vmatprep.subr.msk.mxu1 %vm616_vm1, %v1240_v49  ;;  %1861 = vmatmul.mubr.msk.f32.vlgmr.msra.gmra.mxu1 %vm710_vm2, %v1144_v54 }
 0x4ff   : > { %1864 = vmatpush3.xpose.msk.msra.mxu1 %vm616_vm1, %v1240_v49  ;;  %1867 = vmatprep.mubr.msk.f32.mxu1 %vm616_vm1, %v1234_v55 }
 0x500   : > { %1865 = vmatprep.subr.msk.mxu1 %vm616_vm1, %v1238_v56 }
 0x503   : > { %1866 = vmatpush3.xpose.msk.msra.mxu1 %vm616_vm1, %v1238_v56 }
 0x506   : > { %1868 = vmatmul.mubr.msk.f32.vlgmr.msra.gmra.mxu1 %vm616_vm1, %v1236_v57 }
 0x5ba   : > { %v1848_v59 = vpop.f32.mrf.mxu1 }
 0x5bc   : > { %v1019_v61 = vpop.f32.mrf.mxu1 }
 0x5be   : > { %v1862_v62 = vpop.f32.mrf.mxu1 }
 0x5c0   : > { %v1224_v63 = vpop.f32.mrf.mxu1 }
 0x5c6   : > { %v1869_v0 = vpop.f32.mrf.mxu1 }
 0x5c7   : > { %v1325_v1 = vmul.f32 0.35355338, %v1869_v0 }
 0x5c8   : > { %v1315_v2 = vpop.f32.mrf.mxu1 }
 0x5c9   : > { %v1324_v3 = vmul.f32 0.35355338, %v1315_v2  ;;  %v1327_v4 = vadd.f32 %v1325_v1, %v2108_v27 }
 0x5cb   : > { %v1326_v5 = vadd.f32 %v1324_v3, %v2106_v24  ;;  %v1331_v6 = vsel %vm714_vm3, %v1327_v4, -inf }
 0x5cc   : > { %1332 = vmax.xlane.f32.xlu1 %v1331_v6  ;;  %v1741_v6 = vld [vmem:[%s2243_s9] ss:$0 sm:$0xff] }
 0x5cd   : > { %v1328_v7 = vsel %vm710_vm2, %v1326_v5, -inf }
 0x5ce   : > { %1329 = vmax.xlane.f32.xlu0 %v1328_v7 }
 0x5dd   : > { %1350 = vrot.lane.b32.xlu1 %v2080_v18, %s1956_s21 }
 0x5e1   : > { %1440 = vrot.lane.b32.xlu1 %v1019_v61, %s1957_s22 }
 0x5e5   : > { %1442 = vrot.lane.b32.xlu1 %v1848_v59, %s1957_s22 }
 0x5e9   : > { %1450 = vrot.lane.b32.xlu1 %v1862_v62, %s1958_s18 }
 0x655   : > { %v1333_v8 = vpop.xlane.xlu1 %1332 }
 0x656   : > { %v1335_v9 = vsub.f32 %v1327_v4, %v1333_v8  ;;  %v1742_v8 = vld [vmem:[%s2244_s10] ss:$0 sm:$0xff] }
 0x657   : > { %v1330_v12 = vpop.xlane.xlu0 %1329 }
 0x658   : > { %v1338_v27 = vmul.f32 1.442695, %v1335_v9  ;;  %v1334_v13 = vsub.f32 %v1326_v5, %v1330_v12 }
 0x659   : > { %v1351_v25 = vpop.permute.xlu1 %1350 }
 0x65a   : > { %1930 = vpow2.f32 %v1338_v27  ;;  %v1336_v24 = vmul.f32 1.442695, %v1334_v13 }
 0x65c   : > { %1932 = vpow2.f32 %v1336_v24 }
 0x65d   : > { %v1441_v36 = vpop.permute.xlu1 %1440 }
 0x65e   : > { %v1462_v40 = vsel %vm616_vm1, %v2144_v60, %v1441_v36 }
 0x661   : > { %v1443_v37 = vpop.permute.xlu1 %1442 }
 0x662   : > { %v1463_v42 = vsel %vm616_vm1, %v2142_v58, %v1443_v37 }
 0x665   : > { %v1451_v38 = vpop.permute.xlu1 %1450 }
 0x666   : > { %v1466_v45 = vsel %vm1464_vm5, %v1463_v42, %v1451_v38 }
 0x667   : > { %v1931_v15 = vpop.eup %1930 }
 0x668   : > { %v1343_v16 = vsel %vm714_vm3, %v1931_v15, 0.0 }
 0x669   : > { %v1933_v17 = vpop.eup %1932  ;;  %1344 = vadd.xlane.f32.xlu0 %v1343_v16 }
 0x66a   : > { %v1340_v18 = vsel %vm710_vm2, %v1933_v17, 0.0 }
 0x66d   : > { %1341 = vadd.xlane.f32.xlu0 %v1340_v18 }
 0x683   : > { %1352 = vrot.lane.b32.xlu0 %v2075_v14, %s1956_s21  ;;  %v1473_v14 = vld [vmem:[%s2241_s7 + $0x18] sm:$0xff] }
 0x687   : > { %1448 = vrot.lane.b32.xlu0 %v1224_v63, %s1958_s18 }
 0x6f2   : > { %v1345_v19 = vpop.xlane.xlu0 %1344 }
 0x6f3   : > { %1934 = vrcp.f32 %v1345_v19 }
 0x6f6   : > { %v1342_v22 = vpop.xlane.xlu0 %1341 }
 0x6f7   : > { %1936 = vrcp.f32 %v1342_v22 }
 0x6fa   : > { %v1353_v23 = vpop.permute.xlu0 %1352 }
 0x6fb   : > { %1870 = vmatprep.subr.msk.mxu0 %vm745_vm4, %v1353_v23 }
 0x6fc   : > { %1871 = vmatpush3.msk.msra.mxu0 %vm745_vm4, %v1353_v23 }
 0x6fd   : > { %1872 = vmatprep.subr.mxu0 %v1351_v25 }
 0x6fe   : > { %1873 = vmatpush3.msra.mxu0 %v1351_v25  ;;  %v1449_v39 = vpop.permute.xlu0 %1448 }
 0x6ff   : > { %1877 = vmatprep.subr.mxu0 %v1473_v14  ;;  %v1465_v43 = vsel %vm1464_vm5, %v1462_v40, %v1449_v39 }
 0x700   : > { %v1935_v26 = vpop.eup %1934 }
 0x701   : > { %v1349_v30 = vmul.f32 %v1935_v26, %v1931_v15 }
 0x704   : > { %v1937_v28 = vpop.eup %1936 }
 0x705   : > { %v1348_v29 = vmul.f32 %v1937_v28, %v1933_v17 }
 0x707   : > { %1874 = vmatprep.mubr.msk.f32.mxu0 %vm710_vm2, %v1348_v29 }
 0x708   : > { %1875 = vmatmul.mubr.msk.f32.vlgmr.msra.gmra.mxu0 %vm710_vm2, %v1349_v30 }
 0x709   : > { %1878 = vmatpush3.msra.mxu0 %v1473_v14 }
 0x70a   : > { %1879 = vmatprep.subr.mxu0 %v1472_v31 }
 0x70b   : > { %1880 = vmatpush3.msra.mxu0 %v1472_v31 }
 0x70c   : > { %1881 = vmatprep.subr.mxu0 %v1471_v32 }
 0x70d   : > { %1882 = vmatpush3.msra.mxu0 %v1471_v32 }
 0x70e   : > { %1883 = vmatprep.subr.mxu0 %v1470_v33 }
 0x70f   : > { %1884 = vmatpush3.msra.mxu0 %v1470_v33 }
 0x7c8   : > { %v1876_v34 = vpop.f32.mrf.mxu0 }
 0x7c9   : > { %1458 = vrot.lane.b32.xlu1 %v1876_v34, %s1959_s12 }
 0x7ca   : > { %v1429_v35 = vpop.f32.mrf.mxu0 }
 0x7cb   : > { %1456 = vrot.lane.b32.xlu0 %v1429_v35, %s1959_s12 }
 0x83b   : > { %v1459_v41 = vpop.permute.xlu1 %1458 }
 0x83c   : > { %v1469_v21 = vsel %vm1467_vm6, %v1466_v45, %v1459_v41 }
 0x83d   : > { %v1457_v44 = vpop.permute.xlu0 %1456 }
 0x83e   : > { %v1468_v20 = vsel %vm1467_vm6, %v1465_v43, %v1457_v44 }
 0x83f   : > { %1885 = vmatprep.mubr.msk.f32.mxu0 %vm442_vm0, %v1468_v20 }
 0x840   : > { %1886 = vmatmul.mubr.msk.f32.vlgmr.msra.gmra.mxu0 %vm442_vm0, %v1469_v21 }
 0x900   : > { %v1887_v47 = vpop.f32.mrf.mxu0 }
 0x901   : > { %v1559_v60 = vadd.f32 %v1887_v47, %v1738_v46 }
 0x902   : > { %v1553_v48 = vpop.f32.mrf.mxu0 }
 0x903   : > { %v1554_v49 = vadd.f32 %v1738_v46, %v1553_v48  ;;  %v1563_v58 = vadd.f32 %v1559_v60, %v2065_v11 }
 0x905   : > { %v1570_v50 = vsel %vm1569_vm7, %v1563_v58, 0.0  ;;  %v1562_v51 = vadd.f32 %v1554_v49, %v2063_v10 }
 0x906   : > { %1571 = vadd.xlane.f32.xlu1 %v1570_v50 }
 0x907   : > { %v1566_v52 = vsel %vm442_vm0, %v1562_v51, 0.0 }
 0x908   : > { %1567 = vadd.xlane.f32.xlu0 %v1566_v52 }
 0x98f   : > { %v1572_v53 = vpop.xlane.xlu1 %1571 }
 0x990   : > { %v1575_v54 = vmul.f32 0.03125, %v1572_v53 }
 0x991   : > { %v1568_v55 = vpop.xlane.xlu0 %1567 }
 0x992   : > { %v1574_v56 = vmul.f32 0.03125, %v1568_v55  ;;  %v1577_v57 = vsub.f32 %v1563_v58, %v1575_v54 }
 0x994   : > { %v1576_v59 = vsub.f32 %v1562_v51, %v1574_v56  ;;  %v1579_v63 = vmul.f32 %v1577_v57, %v1577_v57 }
 0x996   : > { %v1578_v61 = vmul.f32 %v1576_v59, %v1576_v59  ;;  %v1583_v11 = vsel %vm1569_vm7, %v1579_v63, 0.0 }
 0x998   : > { %v1580_v62 = vsel %vm442_vm0, %v1578_v61, 0.0 }
 0x999   : > { %1581 = vadd.xlane.f32.xlu0 %v1580_v62 }
 0x99d   : > { %1584 = vadd.xlane.f32.xlu0 %v1583_v11 }
 0xa22   : > { %v1582_v10 = vpop.xlane.xlu0 %1581 }
 0xa23   : > { %v1586_v0 = vmul.f32 0.03125, %v1582_v10 }
 0xa25   : > { %v1588_v1 = vadd.f32 1e-05, %v1586_v0 }
 0xa26   : > { %v1585_v2 = vpop.xlane.xlu0 %1584 }
 0xa27   : > { %1938 = vrsqrt.f32 %v1588_v1  ;;  %v1587_v3 = vmul.f32 0.03125, %v1585_v2 }
 0xa29   : > { %v1589_v4 = vadd.f32 1e-05, %v1587_v3 }
 0xa2b   : > { %1940 = vrsqrt.f32 %v1589_v4 }
 0xa34   : > { %v1939_v5 = vpop.eup %1938 }
 0xa35   : > { %v1592_v7 = vmul.f32 %v1939_v5, %v1576_v59 }
 0xa37   : > { %v1600_v9 = vmul.f32 %v1741_v6, %v1592_v7 }
 0xa38   : > { %v1941_v12 = vpop.eup %1940 }
 0xa39   : > { %v1608_v27 = vadd.f32 %v1742_v8, %v1600_v9  ;;  %v1593_v13 = vmul.f32 %v1941_v12, %v1577_v57 }
 0xa3b   : > { %1610 = vst.msk [vmem:[%s426_s23] sm:$0xff] %vm442_vm0, %v1608_v27  ;;  %v1601_v24 = vmul.f32 %v1741_v6, %v1593_v13 }
 0xa3d   : > { %v1609_v15 = vadd.f32 %v1742_v8, %v1601_v24 }
 0xa3f   : > { %1611 = vst.msk [vmem:[%s426_s23 + $0x8] sm:$0x3] %vm1569_vm7, %v1609_v15 }
 0xa40 PF: > { %s21_s17 = sadd.s32 1, %s1948_s17  }
 0xa41   : > { %p18_p4 = scmp.ge.s32.totalorder %s21_s17, 4  }
 0xa43   :  { %20 = sbr.rel (!%p18_p4) target bundleno = 1 (0x1), region = 100 }

// kernel: seq2seq_transformer_forward.19
= control target key start
LH: loop header
LB: loop body
LE: loop exit
PB: predicated region body
PF: predicated region fallthrough
CT: control target
= control target key end

     0   :  { %s656_s24 = smov 0   ;;  %s734_s0 = inlined_call_operand.vmem [shape: f32[2,8,32], index: 0, kind: input, shape index: {}]   ;;  %s735_s1 = inlined_call_operand.vmem [shape: f32[32,64], index: 1, kind: input, shape index: {}]   ;;  %s736_s2 = inlined_call_operand.vmem [shape: f32[1,64], index: 2, kind: input, shape index: {}]   ;;  %s737_s3 = inlined_call_operand.vmem [shape: f32[64,32], index: 3, kind: input, shape index: {}]   ;;  %s738_s4 = inlined_call_operand.vmem [shape: f32[1,32], index: 4, kind: input, shape index: {}]   ;;  %s739_s5 = inlined_call_operand.vmem [shape: f32[1,32], index: 5, kind: input, shape index: {}]   ;;  %s740_s6 = inlined_call_operand.vmem [shape: f32[1,32], index: 6, kind: input, shape index: {}]   ;;  %s741_s7 = inlined_call_operand.vmem [shape: f32[2,8,32], index: 7, kind: output, shape index: {}]  }
   0x1 LB: > { %s535_s25 = sadd.s32 4294967295, %s612_s24   ;;  %p539_p0 = scmp.ge.s32.totalorder %s612_s24, 1  ;;  %s612_s24 = sphi %s656_s24, %s17_s24  }
   0x2   : > { %p236_p1 = scmp.lt.s32.totalorder %s612_s24, 3 }
   0x4   : > { %p237_p2 = pnand %p539_p0, %p236_p1 }
   0x5   : > { %p266_p3 = scmp.lt.s32.totalorder (!%p237_p2), %s535_s25, 1 }
   0x6   : > { %240 = sbr.rel (%p237_p2) target bundleno = 723 (0x2d3), region = 48 }
   0xb   : > { %v278_v0 = vld [vmem:[%s735_s1 + $0x18] sm:$0xff]  ;;  %v614_v1 = vmov 0.0   ;;  %v277_v2 = vld [vmem:[%s735_s1 + $0x10] sm:$0xff]  ;;  %vm615_vm0 = vmmov 0   ;;  %s743_s25 = smov (!%p266_p3, %s535_s25), 1  ;;  %v276_v5 = vld [vmem:[%s735_s1 + $0x8] sm:$0xff] }
   0xc   : > { %564 = vmatprep.subr.mxu0 %v614_v1  ;;  %572 = vmatprep.mubr.msk.f32.mxu0 %vm615_vm0, %v614_v1  ;;  %v368_v3 = vld [vmem:[%s737_s3 + $0x38] sm:$0xff]  ;;  %v367_v4 = vld [vmem:[%s737_s3 + $0x30] sm:$0xff]  ;;  %s540_s13 = sshll.u32 %s743_s25, 3  ;;  %v366_v6 = vld [vmem:[%s737_s3 + $0x28] sm:$0xff]  ;;  %vm286_vm1 = vcmask 261120   ;;  %vm376_vm2 = vcmask 523264  }
   0xd   : > { %565 = vmatpush3.msra.mxu0 %v278_v0  ;;  %575 = vmatprep.subr.mxu1 %v614_v1  ;;  %v275_v7 = vld [vmem:[%s735_s1] sm:$0xff]  ;;  %s269_s20 = scalar_lea.vmem %s734_s0, %s540_s13  ;;  %v364_v10 = vld [vmem:[%s737_s3 + $0x18] sm:$0xff]  ;;  %v363_v11 = vld [vmem:[%s737_s3 + $0x10] sm:$0xff]  ;;  %s273_s21 = scalar_lea.vmem %s741_s7, %s540_s13 }
   0xe   : > { %566 = vmatprep.subr.mxu0 %v614_v1  ;;  %576 = vmatpush3.msra.mxu1 %v368_v3  ;;  %v274_v8 = vld [vmem:[%s269_s20] sm:$0xff]  ;;  %v362_v12 = vld [vmem:[%s737_s3 + $0x8] sm:$0xff] }
   0xf   : > { %567 = vmatpush3.msra.mxu0 %v277_v2  ;;  %577 = vmatprep.subr.mxu1 %v614_v1  ;;  %v365_v9 = vld [vmem:[%s737_s3 + $0x20] sm:$0xff] }
  0x10   : > { %568 = vmatprep.subr.mxu0 %v614_v1  ;;  %578 = vmatpush3.msra.mxu1 %v367_v4  ;;  %v361_v13 = vld [vmem:[%s737_s3] sm:$0xff] }
  0x11   : > { %569 = vmatpush3.msra.mxu0 %v276_v5  ;;  %579 = vmatprep.subr.mxu1 %v614_v1  ;;  %v542_v14 = vld [vmem:[%s736_s2] ss:$0 sm:$0xff] }
  0x12   : > { %570 = vmatprep.subr.mxu0 %v614_v1  ;;  %580 = vmatpush3.msra.mxu1 %v366_v6  ;;  %v544_v19 = vld [vmem:[%s738_s4] ss:$0 sm:$0xff] }
  0x13   : > { %571 = vmatpush3.msra.mxu0 %v275_v7  ;;  %581 = vmatprep.subr.mxu1 %v614_v1  ;;  %v546_v34 = vld [vmem:[%s739_s5] ss:$0 sm:$0xff] }
  0x14   : > { %573 = vmatmul.mubr.msk.f32.vlgmr.msra.gmra.mxu0 %vm286_vm1, %v274_v8  ;;  %582 = vmatpush3.msra.mxu1 %v365_v9  ;;  %v547_v36 = vld [vmem:[%s740_s6] ss:$0 sm:$0xff] }
  0x15   : > { %583 = vmatprep.subr.mxu1 %v614_v1  ;;  %591 = vmatprep.mubr.msk.f32.mxu1 %vm615_vm0, %v614_v1 }
  0x16   : > { %584 = vmatpush3.msra.mxu1 %v364_v10 }
  0x17   : > { %585 = vmatprep.subr.mxu1 %v614_v1 }
  0x18   : > { %586 = vmatpush3.msra.mxu1 %v363_v11 }
  0x19   : > { %587 = vmatprep.subr.mxu1 %v614_v1 }
  0x1a   : > { %588 = vmatpush3.msra.mxu1 %v362_v12 }
  0x1b   : > { %589 = vmatprep.subr.mxu1 %v614_v1 }
  0x1c   : > { %590 = vmatpush3.msra.mxu1 %v361_v13 }
  0xd4   : > { %v356_v15 = vpop.f32.mrf.mxu0 }
  0xd5   : > { %v357_v16 = vadd.f32 %v542_v14, %v356_v15 }
  0xd6   : > { %v574_v17 = vpop.f32.mrf.mxu0 }
  0xd7   : > { %v360_v18 = vmax.f32 %v357_v16, 0.0 }
  0xd9   : > { %592 = vmatmul.mubr.msk.f32.vlgmr.msra.gmra.mxu1 %vm376_vm2, %v360_v18 }
 0x199   : > { %v446_v20 = vpop.f32.mrf.mxu1 }
 0x19a   : > { %v447_v21 = vadd.f32 %v544_v19, %v446_v20 }
 0x19b   : > { %v593_v22 = vpop.f32.mrf.mxu1 }
 0x19c   : > { %v450_v23 = vadd.f32 %v447_v21, %v274_v8 }
 0x19e   : > { %v453_v24 = vsel %vm286_vm1, %v450_v23, 0.0 }
 0x19f   : > { %454 = vadd.xlane.f32.xlu0 %v453_v24 }
 0x228   : > { %v455_v25 = vpop.xlane.xlu0 %454 }
 0x229   : > { %v457_v26 = vmul.f32 0.03125, %v455_v25 }
 0x22b   : > { %v458_v27 = vsub.f32 %v450_v23, %v457_v26 }
 0x22d   : > { %v459_v28 = vmul.f32 %v458_v27, %v458_v27 }
 0x22f   : > { %v460_v29 = vsel %vm286_vm1, %v459_v28, 0.0 }
 0x230   : > { %461 = vadd.xlane.f32.xlu0 %v460_v29 }
 0x2b9   : > { %v462_v30 = vpop.xlane.xlu0 %461 }
 0x2ba   : > { %v463_v31 = vmul.f32 0.03125, %v462_v30 }
 0x2bc   : > { %v464_v32 = vadd.f32 1e-05, %v463_v31 }
 0x2be   : > { %604 = vrsqrt.f32 %v464_v32 }
 0x2cb   : > { %v605_v33 = vpop.eup %604 }
 0x2cc   : > { %v466_v35 = vmul.f32 %v605_v33, %v458_v27 }
 0x2ce   : > { %v473_v37 = vmul.f32 %v546_v34, %v466_v35 }
 0x2d0   : > { %v480_v38 = vadd.f32 %v547_v36, %v473_v37 }
 0x2d2   : > { %481 = vst.msk [vmem:[%s273_s21] sm:$0xff] %vm286_vm1, %v480_v38 }
 0x2d3 PF: > { %s17_s24 = sadd.s32 1, %s612_s24  }
 0x2d4   : > { %p14_p4 = scmp.ge.s32.totalorder %s17_s24, 4  }
 0x2d6   :  { %16 = sbr.rel (!%p14_p4) target bundleno = 1 (0x1), region = 78 }

// kernel: seq2seq_transformer_forward.17
= control target key start
LH: loop header
LB: loop body
LE: loop exit
PB: predicated region body
PF: predicated region fallthrough
CT: control target
= control target key end

     0   :  { %s1718_s17 = smov 0   ;;  %s1881_s0 = inlined_call_operand.vmem [shape: f32[2,8,32], index: 0, kind: input, shape index: {}, may-alias: {0,1}]   ;;  %s1882_s1 = inlined_call_operand.vmem [shape: f32[2,8,32], index: 1, kind: input, shape index: {}, may-alias: {0,1}]   ;;  %s1883_s2 = inlined_call_operand.vmem [shape: f32[2,8,8], index: 2, kind: input, shape index: {}]   ;;  %s1884_s3 = inlined_call_operand.vmem [shape: f32[32,32], index: 3, kind: input, shape index: {}]   ;;  %s1885_s4 = inlined_call_operand.vmem [shape: f32[1,32], index: 4, kind: input, shape index: {}]   ;;  %s1886_s5 = inlined_call_operand.vmem [shape: f32[32,64], index: 5, kind: input, shape index: {}]   ;;  %s1887_s6 = inlined_call_operand.vmem [shape: f32[1,64], index: 6, kind: input, shape index: {}]   ;;  %s1888_s7 = inlined_call_operand.vmem [shape: f32[32,32], index: 7, kind: input, shape index: {}]   ;;  %s1889_s8 = inlined_call_operand.vmem [shape: f32[1,32], index: 8, kind: input, shape index: {}]   ;;  %s1890_s9 = inlined_call_operand.vmem [shape: f32[1,32], index: 9, kind: input, shape index: {}]   ;;  %s1891_s10 = inlined_call_operand.vmem [shape: f32[1,32], index: 10, kind: input, shape index: {}]   ;;  %s1892_s11 = inlined_call_operand.vmem [shape: f32[2,8,32], index: 11, kind: output, shape index: {}]  }
   0x1 LB: > { %s1465_s18 = sadd.s32 4294967295, %s1644_s17   ;;  %p1469_p0 = scmp.ge.s32.totalorder %s1644_s17, 1  ;;  %s1644_s17 = sphi %s1718_s17, %s21_s17  }
   0x2   : > { %p354_p1 = scmp.lt.s32.totalorder %s1644_s17, 3 }
   0x4   : > { %p355_p2 = pnand %p1469_p0, %p354_p1 }
   0x5   : > { %p400_p3 = scmp.lt.s32.totalorder (!%p355_p2), %s1465_s18, 1  ;;  %s1648_s28 = smov (!%p355_p2), 112  }
   0x6   : > { %358 = sbr.rel (%p355_p2) target bundleno = 1667 (0x683), region = 64  ;;  %s1649_s29 = smov (!%p355_p2), 120  }
   0x7   : > { %s1650_s30 = smov (!%p355_p2), 104   ;;  %s1651_s16 = smov (!%p355_p2), 96  }
   0x8   : > { %s1654_s20 = smov (!%p355_p2), 88   ;;  %s1657_s13 = smov (!%p355_p2), 24  }
   0xb   : > { %v506_v0 = vld [vmem:[%s1886_s5 + $0x18] sm:$0xff]  ;;  %v1646_v2 = vmov 0.0   ;;  %v505_v3 = vld [vmem:[%s1886_s5 + $0x10] sm:$0xff]  ;;  %s1894_s18 = smov (!%p400_p3, %s1465_s18), 1  ;;  %v504_v5 = vld [vmem:[%s1886_s5 + $0x8] sm:$0xff]  ;;  %vm429_vm0 = vcmask 261120  }
   0xc   : > { %v421_v1 = vld [vmem:[%s1884_s3 + $0x18] sm:$0xff]  ;;  %1538 = vmatprep.subr.mxu1 %v1646_v2  ;;  %1527 = vmatprep.subr.mxu0 %v1646_v2  ;;  %v420_v4 = vld [vmem:[%s1884_s3 + $0x10] sm:$0xff]  ;;  %v419_v6 = vld [vmem:[%s1884_s3 + $0x8] sm:$0xff]  ;;  %s1748_s12 = sshll.u32 %s1894_s18, 3  ;;  %vm1647_vm1 = vmmov 0   ;;  %vm587_vm2 = vcmask 64512  }
   0xd   : > { %1539 = vmatpush3.msra.mxu1 %v506_v0  ;;  %1528 = vmatpush3.msra.mxu0 %v421_v1  ;;  %v503_v7 = vld [vmem:[%s1886_s5] sm:$0xff]  ;;  %s407_s19 = scalar_lea.vmem %s1882_s1, %s1748_s12  ;;  %s403_s23 = scalar_lea.vmem %s1881_s0, %s1748_s12  ;;  %vm1268_vm3 = vcmask 130048   ;;  %vm1270_vm4 = vcmask 195584  }
   0xe   : > { %1540 = vmatprep.subr.mxu1 %v1646_v2  ;;  %1529 = vmatprep.subr.mxu0 %v1646_v2  ;;  %v417_v8 = vld [vmem:[%s407_s19] sm:$0xff]  ;;  %s411_s15 = scalar_lea.vmem %s1883_s2, %s1748_s12  ;;  %s1652_s19 = smov 80  }
   0xf   : > { %1541 = vmatpush3.msra.mxu1 %v505_v3  ;;  %1530 = vmatpush3.msra.mxu0 %v420_v4  ;;  %v418_v9 = vld [vmem:[%s1884_s3] sm:$0xff]  ;;  %s1653_s18 = smov 72  }
  0x10   : > { %1542 = vmatprep.subr.mxu1 %v1646_v2  ;;  %1531 = vmatprep.subr.mxu0 %v1646_v2  ;;  %v1770_v10 = vld [vmem:[%s403_s23] sm:$0xff]  ;;  %s415_s23 = scalar_lea.vmem %s1892_s11, %s1748_s12 }
  0x11   : > { %1543 = vmatpush3.msra.mxu1 %v504_v5  ;;  %1532 = vmatpush3.msra.mxu0 %v419_v6  ;;  %v1476_v11 = vld [vmem:[%s1887_s6] ss:$0 sm:$0xff] }
  0x12   : > { %1544 = vmatprep.subr.mxu1 %v1646_v2  ;;  %1546 = vmatprep.mubr.msk.f32.mxu1 %vm1647_vm1, %v1646_v2  ;;  %v1474_v13 = vld [vmem:[%s1885_s4] ss:$0 sm:$0xff] }
  0x13   : > { %1545 = vmatpush3.msra.mxu1 %v503_v7  ;;  %1533 = vmatprep.subr.mxu0 %v1646_v2  ;;  %v665_v26 = vld [vmem:[%s411_s15] sm:$0xff] }
  0x14   : > { %1547 = vmatmul.mubr.msk.f32.vlgmr.msra.gmra.mxu1 %vm429_vm0, %v417_v8  ;;  %1534 = vmatpush3.msra.mxu0 %v418_v9 }
  0x15   : > { %1535 = vmatprep.mubr.msk.f32.mxu0 %vm1647_vm1, %v1646_v2  ;;  %1549 = vmatprep.subr.mxu1 %v1646_v2 }
  0x16   : > { %1536 = vmatmul.mubr.msk.f32.vlgmr.msra.gmra.mxu0 %vm429_vm0, %v1770_v10  ;;  %1551 = vmatprep.mubr.msk.f32.mxu1 %vm1647_vm1, %v1646_v2 }
  0x17   : > { %1559 = vmatprep.subr.mxu0 %v1646_v2  ;;  %1561 = vmatprep.mubr.msk.f32.mxu0 %vm1647_vm1, %v1646_v2 }
  0xd4   : > { %v583_v12 = vpop.f32.mrf.mxu1 }
  0xd5   : > { %v1789_v14 = vadd.f32 %v1476_v11, %v583_v12 }
  0xd6   : > { %v499_v15 = vpop.f32.mrf.mxu0  ;;  %v1548_v16 = vpop.f32.mrf.mxu1 }
  0xd7   : > { %v500_v17 = vadd.f32 %v1474_v13, %v499_v15  ;;  %923 = vrot.lane.b32.xlu1 %v1789_v14, %s1648_s28  ;;  %756 = vrot.lane.b32.xlu0 %v1789_v14, %s1649_s29 }
  0xd8   : > { %1550 = vmatpush3.xpose.msk.msra.mxu1 %vm587_vm2, %v1789_v14  ;;  %v1537_v18 = vpop.f32.mrf.mxu0 }
  0xd9   : > { %1554 = vmatprep.subr.mxu1 %v1646_v2 }
  0xdb   : > { %1552 = vmatmul.mubr.msk.f32.vlgmr.msra.gmra.mxu1 %vm587_vm2, %v500_v17  ;;  %921 = vrot.lane.b32.xlu1 %v500_v17, %s1648_s28 }
  0xdc   : > { %754 = vrot.lane.b32.xlu0 %v500_v17, %s1649_s29  ;;  %1556 = vmatprep.mubr.msk.f32.mxu1 %vm1647_vm1, %v1646_v2  ;;  %s1655_s29 = smov 8  }
  0xdf   : > { %1088 = vrot.lane.b32.xlu1 %v500_v17, %s1650_s30 }
  0xe0   : > { %1090 = vrot.lane.b32.xlu0 %v1789_v14, %s1650_s30  ;;  %s1656_s30 = smov 16  }
 0x149   : > { %v757_v19 = vpop.permute.xlu0 %756  ;;  %v924_v20 = vpop.permute.xlu1 %923 }
 0x14a   : > { %1560 = vmatpush3.xpose.msk.msra.mxu0 %vm587_vm2, %v757_v19 }
 0x14b   : > { %1569 = vmatprep.subr.mxu0 %v1646_v2 }
 0x14d   : > { %v922_v22 = vpop.permute.xlu1 %921 }
 0x14e   : > { %v755_v21 = vpop.permute.xlu0 %754 }
 0x14f   : > { %1562 = vmatmul.mubr.msk.f32.vlgmr.msra.gmra.mxu0 %vm587_vm2, %v755_v21 }
 0x150   : > { %1570 = vmatpush3.xpose.msk.msra.mxu0 %vm587_vm2, %v924_v20  ;;  %1571 = vmatprep.mubr.msk.f32.mxu0 %vm1647_vm1, %v1646_v2 }
 0x151   : > { %1579 = vmatprep.subr.mxu0 %v1646_v2  ;;  %v1089_v24 = vpop.permute.xlu1 %1088 }
 0x152   : > { %v1091_v23 = vpop.permute.xlu0 %1090 }
 0x153   : > { %1572 = vmatmul.mubr.msk.f32.vlgmr.msra.gmra.mxu0 %vm587_vm2, %v922_v22  ;;  %v1275_v22 = vld [vmem:[%s1888_s7 + $0x18] sm:$0xff] }
 0x154   : > { %1580 = vmatpush3.xpose.msk.msra.mxu0 %vm587_vm2, %v1091_v23  ;;  %1581 = vmatprep.mubr.msk.f32.mxu0 %vm1647_vm1, %v1646_v2  ;;  %v1274_v23 = vld [vmem:[%s1888_s7 + $0x10] sm:$0xff] }
 0x155   : > { %1589 = vmatprep.subr.mxu0 %v1646_v2 }
 0x157   : > { %1582 = vmatmul.mubr.msk.f32.vlgmr.msra.gmra.mxu0 %vm587_vm2, %v1089_v24  ;;  %v1273_v24 = vld [vmem:[%s1888_s7 + $0x8] sm:$0xff] }
 0x158   : > { %1597 = vmatprep.mubr.msk.f32.mxu0 %vm1647_vm1, %v1646_v2  ;;  %1590 = vmatpush3.msra.mxu0 %v1275_v22 }
 0x159   : > { %1591 = vmatprep.subr.mxu0 %v1646_v2 }
 0x15a   : > { %1592 = vmatpush3.msra.mxu0 %v1274_v23 }
 0x15b   : > { %1593 = vmatprep.subr.mxu0 %v1646_v2 }
 0x15c   : > { %1594 = vmatpush3.msra.mxu0 %v1273_v24 }
 0x15d   : > { %1595 = vmatprep.subr.mxu0 %v1646_v2 }
 0x19b   : > { %v660_v25 = vpop.f32.mrf.mxu1 }
 0x19c   : > { %v664_v27 = vmul.f32 0.35355338, %v660_v25  ;;  %v1272_v25 = vld [vmem:[%s1888_s7] sm:$0xff] }
 0x19d   : > { %v1553_v28 = vpop.f32.mrf.mxu1  ;;  %1596 = vmatpush3.msra.mxu0 %v1272_v25 }
 0x19e   : > { %v666_v29 = vadd.f32 %v665_v26, %v664_v27 }
 0x1a0   : > { %v667_v30 = vsel %vm587_vm2, %v666_v29, -inf }
 0x1a1   : > { %668 = vmax.xlane.f32.xlu0 %v667_v30 }
 0x20f   : > { %v828_v31 = vpop.f32.mrf.mxu0 }
 0x210   : > { %v832_v32 = vmul.f32 0.35355338, %v828_v31 }
 0x211   : > { %v1563_v33 = vpop.f32.mrf.mxu0 }
 0x212   : > { %v833_v34 = vadd.f32 %v832_v32, %v665_v26 }
 0x213   : > { %v995_v35 = vpop.f32.mrf.mxu0 }
 0x214   : > { %v999_v36 = vmul.f32 0.35355338, %v995_v35  ;;  %v834_v37 = vsel %vm587_vm2, %v833_v34, -inf }
 0x215   : > { %835 = vmax.xlane.f32.xlu1 %v834_v37  ;;  %v1573_v38 = vpop.f32.mrf.mxu0  ;;  %v1490_v37 = vld [vmem:[%s1889_s8] ss:$0 sm:$0xff] }
 0x216   : > { %v1000_v39 = vadd.f32 %v999_v36, %v665_v26 }
 0x217   : > { %v1162_v40 = vpop.f32.mrf.mxu0 }
 0x218   : > { %v1166_v41 = vmul.f32 0.35355338, %v1162_v40  ;;  %v1001_v42 = vsel %vm587_vm2, %v1000_v39, -inf }
 0x219   : > { %1002 = vmax.xlane.f32.xlu0 %v1001_v42  ;;  %v1583_v43 = vpop.f32.mrf.mxu0 }
 0x21a   : > { %v1167_v44 = vadd.f32 %v1166_v41, %v665_v26 }
 0x21c   : > { %v1168_v45 = vsel %vm587_vm2, %v1167_v44, -inf }
 0x21d   : > { %1169 = vmax.xlane.f32.xlu0 %v1168_v45 }
 0x226   : > { %678 = vrot.lane.b32.xlu1 %v1789_v14, %s1651_s16 }
 0x22a   : > { %v669_v46 = vpop.xlane.xlu0 %668 }
 0x22b   : > { %v670_v47 = vsub.f32 %v666_v29, %v669_v46 }
 0x22d   : > { %v671_v48 = vmul.f32 1.442695, %v670_v47 }
 0x22f   : > { %1620 = vpow2.f32 %v671_v48 }
 0x23c   : > { %v1621_v49 = vpop.eup %1620 }
 0x23d   : > { %v673_v50 = vsel %vm587_vm2, %v1621_v49, 0.0 }
 0x24a   : > { %674 = vadd.xlane.f32.xlu1 %v673_v50 }
 0x29e   : > { %v836_v51 = vpop.xlane.xlu1 %835 }
 0x29f   : > { %v837_v52 = vsub.f32 %v833_v34, %v836_v51 }
 0x2a1   : > { %v838_v53 = vmul.f32 1.442695, %v837_v52 }
 0x2a2   : > { %v679_v54 = vpop.permute.xlu1 %678  ;;  %v1003_v55 = vpop.xlane.xlu0 %1002 }
 0x2a3   : > { %1622 = vpow2.f32 %v838_v53  ;;  %v1004_v56 = vsub.f32 %v1000_v39, %v1003_v55  ;;  %1555 = vmatpush3.msra.mxu1 %v679_v54  ;;  %v1493_v53 = vld [vmem:[%s1891_s10] ss:$0 sm:$0xff] }
 0x2a4   : > { %1564 = vmatprep.subr.mxu1 %v1646_v2 }
 0x2a5   : > { %v1005_v57 = vmul.f32 1.442695, %v1004_v56 }
 0x2a6   : > { %v1170_v58 = vpop.xlane.xlu0 %1169 }
 0x2a7   : > { %1624 = vpow2.f32 %v1005_v57  ;;  %v1171_v59 = vsub.f32 %v1167_v44, %v1170_v58 }
 0x2a9   : > { %v1172_v60 = vmul.f32 1.442695, %v1171_v59 }
 0x2ab   : > { %1626 = vpow2.f32 %v1172_v60 }
 0x2b0   : > { %v1623_v61 = vpop.eup %1622 }
 0x2b1   : > { %v840_v62 = vsel %vm587_vm2, %v1623_v61, 0.0 }
 0x2b2   : > { %841 = vadd.xlane.f32.xlu0 %v840_v62 }
 0x2b4   : > { %v1625_v63 = vpop.eup %1624 }
 0x2b5   : > { %v1007_v0 = vsel %vm587_vm2, %v1625_v63, 0.0 }
 0x2b6   : > { %1008 = vadd.xlane.f32.xlu1 %v1007_v0 }
 0x2b8   : > { %v1627_v1 = vpop.eup %1626 }
 0x2b9   : > { %v1174_v3 = vsel %vm587_vm2, %v1627_v1, 0.0 }
 0x2ba   : > { %1175 = vadd.xlane.f32.xlu0 %v1174_v3 }
 0x2c7   : > { %1012 = vrot.lane.b32.xlu1 %v1789_v14, %s1652_s19 }
 0x2cb   : > { %1179 = vrot.lane.b32.xlu1 %v1789_v14, %s1653_s18 }
 0x2d0   : > { %845 = vrot.lane.b32.xlu0 %v1789_v14, %s1654_s20 }
 0x2d3   : > { %v675_v4 = vpop.xlane.xlu1 %674 }
 0x2d4   : > { %1628 = vrcp.f32 %v675_v4 }
 0x2e1   : > { %v1629_v5 = vpop.eup %1628 }
 0x2e2   : > { %v677_v6 = vmul.f32 %v1629_v5, %v1621_v49 }
 0x2e4   : > { %1557 = vmatmul.mubr.msk.f32.vlgmr.msra.gmra.mxu1 %vm587_vm2, %v677_v6 }
 0x2e5   : > { %1566 = vmatprep.mubr.msk.f32.mxu1 %vm1647_vm1, %v1646_v2 }
 0x33b   : > { %v842_v7 = vpop.xlane.xlu0 %841 }
 0x33c   : > { %1630 = vrcp.f32 %v842_v7 }
 0x33f   : > { %v1009_v8 = vpop.xlane.xlu1 %1008 }
 0x340   : > { %1632 = vrcp.f32 %v1009_v8 }
 0x343   : > { %v1176_v9 = vpop.xlane.xlu0 %1175  ;;  %v1013_v13 = vpop.permute.xlu1 %1012 }
 0x344   : > { %1634 = vrcp.f32 %v1176_v9 }
 0x347   : > { %v846_v11 = vpop.permute.xlu0 %845  ;;  %v1180_v17 = vpop.permute.xlu1 %1179 }
 0x348   : > { %1565 = vmatpush3.msra.mxu1 %v846_v11 }
 0x349   : > { %v1631_v12 = vpop.eup %1630  ;;  %1574 = vmatprep.subr.mxu1 %v1646_v2 }
 0x34a   : > { %v844_v14 = vmul.f32 %v1631_v12, %v1623_v61 }
 0x34c   : > { %1567 = vmatmul.mubr.msk.f32.vlgmr.msra.gmra.mxu1 %vm587_vm2, %v844_v14 }
 0x34d   : > { %v1633_v15 = vpop.eup %1632  ;;  %1575 = vmatpush3.msra.mxu1 %v1013_v13  ;;  %1576 = vmatprep.mubr.msk.f32.mxu1 %vm1647_vm1, %v1646_v2 }
 0x34e   : > { %1584 = vmatprep.subr.mxu1 %v1646_v2  ;;  %v1011_v16 = vmul.f32 %v1633_v15, %v1625_v63 }
 0x350   : > { %1577 = vmatmul.mubr.msk.f32.vlgmr.msra.gmra.mxu1 %vm587_vm2, %v1011_v16 }
 0x351   : > { %v1635_v18 = vpop.eup %1634  ;;  %1585 = vmatpush3.msra.mxu1 %v1180_v17  ;;  %1586 = vmatprep.mubr.msk.f32.mxu1 %vm1647_vm1, %v1646_v2 }
 0x352   : > { %v1178_v19 = vmul.f32 %v1635_v18, %v1627_v1 }
 0x354   : > { %1587 = vmatmul.mubr.msk.f32.vlgmr.msra.gmra.mxu1 %vm587_vm2, %v1178_v19 }
 0x3a4   : > { %v750_v20 = vpop.f32.mrf.mxu1 }
 0x3a6   : > { %v1558_v21 = vpop.f32.mrf.mxu1 }
 0x40c   : > { %v917_v26 = vpop.f32.mrf.mxu1 }
 0x40d   : > { %1256 = vrot.lane.b32.xlu0 %v917_v26, %s1655_s29 }
 0x40e   : > { %v1568_v27 = vpop.f32.mrf.mxu1 }
 0x410   : > { %v1084_v28 = vpop.f32.mrf.mxu1 }
 0x411   : > { %1260 = vrot.lane.b32.xlu1 %v1084_v28, %s1656_s30 }
 0x412   : > { %v1578_v29 = vpop.f32.mrf.mxu1 }
 0x414   : > { %v1251_v30 = vpop.f32.mrf.mxu1 }
 0x415   : > { %1264 = vrot.lane.b32.xlu0 %v1251_v30, %s1657_s13 }
 0x416   : > { %v1588_v31 = vpop.f32.mrf.mxu1 }
 0x47f   : > { %v1257_v32 = vpop.permute.xlu0 %1256 }
 0x480   : > { %v1267_v33 = vsel %vm587_vm2, %v750_v20, %v1257_v32 }
 0x483   : > { %v1261_v2 = vpop.permute.xlu1 %1260 }
 0x484   : > { %v1269_v34 = vsel %vm1268_vm3, %v1267_v33, %v1261_v2 }
 0x487   : > { %v1265_v35 = vpop.permute.xlu0 %1264 }
 0x488   : > { %v1271_v36 = vsel %vm1270_vm4, %v1269_v34, %v1265_v35 }
 0x489   : > { %1598 = vmatmul.mubr.msk.f32.vlgmr.msra.gmra.mxu0 %vm429_vm0, %v1271_v36 }
 0x549   : > { %v1352_v38 = vpop.f32.mrf.mxu0 }
 0x54a   : > { %v1353_v39 = vadd.f32 %v1490_v37, %v1352_v38 }
 0x54b   : > { %v1599_v40 = vpop.f32.mrf.mxu0 }
 0x54c   : > { %v1356_v41 = vadd.f32 %v1353_v39, %v1770_v10  ;;  %v1492_v10 = vld [vmem:[%s1890_s9] ss:$0 sm:$0xff] }
 0x54e   : > { %v1359_v42 = vsel %vm429_vm0, %v1356_v41, 0.0 }
 0x54f   : > { %1360 = vadd.xlane.f32.xlu1 %v1359_v42 }
 0x5d8   : > { %v1361_v43 = vpop.xlane.xlu1 %1360 }
 0x5d9   : > { %v1363_v44 = vmul.f32 0.03125, %v1361_v43 }
 0x5db   : > { %v1364_v45 = vsub.f32 %v1356_v41, %v1363_v44 }
 0x5dd   : > { %v1365_v46 = vmul.f32 %v1364_v45, %v1364_v45 }
 0x5df   : > { %v1366_v47 = vsel %vm429_vm0, %v1365_v46, 0.0 }
 0x5e0   : > { %1367 = vadd.xlane.f32.xlu0 %v1366_v47 }
 0x669   : > { %v1368_v48 = vpop.xlane.xlu0 %1367 }
 0x66a   : > { %v1369_v49 = vmul.f32 0.03125, %v1368_v48 }
 0x66c   : > { %v1370_v50 = vadd.f32 1e-05, %v1369_v49 }
 0x66e   : > { %1636 = vrsqrt.f32 %v1370_v50 }
 0x67b   : > { %v1637_v51 = vpop.eup %1636 }
 0x67c   : > { %v1372_v52 = vmul.f32 %v1637_v51, %v1364_v45 }
 0x67e   : > { %v1379_v54 = vmul.f32 %v1492_v10, %v1372_v52 }
 0x680   : > { %v1386_v55 = vadd.f32 %v1493_v53, %v1379_v54 }
 0x682   : > { %1387 = vst.msk [vmem:[%s415_s23] sm:$0xff] %vm429_vm0, %v1386_v55 }
 0x683 PF: > { %s21_s17 = sadd.s32 1, %s1644_s17  }
 0x684   : > { %p18_p4 = scmp.ge.s32.totalorder %s21_s17, 4  }
 0x686   :  { %20 = sbr.rel (!%p18_p4) target bundleno = 1 (0x1), region = 100 }

// kernel: seq2seq_transformer_forward.23
= control target key start
LH: loop header
LB: loop body
LE: loop exit
PB: predicated region body
PF: predicated region fallthrough
CT: control target
= control target key end

     0   :  { %10 = vsyncpa [#allocation3], 0  ;;  %s696_s0 = inlined_call_operand.vmem [shape: f32[2,8,32], index: 0, kind: input, shape index: {}]   ;;  %s697_s1 = inlined_call_operand.vmem [shape: f32[1,32], index: 1, kind: input, shape index: {}]   ;;  %s698_s2 = inlined_call_operand.vmem [shape: f32[1,32], index: 2, kind: input, shape index: {}]   ;;  %s699_s3 = inlined_call_operand.vmem [shape: f32[32,29], index: 3, kind: input, shape index: {}]   ;;  %s700_s4 = inlined_call_operand.vmem [shape: f32[1,29], index: 4, kind: input, shape index: {}]   ;;  %s701_s5 = inlined_call_operand.hbm [shape: f32[2,8,29], index: 5, kind: output, shape index: {}]  }
   0x1   :  { %12 = vsyncpa [#allocation3 + $0x1], 0  ;;  %s579_s18 = smov 0   ;;  %s581_s19 = smov 0  }
   0x2   :  { %s583_s20 = smov 0   ;;  %s585_s21 = smov 0  }
   0x3 LB: > { %s600_s22 = sadd.s32 4294967295, %s544_s21   ;;  %s411_s23 = sadd.s32 4294967294, %s544_s21   ;;  %s544_s21 = sphi %s585_s21, %s707_s21   ;;  %s540_s20 = sphi %s583_s20, %s706_s20   ;;  %s536_s19 = sphi %s581_s19, %s705_s19   ;;  %s532_s18 = sphi %s579_s18, %s704_s18  }
   0x4   : > { %s604_s24 = sadd.s32 1, %s544_s21   ;;  %s135_s25 = sadd.s32 1, %s540_s20 }
   0x5   : > { %s132_s26 = ssub.s32 %s544_s21, %s604_s24  ;;  %p145_p0 = scmp.ne.s32.totalorder %s540_s20, %s536_s19 }
   0x6   : > { %p133_p1 = scmp.eq.s32.totalorder %s132_s26, 0  ;;  %p146_p2 = scmp.eq.s32.totalorder %s600_s22, 1 }
   0x7   : > { %p151_p3 = scmp.ne.s32.totalorder %s536_s19, %s532_s18  ;;  %p152_p4 = scmp.eq.s32.totalorder %s411_s23, 1 }
   0x8   : > { %s615_s27 = scalar_select %p133_p1, %s540_s20, %s135_s25  }
   0x9   : > { %p617_p5 = por %p146_p2, %p145_p0  ;;  %p621_p6 = por %p152_p4, %p151_p3 }
   0xa   : > { %p414_p7 = scmp.ge.s32.totalorder %s544_s21, 1  ;;  %p189_p8 = scmp.lt.s32.totalorder %s544_s21, 3 }
   0xc   : > { %p190_p9 = pnand %p414_p7, %p189_p8 }
   0xd   : > { %p216_p10 = scmp.lt.s32.totalorder (!%p190_p9), %s600_s22, 1  ;;  %s422_s10 = sshll.u32 (!%p190_p9), %s600_s22, 7 }
   0xe   : > { %193 = sbr.rel (%p190_p9) target bundleno = 540 (0x21c), region = 40  ;;  %s661_s15 = scalar_lea.hbm (!%p190_p9), %s701_s5, %s422_s10 }
  0x13   : > { %s217_s30 = scalar_select %p216_p10, %s600_s22, 1  ;;  %vm223_vm0 = vcmask 261120   ;;  %v255_v7 = vld [vmem:[%s699_s3 + $0x18] sm:$0xff]  ;;  %v546_v8 = vmov 0.0   ;;  %v254_v9 = vld [vmem:[%s699_s3 + $0x10] sm:$0xff]  ;;  %vm547_vm1 = vmmov 0  }
  0x14   : > { %430 = vmatprep.subr.mxu0 %v546_v8  ;;  %438 = vmatprep.mubr.msk.f32.mxu0 %vm547_vm1, %v546_v8  ;;  %v253_v10 = vld [vmem:[%s699_s3 + $0x8] sm:$0xff]  ;;  %v252_v11 = vld [vmem:[%s699_s3] sm:$0xff]  ;;  %vm336_vm2 = vcmask 236544   ;;  %s548_s22 = smov [#allocation2]  }
  0x15   : > { %s416_s6 = sshll.u32 %s217_s30, 3  ;;  %431 = vmatpush3.msra.mxu0 %v255_v7  ;;  %v417_v16 = vld [vmem:[%s697_s1] ss:$0 sm:$0xff]  ;;  %s488_s23 = sshll.u32 %s548_s22, 4  ;;  %s489_s23 = int_to_ptr.vmem [resolvable:$false] %s488_s23 }
  0x16   : > { %s219_s9 = scalar_lea.vmem %s696_s0, %s416_s6  ;;  %432 = vmatprep.subr.mxu0 %v546_v8  ;;  %v418_v18 = vld [vmem:[%s698_s2] ss:$0 sm:$0xff]  ;;  %s213_s6 = sand.u32 1, %s536_s19  }
  0x17   : > { %v220_v0 = vld [vmem:[%s219_s9] sm:$0xff]  ;;  %433 = vmatpush3.msra.mxu0 %v254_v9  ;;  %s415_s7 = sshll.u32 %s213_s6, 3  ;;  %s339_s16 = scalar_lea.sflag [#allocation3], %s213_s6 }
  0x18   : > { %v224_v1 = vsel %vm223_vm0, %v220_v0, 0.0  ;;  %434 = vmatprep.subr.mxu0 %v546_v8  ;;  %v419_v21 = vld [vmem:[%s700_s4] ss:$0 sm:$0xff]  ;;  %s215_s11 = scalar_lea.vmem [#allocation2], %s415_s7  ;;  %s490_s25 = scalar_lea.vmem %s489_s23, 256 }
  0x19   : > { %225 = vadd.xlane.f32.xlu0 %v224_v1  ;;  %435 = vmatpush3.msra.mxu0 %v253_v10  ;;  %s352_s12 = sshll.u32 %s215_s11, 4  ;;  %s353_s12 = int_to_ptr.vmem [resolvable:$true] %s352_s12 }
  0x1a   : > { %436 = vmatprep.subr.mxu0 %v546_v8  ;;  %s484_s17 = scalar_lea.vmem %s353_s12, 128  ;;  %p491_p0 = scmp.lt.s32.totalorder %s353_s12, %s489_s23 }
  0x1b   : > { %437 = vmatpush3.msra.mxu0 %v252_v11  ;;  %p485_p11 = scmp.ne.s32.totalorder %s353_s12, %s484_s17  ;;  %p492_p1 = scmp.lt.s32.totalorder %s490_s25, %s484_s17 }
  0x1d   : > { %p486_p12 = pnand %p485_p11, %p617_p5  ;;  %p493_p2 = por %p492_p1, %p491_p0 }
  0x1f   : > { %p487_p13 = pneg %p486_p12 }
  0x21   : > { %p494_p3 = pnand %p493_p2, %p487_p13 }
  0xa2   : > { %v226_v2 = vpop.xlane.xlu0 %225 }
  0xa3   : > { %v228_v3 = vmul.f32 0.03125, %v226_v2 }
  0xa5   : > { %v229_v4 = vsub.f32 %v220_v0, %v228_v3 }
  0xa7   : > { %v230_v5 = vmul.f32 %v229_v4, %v229_v4 }
  0xa9   : > { %v231_v6 = vsel %vm223_vm0, %v230_v5, 0.0 }
  0xaa   : > { %232 = vadd.xlane.f32.xlu0 %v231_v6 }
 0x133   : > { %v233_v12 = vpop.xlane.xlu0 %232 }
 0x134   : > { %v234_v13 = vmul.f32 0.03125, %v233_v12 }
 0x136   : > { %v235_v14 = vadd.f32 1e-05, %v234_v13 }
 0x138   : > { %482 = vrsqrt.f32 %v235_v14 }
 0x145   : > { %v483_v15 = vpop.eup %482 }
 0x146   : > { %v237_v17 = vmul.f32 %v483_v15, %v229_v4 }
 0x148   : > { %v244_v19 = vmul.f32 %v417_v16, %v237_v17 }
 0x14a   : > { %v251_v20 = vadd.f32 %v418_v18, %v244_v19 }
 0x14c   : > { %439 = vmatmul.mubr.msk.f32.vlgmr.msra.gmra.mxu0 %vm223_vm0, %v251_v20 }
 0x20c   : > { %v332_v22 = vpop.f32.mrf.mxu0 }
 0x20d   : > { %v333_v23 = vadd.f32 %v419_v21, %v332_v22 }
 0x20e   : > { %v440_v24 = vpop.f32.mrf.mxu0 }
 0x20f   : > { %337 = vst.msk [vmem:[%s215_s11] sm:$0xff] %vm336_vm2, %v333_v23 }
 0x210   : > { %497 = shalt.err (!%p494_p3)
}
 0x211   : > { %s498_s26 = scalar_lea.hbm %s661_s15, 128  ;;  %s502_s7 = scalar_lea.hbm %s701_s5, 256 }
 0x212   : > { %p499_p4 = scmp.ne.s32.totalorder %s661_s15, %s498_s26  ;;  %p503_p9 = scmp.lt.s32.totalorder %s661_s15, %s701_s5 }
 0x213   : > { %p504_p10 = scmp.lt.s32.totalorder %s502_s7, %s498_s26 }
 0x214   : > { %p500_p7 = pnand %p499_p4, %p617_p5 }
 0x215   : > { %p505_p11 = por %p504_p10, %p503_p9 }
 0x216   : > { %p501_p8 = pneg %p500_p7 }
 0x218   : > { %p506_p12 = pnand %p505_p11, %p501_p8 }
 0x21a   : > { %509 = shalt.err (!%p506_p12)
}
 0x21b   : > { %441 = dma.vmem_to_hbm [thread:$0]  (%p617_p5), %s353_s12, 128, %s661_s15, %s339_s16  }
 0x21c PF: > { %p447_p13 = scmp.ge.s32.totalorder %s544_s21, 2  ;;  %s364_s10 = sand.u32 1, %s532_s18  }
 0x21d   : > { %s365_s11 = scalar_lea.sflag [#allocation3], %s364_s10 }
 0x21e   : > { %p444_p0 = pnand %p447_p13, %p621_p6 }
 0x220   : > { %p445_p1 = pneg %p444_p0 }
 0x222   : > { %527 = dma.done.wait (%p445_p1), %s365_s11, 128  }
 0x223   : > { %529 = vsyncadd (%p445_p1), %s365_s11, 4294967168  ;;  %p15_p2 = scmp.ge.s32.totalorder %s604_s24, 4   ;;  %s704_s18 = smov %s536_s19 }
 0x224   : > { %s705_s19 = smov %s540_s20  ;;  %s706_s20 = smov %s615_s27 }
 0x225   : > { %s707_s21 = smov %s604_s24  ;;  %17 = sbr.rel (!%p15_p2) target bundleno = 3 (0x3), region = 75 }
 0x22a   :  { %370 = vsyncpa [#allocation3], 1 }
 0x22b   :  { %372 = vsyncpa [#allocation3 + $0x1], 1 }

// kernel: seq2seq_transformer_forward.18
= control target key start
LH: loop header
LB: loop body
LE: loop exit
PB: predicated region body
PF: predicated region fallthrough
CT: control target
= control target key end

     0   :  { %s1732_s13 = smov 0   ;;  %s1929_s0 = inlined_call_operand.vmem [shape: f32[2,8,32], index: 0, kind: input, shape index: {}]   ;;  %s1930_s1 = inlined_call_operand.vmem [shape: f32[2,10,32], index: 1, kind: input, shape index: {}]   ;;  %s1931_s2 = inlined_call_operand.vmem [shape: f32[32,32], index: 2, kind: input, shape index: {}]   ;;  %s1932_s3 = inlined_call_operand.vmem [shape: f32[1,32], index: 3, kind: input, shape index: {}]   ;;  %s1933_s4 = inlined_call_operand.vmem [shape: f32[32,64], index: 4, kind: input, shape index: {}]   ;;  %s1934_s5 = inlined_call_operand.vmem [shape: f32[1,64], index: 5, kind: input, shape index: {}]   ;;  %s1935_s6 = inlined_call_operand.vmem [shape: f32[32,32], index: 6, kind: input, shape index: {}]   ;;  %s1936_s7 = inlined_call_operand.vmem [shape: f32[1,32], index: 7, kind: input, shape index: {}]   ;;  %s1937_s8 = inlined_call_operand.vmem [shape: f32[1,32], index: 8, kind: input, shape index: {}]   ;;  %s1938_s9 = inlined_call_operand.vmem [shape: f32[1,32], index: 9, kind: input, shape index: {}]   ;;  %s1939_s10 = inlined_call_operand.vmem [shape: f32[2,8,32], index: 10, kind: output, shape index: {}]  }
   0x1 LB: > { %s1449_s14 = sadd.s32 4294967295, %s1663_s13   ;;  %p1453_p0 = scmp.ge.s32.totalorder %s1663_s13, 1  ;;  %s1663_s13 = sphi %s1732_s13, %s20_s13  }
   0x2   : > { %p321_p1 = scmp.lt.s32.totalorder %s1663_s13, 3 }
   0x4   : > { %p322_p2 = pnand %p1453_p0, %p321_p1 }
   0x5   : > { %p362_p3 = scmp.lt.s32.totalorder (!%p322_p2), %s1449_s14, 1  ;;  %s1667_s23 = smov (!%p322_p2), 96  }
   0x6   : > { %325 = sbr.rel (%p322_p2) target bundleno = 2578 (0xa12), region = 60  ;;  %s1668_s26 = smov (!%p322_p2), 120  }
   0x7   : > { %s1669_s27 = smov (!%p322_p2), 112   ;;  %s1670_s28 = smov (!%p322_p2), 88  }
   0x8   : > { %s1672_s11 = smov (!%p322_p2), 104   ;;  %s1673_s12 = smov (!%p322_p2), 72  }
   0x9   : > { %s1675_s16 = smov (!%p322_p2), 16   ;;  %s1676_s25 = smov (!%p322_p2), 24  }
   0xb   : > { %v466_v0 = vld [vmem:[%s1933_s4 + $0x18] sm:$0xff]  ;;  %v465_v1 = vld [vmem:[%s1933_s4 + $0x10] sm:$0xff]  ;;  %v1665_v2 = vmov 0.0   ;;  %v464_v5 = vld [vmem:[%s1933_s4 + $0x8] sm:$0xff]  ;;  %s1941_s14 = smov (!%p362_p3, %s1449_s14), 1  ;;  %vm389_vm0 = vcmask 261120  }
   0xc   : > { %1541 = vmatprep.subr.mxu1 %v466_v0  ;;  %1530 = vmatprep.subr.mxu0 %v1665_v2  ;;  %v381_v3 = vld [vmem:[%s1931_s2 + $0x18] sm:$0xff]  ;;  %v380_v4 = vld [vmem:[%s1931_s2 + $0x10] sm:$0xff]  ;;  %v379_v6 = vld [vmem:[%s1931_s2 + $0x8] sm:$0xff]  ;;  %s1489_s29 = sshll.u32 %s1941_s14, 4  ;;  %s1454_s30 = sshll.u32 %s1941_s14, 3  ;;  %vm1666_vm1 = vmmov 0  }
   0xd   : > { %1542 = vmatpush3.msra.mxu1 %v466_v0  ;;  %1531 = vmatpush3.msra.mxu0 %v381_v3  ;;  %v463_v7 = vld [vmem:[%s1933_s4] sm:$0xff]  ;;  %s370_s15 = scalar_lea.vmem %s1930_s1, %s1489_s29  ;;  %s365_s18 = scalar_lea.vmem %s1929_s0, %s1454_s30  ;;  %vm555_vm2 = vcmask 64512   ;;  %vm656_vm3 = vcmask 1041408   ;;  %vm636_vm4 = vcmask 80896   ;;  %vm1264_vm5 = vcmask 130048  }
   0xe   : > { %1543 = vmatprep.subr.mxu1 %v465_v1  ;;  %1532 = vmatprep.subr.mxu0 %v1665_v2  ;;  %v376_v8 = vld [vmem:[%s370_s15] sm:$0xff]  ;;  %v377_v9 = vld [vmem:[%s370_s15 + $0x8] sm:$0x3]  ;;  %s1671_s29 = smov 80   ;;  %s1674_s15 = smov 8   ;;  %vm1266_vm6 = vcmask 195584  }
   0xf   : > { %1544 = vmatpush3.msra.mxu1 %v465_v1  ;;  %1533 = vmatpush3.msra.mxu0 %v380_v4  ;;  %v378_v10 = vld [vmem:[%s1931_s2] sm:$0xff]  ;;  %s374_s17 = scalar_lea.vmem %s1939_s10, %s1454_s30 }
  0x10   : > { %1545 = vmatprep.subr.mxu1 %v464_v5  ;;  %1534 = vmatprep.subr.mxu0 %v1665_v2  ;;  %v1781_v11 = vld [vmem:[%s365_s18] sm:$0xff] }
  0x11   : > { %1546 = vmatpush3.msra.mxu1 %v464_v5  ;;  %1535 = vmatpush3.msra.mxu0 %v379_v6  ;;  %v1460_v12 = vld [vmem:[%s1934_s5] ss:$0 sm:$0xff] }
  0x12   : > { %1547 = vmatprep.subr.mxu1 %v463_v7  ;;  %1549 = vmatprep.mubr.msk.f32.mxu1 %vm389_vm0, %v376_v8  ;;  %v1458_v17 = vld [vmem:[%s1932_s3] ss:$0 sm:$0xff] }
  0x13   : > { %1548 = vmatpush3.msra.mxu1 %v463_v7  ;;  %1536 = vmatprep.subr.mxu0 %v1665_v2 }
  0x14   : > { %1550 = vmatmul.mubr.msk.f32.vlgmr.msra.gmra.mxu1 %vm389_vm0, %v377_v9  ;;  %1537 = vmatpush3.msra.mxu0 %v378_v10 }
  0x15   : > { %1538 = vmatprep.mubr.msk.f32.mxu0 %vm1666_vm1, %v1665_v2  ;;  %1552 = vmatprep.subr.mxu0 %v1665_v2 }
  0x16   : > { %1539 = vmatmul.mubr.msk.f32.vlgmr.msra.gmra.mxu0 %vm389_vm0, %v1781_v11  ;;  %1559 = vmatprep.subr.mxu1 %v1665_v2 }
  0x17   : > { %1556 = vmatprep.mubr.msk.f32.mxu0 %vm1666_vm1, %v1665_v2  ;;  %1563 = vmatprep.mubr.msk.f32.mxu1 %vm1666_vm1, %v1665_v2 }
  0xd4   : > { %v1551_v13 = vpop.f32.mrf.mxu1 }
  0xd5   : > { %v1797_v14 = vadd.f32 %v1551_v13, %v1460_v12 }
  0xd6   : > { %v546_v15 = vpop.f32.mrf.mxu1  ;;  %v459_v16 = vpop.f32.mrf.mxu0 }
  0xd7   : > { %650 = vrot.lane.b32.xlu1 %v1797_v14, %s1667_s23  ;;  %1553 = vmatpush3.xpose.msk.msra.mxu0 %vm555_vm2, %v1797_v14  ;;  %v1806_v19 = vadd.f32 %v1460_v12, %v546_v15  ;;  %v1808_v20 = vadd.f32 %v1458_v17, %v459_v16 }
  0xd8   : > { %1554 = vmatprep.subr.mxu0 %v1665_v2  ;;  %v1540_v18 = vpop.f32.mrf.mxu0 }
  0xdb   : > { %648 = vrot.lane.b32.xlu1 %v1806_v19, %s1667_s23  ;;  %1555 = vmatpush3.xpose.msk.msra.mxu0 %vm555_vm2, %v1806_v19 }
  0xdc   : > { %1580 = vmatprep.subr.mxu0 %v1665_v2 }
  0xde   : > { %1557 = vmatmul.mubr.msk.f32.vlgmr.msra.gmra.mxu0 %vm555_vm2, %v1808_v20 }
  0xdf   : > { %731 = vrot.lane.b32.xlu1 %v1806_v19, %s1668_s26  ;;  %1584 = vmatprep.mubr.msk.f32.mxu0 %vm1666_vm1, %v1665_v2 }
  0xe3   : > { %907 = vrot.lane.b32.xlu1 %v1797_v14, %s1669_s27 }
  0xe7   : > { %729 = vrot.lane.b32.xlu1 %v1808_v20, %s1668_s26 }
  0xeb   : > { %905 = vrot.lane.b32.xlu1 %v1806_v19, %s1669_s27 }
  0xef   : > { %903 = vrot.lane.b32.xlu1 %v1808_v20, %s1669_s27 }
 0x149   : > { %v651_v21 = vpop.permute.xlu1 %650 }
 0x14a   : > { %1560 = vmatpush3.msk.msra.mxu1 %vm656_vm3, %v651_v21 }
 0x14b   : > { %1561 = vmatprep.subr.mxu1 %v1665_v2 }
 0x14d   : > { %v649_v22 = vpop.permute.xlu1 %648 }
 0x14e   : > { %1562 = vmatpush3.msra.mxu1 %v649_v22 }
 0x14f   : > { %1566 = vmatprep.subr.mxu1 %v1665_v2 }
 0x151   : > { %v732_v23 = vpop.permute.xlu1 %731 }
 0x155   : > { %v908_v24 = vpop.permute.xlu1 %907 }
 0x156   : > { %1581 = vmatpush3.xpose.msk.msra.mxu0 %vm555_vm2, %v908_v24 }
 0x157   : > { %1582 = vmatprep.subr.mxu0 %v1665_v2 }
 0x159   : > { %v730_v25 = vpop.permute.xlu1 %729 }
 0x15d   : > { %v906_v26 = vpop.permute.xlu1 %905 }
 0x15e   : > { %1583 = vmatpush3.xpose.msk.msra.mxu0 %vm555_vm2, %v906_v26 }
 0x15f   : > { %1601 = vmatprep.subr.mxu0 %v1665_v2 }
 0x161   : > { %v904_v27 = vpop.permute.xlu1 %903 }
 0x162   : > { %1585 = vmatmul.mubr.msk.f32.vlgmr.msra.gmra.mxu0 %vm555_vm2, %v904_v27 }
 0x163   : > { %1605 = vmatprep.mubr.msk.f32.mxu0 %vm1666_vm1, %v1665_v2 }
 0x19e   : > { %v631_v28 = vpop.f32.mrf.mxu0 }
 0x19f   : > { %v635_v29 = vmul.f32 0.35355338, %v631_v28 }
 0x1a0   : > { %v1558_v30 = vpop.f32.mrf.mxu0 }
 0x1a1   : > { %v637_v31 = vsel %vm636_vm4, %v635_v29, -inf }
 0x1a2   : > { %638 = vmax.xlane.f32.xlu0 %v637_v31  ;;  %v1271_v31 = vld [vmem:[%s1935_s6 + $0x18] sm:$0xff] }
 0x222   : > { %v981_v32 = vpop.f32.mrf.mxu0 }
 0x223   : > { %v985_v39 = vmul.f32 0.35355338, %v981_v32  ;;  %v1269_v32 = vld [vmem:[%s1935_s6 + $0x8] sm:$0xff] }
 0x224   : > { %v1586_v33 = vpop.f32.mrf.mxu0 }
 0x225   : > { %v986_v40 = vsel %vm636_vm4, %v985_v39, -inf  ;;  %v1268_v33 = vld [vmem:[%s1935_s6] sm:$0xff] }
 0x22b   : > { %v639_v34 = vpop.xlane.xlu0 %638 }
 0x22c   : > { %v640_v35 = vsub.f32 %v635_v29, %v639_v34 }
 0x22e   : > { %v641_v36 = vmul.f32 1.442695, %v640_v35 }
 0x230   : > { %1639 = vpow2.f32 %v641_v36 }
 0x23d   : > { %v1640_v37 = vpop.eup %1639 }
 0x23e   : > { %v643_v38 = vsel %vm636_vm4, %v1640_v37, 0.0 }
 0x23f   : > { %644 = vadd.xlane.f32.xlu0 %v643_v38 }
 0x255   : > { %733 = vrot.lane.b32.xlu0 %v1797_v14, %s1668_s26 }
 0x274   : > { %987 = vmax.xlane.f32.xlu0 %v986_v40 }
 0x28a   : > { %825 = vrot.lane.b32.xlu0 %v1797_v14, %s1670_s28 }
 0x2c8   : > { %v645_v41 = vpop.xlane.xlu0 %644 }
 0x2c9   : > { %1641 = vrcp.f32 %v645_v41 }
 0x2cc   : > { %v734_v44 = vpop.permute.xlu0 %733 }
 0x2d6   : > { %v1642_v42 = vpop.eup %1641 }
 0x2d7   : > { %v647_v43 = vmul.f32 %v1642_v42, %v1640_v37 }
 0x2d9   : > { %1564 = vmatmul.mubr.msk.f32.vlgmr.msra.gmra.mxu1 %vm636_vm4, %v647_v43 }
 0x2da   : > { %1567 = vmatpush3.xpose.msk.msra.mxu1 %vm555_vm2, %v734_v44  ;;  %1570 = vmatprep.mubr.msk.f32.mxu1 %vm1666_vm1, %v1665_v2 }
 0x2db   : > { %1568 = vmatprep.subr.mxu1 %v1665_v2 }
 0x2de   : > { %1569 = vmatpush3.xpose.msk.msra.mxu1 %vm555_vm2, %v732_v23 }
 0x2df   : > { %1573 = vmatprep.subr.mxu1 %v1665_v2 }
 0x2e1   : > { %1571 = vmatmul.mubr.msk.f32.vlgmr.msra.gmra.mxu1 %vm555_vm2, %v730_v25 }
 0x2e2   : > { %1577 = vmatprep.mubr.msk.f32.mxu1 %vm1666_vm1, %v1665_v2 }
 0x2fd   : > { %v988_v45 = vpop.xlane.xlu0 %987 }
 0x2fe   : > { %v989_v47 = vsub.f32 %v985_v39, %v988_v45 }
 0x300   : > { %v990_v48 = vmul.f32 1.442695, %v989_v47 }
 0x301   : > { %v826_v46 = vpop.permute.xlu0 %825 }
 0x302   : > { %1574 = vmatpush3.msk.msra.mxu1 %vm656_vm3, %v826_v46  ;;  %1643 = vpow2.f32 %v990_v48 }
 0x303   : > { %1575 = vmatprep.subr.mxu1 %v1665_v2 }
 0x30f   : > { %v1644_v55 = vpop.eup %1643 }
 0x310   : > { %v992_v56 = vsel %vm636_vm4, %v1644_v55, 0.0 }
 0x399   : > { %v1854_v49 = vpop.f32.mrf.mxu1 }
 0x39b   : > { %v1565_v50 = vpop.f32.mrf.mxu1 }
 0x3a1   : > { %v807_v51 = vpop.f32.mrf.mxu1 }
 0x3a2   : > { %v811_v52 = vmul.f32 0.35355338, %v807_v51 }
 0x3a3   : > { %v1572_v53 = vpop.f32.mrf.mxu1 }
 0x3a4   : > { %v812_v54 = vsel %vm636_vm4, %v811_v52, -inf }
 0x3a5   : > { %813 = vmax.xlane.f32.xlu1 %v812_v54 }
 0x3a9   : > { %993 = vadd.xlane.f32.xlu1 %v992_v56 }
 0x3ba   : > { %823 = vrot.lane.b32.xlu1 %v1806_v19, %s1670_s28 }
 0x3be   : > { %999 = vrot.lane.b32.xlu1 %v1797_v14, %s1671_s29 }
 0x3c2   : > { %1081 = vrot.lane.b32.xlu1 %v1797_v14, %s1672_s11 }
 0x3c6   : > { %1077 = vrot.lane.b32.xlu1 %v1808_v20, %s1672_s11 }
 0x42e   : > { %v814_v57 = vpop.xlane.xlu1 %813 }
 0x42f   : > { %v815_v58 = vsub.f32 %v811_v52, %v814_v57  ;;  %v1486_v57 = vld [vmem:[%s1938_s9] ss:$0 sm:$0xff] }
 0x431   : > { %v816_v59 = vmul.f32 1.442695, %v815_v58 }
 0x432   : > { %v994_v60 = vpop.xlane.xlu1 %993 }
 0x433   : > { %1645 = vpow2.f32 %v816_v59 }
 0x436   : > { %v824_v61 = vpop.permute.xlu1 %823 }
 0x437   : > { %1576 = vmatpush3.msra.mxu1 %v824_v61 }
 0x438   : > { %1587 = vmatprep.subr.mxu1 %v1665_v2 }
 0x43a   : > { %v1000_v3 = vpop.permute.xlu1 %999 }
 0x43e   : > { %v1082_v8 = vpop.permute.xlu1 %1081 }
 0x440   : > { %v1646_v62 = vpop.eup %1645 }
 0x441   : > { %v818_v63 = vsel %vm636_vm4, %v1646_v62, 0.0 }
 0x442   : > { %819 = vadd.xlane.f32.xlu0 %v818_v63  ;;  %v1078_v10 = vpop.permute.xlu1 %1077 }
 0x458   : > { %997 = vrot.lane.b32.xlu0 %v1806_v19, %s1671_s29 }
 0x45c   : > { %1079 = vrot.lane.b32.xlu0 %v1806_v19, %s1672_s11 }
 0x4cb   : > { %v820_v0 = vpop.xlane.xlu0 %819 }
 0x4cc   : > { %1647 = vrcp.f32 %v820_v0 }
 0x4cd   : > { %1649 = vrcp.f32 %v994_v60 }
 0x4cf   : > { %v998_v6 = vpop.permute.xlu0 %997 }
 0x4d3   : > { %v1080_v9 = vpop.permute.xlu0 %1079 }
 0x4d9   : > { %v1648_v1 = vpop.eup %1647 }
 0x4da   : > { %v822_v4 = vmul.f32 %v1648_v1, %v1646_v62  ;;  %v1650_v5 = vpop.eup %1649 }
 0x4db   : > { %v996_v7 = vmul.f32 %v1650_v5, %v1644_v55 }
 0x4dc   : > { %1578 = vmatmul.mubr.msk.f32.vlgmr.msra.gmra.mxu1 %vm636_vm4, %v822_v4 }
 0x4dd   : > { %1588 = vmatpush3.msk.msra.mxu1 %vm656_vm3, %v1000_v3  ;;  %1591 = vmatprep.mubr.msk.f32.mxu1 %vm1666_vm1, %v1665_v2 }
 0x4de   : > { %1589 = vmatprep.subr.mxu1 %v1665_v2 }
 0x4df   : > { %1590 = vmatpush3.msra.mxu1 %v998_v6 }
 0x4e0   : > { %1594 = vmatprep.subr.mxu1 %v1665_v2  ;;  %1592 = vmatmul.mubr.msk.f32.vlgmr.msra.gmra.mxu1 %vm636_vm4, %v996_v7 }
 0x4e1   : > { %1595 = vmatpush3.xpose.msk.msra.mxu1 %vm555_vm2, %v1082_v8  ;;  %1598 = vmatprep.mubr.msk.f32.mxu1 %vm1666_vm1, %v1665_v2 }
 0x4e2   : > { %1596 = vmatprep.subr.mxu1 %v1665_v2 }
 0x4e5   : > { %1597 = vmatpush3.xpose.msk.msra.mxu1 %vm555_vm2, %v1080_v9 }
 0x4e8   : > { %1599 = vmatmul.mubr.msk.f32.vlgmr.msra.gmra.mxu1 %vm555_vm2, %v1078_v10 }
 0x59c   : > { %v899_v12 = vpop.f32.mrf.mxu1 }
 0x59e   : > { %v1579_v13 = vpop.f32.mrf.mxu1 }
 0x5a0   : > { %v1073_v15 = vpop.f32.mrf.mxu1 }
 0x5a2   : > { %v1593_v16 = vpop.f32.mrf.mxu1 }
 0x5a8   : > { %v1155_v17 = vpop.f32.mrf.mxu1 }
 0x5a9   : > { %v1159_v18 = vmul.f32 0.35355338, %v1155_v17 }
 0x5aa   : > { %v1600_v20 = vpop.f32.mrf.mxu1 }
 0x5ab   : > { %v1160_v21 = vsel %vm636_vm4, %v1159_v18, -inf }
 0x5ac   : > { %1161 = vmax.xlane.f32.xlu0 %v1160_v21 }
 0x5c2   : > { %1173 = vrot.lane.b32.xlu0 %v1797_v14, %s1673_s12 }
 0x5c6   : > { %1252 = vrot.lane.b32.xlu0 %v899_v12, %s1674_s15 }
 0x635   : > { %v1162_v22 = vpop.xlane.xlu0 %1161 }
 0x636   : > { %v1163_v23 = vsub.f32 %v1159_v18, %v1162_v22 }
 0x638   : > { %v1164_v24 = vmul.f32 1.442695, %v1163_v23 }
 0x639   : > { %v1174_v25 = vpop.permute.xlu0 %1173 }
 0x63a   : > { %1651 = vpow2.f32 %v1164_v24  ;;  %1602 = vmatpush3.msk.msra.mxu0 %vm656_vm3, %v1174_v25 }
 0x63b   : > { %1603 = vmatprep.subr.mxu0 %v1665_v2 }
 0x63d   : > { %v1253_v36 = vpop.permute.xlu0 %1252 }
 0x63e   : > { %v1263_v38 = vsel %vm555_vm2, %v1854_v49, %v1253_v36 }
 0x647   : > { %v1652_v26 = vpop.eup %1651 }
 0x648   : > { %v1166_v27 = vsel %vm636_vm4, %v1652_v26, 0.0 }
 0x649   : > { %1167 = vadd.xlane.f32.xlu1 %v1166_v27 }
 0x65a   : > { %1171 = vrot.lane.b32.xlu1 %v1806_v19, %s1673_s12  ;;  %v1270_v19 = vld [vmem:[%s1935_s6 + $0x10] sm:$0xff] }
 0x65e   : > { %1256 = vrot.lane.b32.xlu1 %v1073_v15, %s1675_s16 }
 0x6d2   : > { %v1168_v14 = vpop.xlane.xlu1 %1167 }
 0x6d3   : > { %1653 = vrcp.f32 %v1168_v14 }
 0x6d6   : > { %v1172_v28 = vpop.permute.xlu1 %1171 }
 0x6d7   : > { %1604 = vmatpush3.msra.mxu0 %v1172_v28 }
 0x6d8   : > { %1608 = vmatprep.subr.mxu0 %v1665_v2 }
 0x6da   : > { %v1257_v37 = vpop.permute.xlu1 %1256 }
 0x6db   : > { %v1265_v39 = vsel %vm1264_vm5, %v1263_v38, %v1257_v37 }
 0x6e0   : > { %v1654_v29 = vpop.eup %1653 }
 0x6e1   : > { %v1170_v30 = vmul.f32 %v1654_v29, %v1652_v26 }
 0x6e3   : > { %1606 = vmatmul.mubr.msk.f32.vlgmr.msra.gmra.mxu0 %vm636_vm4, %v1170_v30 }
 0x6e4   : > { %1616 = vmatprep.mubr.msk.f32.mxu0 %vm1666_vm1, %v1665_v2  ;;  %1609 = vmatpush3.msra.mxu0 %v1271_v31 }
 0x6e5   : > { %1610 = vmatprep.subr.mxu0 %v1665_v2 }
 0x6e6   : > { %1611 = vmatpush3.msra.mxu0 %v1270_v19 }
 0x6e7   : > { %1612 = vmatprep.subr.mxu0 %v1665_v2 }
 0x6e8   : > { %1613 = vmatpush3.msra.mxu0 %v1269_v32 }
 0x6e9   : > { %1614 = vmatprep.subr.mxu0 %v1665_v2  ;;  %v1483_v2 = vld [vmem:[%s1936_s7] ss:$0 sm:$0xff] }
 0x6ea   : > { %1615 = vmatpush3.msra.mxu0 %v1268_v33 }
 0x7a3   : > { %v1247_v34 = vpop.f32.mrf.mxu0 }
 0x7a4   : > { %1260 = vrot.lane.b32.xlu0 %v1247_v34, %s1676_s25 }
 0x7a5   : > { %v1607_v35 = vpop.f32.mrf.mxu0 }
 0x816   : > { %v1261_v40 = vpop.permute.xlu0 %1260 }
 0x817   : > { %v1267_v41 = vsel %vm1266_vm6, %v1265_v39, %v1261_v40 }
 0x818   : > { %1617 = vmatmul.mubr.msk.f32.vlgmr.msra.gmra.mxu0 %vm389_vm0, %v1267_v41 }
 0x8d8   : > { %v1348_v42 = vpop.f32.mrf.mxu0 }
 0x8d9   : > { %v1349_v43 = vadd.f32 %v1483_v2, %v1348_v42 }
 0x8da   : > { %v1618_v44 = vpop.f32.mrf.mxu0 }
 0x8db   : > { %v1352_v45 = vadd.f32 %v1349_v43, %v1781_v11  ;;  %v1485_v11 = vld [vmem:[%s1937_s8] ss:$0 sm:$0xff] }
 0x8dd   : > { %v1355_v46 = vsel %vm389_vm0, %v1352_v45, 0.0 }
 0x8de   : > { %1356 = vadd.xlane.f32.xlu1 %v1355_v46 }
 0x967   : > { %v1357_v47 = vpop.xlane.xlu1 %1356 }
 0x968   : > { %v1359_v48 = vmul.f32 0.03125, %v1357_v47 }
 0x96a   : > { %v1360_v49 = vsub.f32 %v1352_v45, %v1359_v48 }
 0x96c   : > { %v1361_v50 = vmul.f32 %v1360_v49, %v1360_v49 }
 0x96e   : > { %v1362_v51 = vsel %vm389_vm0, %v1361_v50, 0.0 }
 0x96f   : > { %1363 = vadd.xlane.f32.xlu0 %v1362_v51 }
 0x9f8   : > { %v1364_v52 = vpop.xlane.xlu0 %1363 }
 0x9f9   : > { %v1365_v53 = vmul.f32 0.03125, %v1364_v52 }
 0x9fb   : > { %v1366_v54 = vadd.f32 1e-05, %v1365_v53 }
 0x9fd   : > { %1655 = vrsqrt.f32 %v1366_v54 }
 0xa0a   : > { %v1656_v55 = vpop.eup %1655 }
 0xa0b   : > { %v1368_v56 = vmul.f32 %v1656_v55, %v1360_v49 }
 0xa0d   : > { %v1375_v58 = vmul.f32 %v1485_v11, %v1368_v56 }
 0xa0f   : > { %v1382_v59 = vadd.f32 %v1486_v57, %v1375_v58 }
 0xa11   : > { %1383 = vst.msk [vmem:[%s374_s17] sm:$0xff] %vm389_vm0, %v1382_v59 }
 0xa12 PF: > { %s20_s13 = sadd.s32 1, %s1663_s13  }
 0xa13   : > { %p17_p4 = scmp.ge.s32.totalorder %s20_s13, 4  }
 0xa15   :  { %19 = sbr.rel (!%p17_p4) target bundleno = 1 (0x1), region = 93 }

</bundles_post_ra>
